<compile_context>
chip_gen: v7x
topology: tpu7x:2x2x1
jax: 0.10.0
libtpu: 0.0.40
codegen_flags: <defaults>
</compile_context>

<pallas_src>
import math
import functools

import jax
import jax.numpy as jnp
from jax.experimental import pallas as pl
from jax.experimental.pallas import tpu as pltpu

# ----------------------------- small config ---------------------------------
NUM_LAYERS = 2          # (module default 8; kept small for the demo)
NUM_HEADS = 4
HIDDEN = 64             # (module default 512)
INTERMEDIATE = 128      # (module default 2048)
VOCAB = 69
VOCAB_PAD = 128         # lane-dense output width (padded, sliced back to VOCAB)
MAX_POS = 22
NUM_CLASSES = 10        # unused in pretrain mode
HEAD_DIM = HIDDEN // NUM_HEADS
LN_EPS = 1e-12          # BertConfig.layer_norm_eps default
NEG_INF = float(jnp.finfo(jnp.float32).min)   # HF extended-attention-mask fill

BATCH = 2
SEQ = 16                # <= MAX_POS


# ----------------------------- kernel helpers --------------------------------
def _erf(x):
    # Abramowitz & Stegun 7.1.26 rational approximation, |err| <= 1.5e-7
    # (erf-GELU to ~f32 precision; only exp/mul/add needed in Mosaic).
    a1, a2, a3, a4, a5 = 0.254829592, -0.284496736, 1.421413741, -1.453152027, 1.061405429
    p = 0.3275911
    ax = jnp.abs(x)
    t = 1.0 / (1.0 + p * ax)
    poly = ((((a5 * t + a4) * t + a3) * t + a2) * t + a1) * t
    y = 1.0 - poly * jnp.exp(-ax * ax)
    return jnp.where(x >= 0.0, y, -y)


def _layer_norm(x, g, b):
    mean = jnp.mean(x, axis=-1, keepdims=True)
    var = jnp.mean(jnp.square(x - mean), axis=-1, keepdims=True)
    return (x - mean) * jax.lax.rsqrt(var + LN_EPS) * g + b


# ----------------------------- fused whole-model kernel ----------------------
def _bertax_kernel(emb_ref, mask_ref,
                   emb_g_ref, emb_b_ref,
                   wqkv_ref, bqkv_ref, wo_ref, bo_ref,
                   ln1_g_ref, ln1_b_ref,
                   w1_ref, b1_ref, w2_ref, b2_ref,
                   ln2_g_ref, ln2_b_ref,
                   mlm_w_ref, mlm_b_ref,
                   out_ref,
                   ctx_ref,
                   *, batch, seq, num_heads):
    hidden = emb_ref.shape[1]
    head_dim = hidden // num_heads
    num_layers = wqkv_ref.shape[0]
    scale = 1.0 / math.sqrt(head_dim)

    # ---- embeddings: LayerNorm only (word+pos+type sum done outside; no zero residual) ----
    h = _layer_norm(emb_ref[...], emb_g_ref[...], emb_b_ref[...])

    # attention mask -> keep predicate, computed ONCE for all layers / heads
    keep_b = (mask_ref[...] > 0.0)[:, None, :]          # [B, 1, S]

    for l in range(num_layers):                          # static unroll (small L)
        # ---- fused QKV projection: one [B*S, H] x [H, 3H] MXU pass ----
        qkv = jnp.dot(h, wqkv_ref[l], preferred_element_type=jnp.float32) + bqkv_ref[l]
        q = qkv[:, :hidden].reshape(batch, seq, hidden)
        k = qkv[:, hidden:2 * hidden].reshape(batch, seq, hidden)
        v = qkv[:, 2 * hidden:].reshape(batch, seq, hidden)

        # ---- attention: all batch elements at once per head (batched einsum) ----
        for hh in range(num_heads):                      # static unroll (4 heads)
            c0, c1 = hh * head_dim, (hh + 1) * head_dim
            qh, kh, vh = q[:, :, c0:c1], k[:, :, c0:c1], v[:, :, c0:c1]
            scores = jnp.einsum('bqd,bkd->bqk', qh, kh,
                                preferred_element_type=jnp.float32) * scale
            scores = jnp.where(keep_b, scores, NEG_INF)            # HF padding mask
            scores = scores - jnp.max(scores, axis=-1, keepdims=True)
            p = jnp.exp(scores)
            p = p * pl.reciprocal(jnp.sum(p, axis=-1, keepdims=True), approx=True)
            ch = jnp.einsum('bqk,bkd->bqd', p, vh,
                            preferred_element_type=jnp.float32)
            ctx_ref[:, c0:c1] = ch.reshape(batch * seq, head_dim)  # merge heads in VMEM

        # ---- output projection + Add & LN ----
        attn_out = jnp.dot(ctx_ref[...], wo_ref[l],
                           preferred_element_type=jnp.float32) + bo_ref[l]
        h = _layer_norm(attn_out + h, ln1_g_ref[l], ln1_b_ref[l])

        # ---- FFN (exact erf-GELU) + Add & LN ----
        ffn = jnp.dot(h, w1_ref[l], preferred_element_type=jnp.float32) + b1_ref[l]
        ffn = 0.5 * ffn * (1.0 + _erf(ffn * (1.0 / math.sqrt(2.0))))
        ffn = jnp.dot(ffn, w2_ref[l], preferred_element_type=jnp.float32) + b2_ref[l]
        h = _layer_norm(ffn + h, ln2_g_ref[l], ln2_b_ref[l])

    # ---- MLM head: lane-dense padded vocab (69 -> 128), unmasked vst ----
    out_ref[...] = jnp.dot(h, mlm_w_ref[...],
                           preferred_element_type=jnp.float32) + mlm_b_ref[...]
    # TODO(synk): at the real config (H=512, I=2048, 8 layers) switch matmul inputs to
    # bf16 (f32 accumulate), add a tiled GridSpec with a 'parallel' batch axis for
    # v7x's dual TensorCores, and re-derive VMEM budget against 64 MiB.


# ----------------------------- parameters -----------------------------------
def init_params(key):
    ks = iter(jax.random.split(key, 16 + 16 * NUM_LAYERS))

    def nrm(shape):
        return jax.random.normal(next(ks), shape, jnp.float32) * 0.02

    zeros = lambda n: jnp.zeros((n,), jnp.float32)
    ones = lambda n: jnp.ones((n,), jnp.float32)

    p = {
        "word_emb": nrm((VOCAB, HIDDEN)),
        "pos_emb": nrm((MAX_POS, HIDDEN)),
        "type_emb": nrm((2, HIDDEN)),
        "emb_ln_g": ones(HIDDEN), "emb_ln_b": zeros(HIDDEN),
        "mlm_w": nrm((HIDDEN, VOCAB)), "mlm_b": zeros(VOCAB),
        # TODO(synk): classification head (pooler tanh + 2-layer MLP) is only used in
        # 'classify' mode; default forward ('pretrain') never touches it, so it is omitted.
        "layers": [],
    }
    for _ in range(NUM_LAYERS):
        p["layers"].append({
            "wq": nrm((HIDDEN, HIDDEN)), "bq": zeros(HIDDEN),
            "wk": nrm((HIDDEN, HIDDEN)), "bk": zeros(HIDDEN),
            "wv": nrm((HIDDEN, HIDDEN)), "bv": zeros(HIDDEN),
            "wo": nrm((HIDDEN, HIDDEN)), "bo": zeros(HIDDEN),
            "attn_ln_g": ones(HIDDEN), "attn_ln_b": zeros(HIDDEN),
            "w1": nrm((HIDDEN, INTERMEDIATE)), "b1": zeros(INTERMEDIATE),
            "w2": nrm((INTERMEDIATE, HIDDEN)), "b2": zeros(HIDDEN),
            "ffn_ln_g": ones(HIDDEN), "ffn_ln_b": zeros(HIDDEN),
        })
    return p


def pack_params(p):
    """One-time repack (outside jit): stack per-layer weights along a leading L axis,
    fuse Q/K/V into [H, 3H], pad MLM head to lane-dense 128 columns."""
    layers = p["layers"]

    def stk(name):
        return jnp.stack([l[name] for l in layers])

    def stk_row(name):   # biases / LN params as [L, 1, N] (row-broadcastable in kernel)
        return jnp.stack([l[name][None, :] for l in layers])

    packed = {
        "word_emb": p["word_emb"], "pos_emb": p["pos_emb"], "type_emb": p["type_emb"],
        "emb_ln_g": p["emb_ln_g"][None, :], "emb_ln_b": p["emb_ln_b"][None, :],
        "wqkv": jnp.stack([jnp.concatenate([l["wq"], l["wk"], l["wv"]], axis=1)
                           for l in layers]),                       # [L, H, 3H]
        "bqkv": jnp.stack([jnp.concatenate([l["bq"], l["bk"], l["bv"]])[None, :]
                           for l in layers]),                       # [L, 1, 3H]
        "wo": stk("wo"), "bo": stk_row("bo"),
        "ln1_g": stk_row("attn_ln_g"), "ln1_b": stk_row("attn_ln_b"),
        "w1": stk("w1"), "b1": stk_row("b1"),
        "w2": stk("w2"), "b2": stk_row("b2"),
        "ln2_g": stk_row("ffn_ln_g"), "ln2_b": stk_row("ffn_ln_b"),
        "mlm_w": jnp.zeros((HIDDEN, VOCAB_PAD), jnp.float32).at[:, :VOCAB].set(p["mlm_w"]),
        "mlm_b": jnp.zeros((1, VOCAB_PAD), jnp.float32).at[:, :VOCAB].set(p["mlm_b"]),
    }
    return packed


# ----------------------------- forward ---------------------------------------
def bertax_forward(packed, input_ids, attention_mask):
    """mode == 'pretrain': returns MLM logits [B, S, vocab_size]."""
    b, s = input_ids.shape

    # Embedding gather + word+pos+type sum (single fused XLA op; LN happens in-kernel).
    we = jnp.take(packed["word_emb"], input_ids, axis=0)          # [B, S, H]
    pe = packed["pos_emb"][:s][None, :, :]                        # [1, S, H]
    te = packed["type_emb"][0][None, None, :]                     # [1, 1, H] (token_type_ids = 0)
    emb = (we + pe + te).astype(jnp.float32).reshape(b * s, HIDDEN)

    mask_f = attention_mask.astype(jnp.float32)                   # [B, S]

    kernel = functools.partial(_bertax_kernel, batch=b, seq=s, num_heads=NUM_HEADS)
    logits_pad = pl.pallas_call(
        kernel,
        out_shape=jax.ShapeDtypeStruct((b * s, VOCAB_PAD), jnp.float32),
        scratch_shapes=[pltpu.VMEM((b * s, HIDDEN), jnp.float32)],   # merged-heads ctx
    )(emb, mask_f,
      packed["emb_ln_g"], packed["emb_ln_b"],
      packed["wqkv"], packed["bqkv"], packed["wo"], packed["bo"],
      packed["ln1_g"], packed["ln1_b"],
      packed["w1"], packed["b1"], packed["w2"], packed["b2"],
      packed["ln2_g"], packed["ln2_b"],
      packed["mlm_w"], packed["mlm_b"])

    return logits_pad[:, :VOCAB].reshape(b, s, VOCAB)


# ----------------------------- main ------------------------------------------
if __name__ == "__main__":
    key = jax.random.PRNGKey(0)
    k_par, k_ids = jax.random.split(key)

    params = init_params(k_par)
    packed = pack_params(params)            # one-time repack, outside jit

    input_ids = jax.random.randint(k_ids, (BATCH, SEQ), 0, VOCAB, dtype=jnp.int32)
    # batch 0 fully attended, batch 1 has 4 padding tokens at the end.
    attention_mask = jnp.concatenate(
        [jnp.ones((1, SEQ), jnp.int32),
         jnp.concatenate([jnp.ones((1, SEQ - 4), jnp.int32),
                          jnp.zeros((1, 4), jnp.int32)], axis=1)], axis=0)

    out = jax.jit(bertax_forward)(packed, input_ids, attention_mask)
    out = jax.block_until_ready(out)

    assert out.shape == (BATCH, SEQ, VOCAB), out.shape
    assert out.dtype == jnp.float32
    assert bool(jnp.all(jnp.isfinite(out)))
    print("KERNEL_OK")
</pallas_src>

<mosaic_0001>
module attributes {stable_mosaic.version = 11 : i64} {
  func.func @_bertax_kernel(%arg0: memref<32x64xf32, #tpu.memory_space<vmem>>, %arg1: memref<2x16xf32, #tpu.memory_space<vmem>>, %arg2: memref<1x64xf32, #tpu.memory_space<vmem>>, %arg3: memref<1x64xf32, #tpu.memory_space<vmem>>, %arg4: memref<2x64x192xf32, #tpu.memory_space<vmem>>, %arg5: memref<2x1x192xf32, #tpu.memory_space<vmem>>, %arg6: memref<2x64x64xf32, #tpu.memory_space<vmem>>, %arg7: memref<2x1x64xf32, #tpu.memory_space<vmem>>, %arg8: memref<2x1x64xf32, #tpu.memory_space<vmem>>, %arg9: memref<2x1x64xf32, #tpu.memory_space<vmem>>, %arg10: memref<2x64x128xf32, #tpu.memory_space<vmem>>, %arg11: memref<2x1x128xf32, #tpu.memory_space<vmem>>, %arg12: memref<2x128x64xf32, #tpu.memory_space<vmem>>, %arg13: memref<2x1x64xf32, #tpu.memory_space<vmem>>, %arg14: memref<2x1x64xf32, #tpu.memory_space<vmem>>, %arg15: memref<2x1x64xf32, #tpu.memory_space<vmem>>, %arg16: memref<64x128xf32, #tpu.memory_space<vmem>>, %arg17: memref<1x128xf32, #tpu.memory_space<vmem>>, %arg18: memref<32x128xf32, #tpu.memory_space<vmem>>, %arg19: memref<32x64xf32, #tpu.memory_space<vmem>>) attributes {dimension_semantics = [], scalar_prefetch = 0 : i64, scratch_operands = 1 : i64, tpu.core_type = #tpu.core_type<tc>} {
    %c0 = arith.constant 0 : index
    %c0_0 = arith.constant 0 : index
    %0 = vector.load %arg0[%c0, %c0_0] : memref<32x64xf32, #tpu.memory_space<vmem>>, vector<32x64xf32>
    %c0_1 = arith.constant 0 : index
    %c0_2 = arith.constant 0 : index
    %1 = vector.load %arg2[%c0_1, %c0_2] : memref<1x64xf32, #tpu.memory_space<vmem>>, vector<1x64xf32>
    %c0_3 = arith.constant 0 : index
    %c0_4 = arith.constant 0 : index
    %2 = vector.load %arg3[%c0_3, %c0_4] : memref<1x64xf32, #tpu.memory_space<vmem>>, vector<1x64xf32>
    %cst = arith.constant dense<0.000000e+00> : vector<32xf32>
    %3 = vector.multi_reduction <add>, %0, %cst [1] : vector<32x64xf32> to vector<32xf32>
    %4 = vector.shape_cast %3 : vector<32xf32> to vector<32x1xf32>
    %cst_5 = arith.constant 6.400000e+01 : f32
    %5 = vector.broadcast %cst_5 : f32 to vector<32x1xf32>
    %6 = arith.divf %4, %5 : vector<32x1xf32>
    %7 = vector.broadcast %6 : vector<32x1xf32> to vector<32x64xf32>
    %8 = arith.subf %0, %7 : vector<32x64xf32>
    %9 = arith.mulf %8, %8 : vector<32x64xf32>
    %cst_6 = arith.constant dense<0.000000e+00> : vector<32xf32>
    %10 = vector.multi_reduction <add>, %9, %cst_6 [1] : vector<32x64xf32> to vector<32xf32>
    %11 = vector.shape_cast %10 : vector<32xf32> to vector<32x1xf32>
    %cst_7 = arith.constant 6.400000e+01 : f32
    %12 = vector.broadcast %cst_7 : f32 to vector<32x1xf32>
    %13 = arith.divf %11, %12 : vector<32x1xf32>
    %14 = vector.broadcast %6 : vector<32x1xf32> to vector<32x64xf32>
    %15 = arith.subf %0, %14 : vector<32x64xf32>
    %cst_8 = arith.constant 9.99999996E-13 : f32
    %16 = vector.broadcast %cst_8 : f32 to vector<32x1xf32>
    %17 = arith.addf %13, %16 : vector<32x1xf32>
    %18 = math.rsqrt %17 : vector<32x1xf32>
    %19 = vector.broadcast %18 : vector<32x1xf32> to vector<32x64xf32>
    %20 = arith.mulf %15, %19 : vector<32x64xf32>
    %21 = vector.broadcast %1 : vector<1x64xf32> to vector<32x64xf32>
    %22 = arith.mulf %20, %21 : vector<32x64xf32>
    %23 = vector.broadcast %2 : vector<1x64xf32> to vector<32x64xf32>
    %24 = arith.addf %22, %23 : vector<32x64xf32>
    %c0_9 = arith.constant 0 : index
    %c0_10 = arith.constant 0 : index
    %25 = vector.load %arg1[%c0_9, %c0_10] : memref<2x16xf32, #tpu.memory_space<vmem>>, vector<2x16xf32>
    %cst_11 = arith.constant 0.000000e+00 : f32
    %26 = vector.broadcast %cst_11 : f32 to vector<2x16xf32>
    %27 = arith.cmpf ogt, %25, %26 : vector<2x16xf32>
    %28 = vector.shape_cast %27 : vector<2x16xi1> to vector<2x1x16xi1>
    %c0_12 = arith.constant 0 : index
    %c0_13 = arith.constant 0 : index
    %c0_14 = arith.constant 0 : index
    %29 = vector.load %arg4[%c0_12, %c0_13, %c0_14] : memref<2x64x192xf32, #tpu.memory_space<vmem>>, vector<1x64x192xf32>
    %30 = vector.shape_cast %29 : vector<1x64x192xf32> to vector<64x192xf32>
    %cst_15 = arith.constant dense<0.000000e+00> : vector<32x192xf32>
    %31 = tpu.matmul %24, %30, %cst_15 {dimension_numbers = #tpu.dot_dimension_numbers<[1], [0], [0], [1], [0, 0, 1, 1], [], []>} : vector<32x64xf32>, vector<64x192xf32>, vector<32x192xf32> -> vector<32x192xf32>
    %c0_16 = arith.constant 0 : index
    %c0_17 = arith.constant 0 : index
    %c0_18 = arith.constant 0 : index
    %32 = vector.load %arg5[%c0_16, %c0_17, %c0_18] : memref<2x1x192xf32, #tpu.memory_space<vmem>>, vector<1x1x192xf32>
    %33 = vector.shape_cast %32 : vector<1x1x192xf32> to vector<1x192xf32>
    %34 = vector.broadcast %33 : vector<1x192xf32> to vector<32x192xf32>
    %35 = arith.addf %31, %34 : vector<32x192xf32>
    %36 = vector.extract_strided_slice %35 {offsets = [0, 0], sizes = [32, 64], strides = [1, 1]} : vector<32x192xf32> to vector<32x64xf32>
    %37 = vector.shape_cast %36 : vector<32x64xf32> to vector<2x16x64xf32>
    %38 = vector.extract_strided_slice %35 {offsets = [0, 64], sizes = [32, 64], strides = [1, 1]} : vector<32x192xf32> to vector<32x64xf32>
    %39 = vector.shape_cast %38 : vector<32x64xf32> to vector<2x16x64xf32>
    %40 = vector.extract_strided_slice %35 {offsets = [0, 128], sizes = [32, 64], strides = [1, 1]} : vector<32x192xf32> to vector<32x64xf32>
    %41 = vector.shape_cast %40 : vector<32x64xf32> to vector<2x16x64xf32>
    %42 = vector.extract_strided_slice %37 {offsets = [0, 0, 0], sizes = [2, 16, 16], strides = [1, 1, 1]} : vector<2x16x64xf32> to vector<2x16x16xf32>
    %43 = vector.extract_strided_slice %39 {offsets = [0, 0, 0], sizes = [2, 16, 16], strides = [1, 1, 1]} : vector<2x16x64xf32> to vector<2x16x16xf32>
    %44 = vector.extract_strided_slice %41 {offsets = [0, 0, 0], sizes = [2, 16, 16], strides = [1, 1, 1]} : vector<2x16x64xf32> to vector<2x16x16xf32>
    "tpu.trace_start"() <{level = 10 : i32, message = "bqd,bkd->bqk"}> : () -> ()
    %cst_19 = arith.constant dense<0.000000e+00> : vector<2x16x16xf32>
    %45 = tpu.matmul %42, %43, %cst_19 {dimension_numbers = #tpu.dot_dimension_numbers<[2], [2], [1], [1], [0, 0, 0, 1, 1, 1], [0], [0]>} : vector<2x16x16xf32>, vector<2x16x16xf32>, vector<2x16x16xf32> -> vector<2x16x16xf32>
    "tpu.trace_stop"() : () -> ()
    %cst_20 = arith.constant 2.500000e-01 : f32
    %46 = vector.broadcast %cst_20 : f32 to vector<2x16x16xf32>
    %47 = arith.mulf %45, %46 : vector<2x16x16xf32>
    %cst_21 = arith.constant -3.40282347E+38 : f32
    %48 = vector.shape_cast %28 : vector<2x1x16xi1> to vector<2x1x16xi1>
    %49 = vector.broadcast %48 : vector<2x1x16xi1> to vector<2x16x16xi1>
    %50 = vector.broadcast %cst_21 : f32 to vector<2x16x16xf32>
    %51 = arith.select %49, %47, %50 : vector<2x16x16xi1>, vector<2x16x16xf32>
    %cst_22 = arith.constant dense<0xFF800000> : vector<2x16xf32>
    %52 = vector.multi_reduction <maximumf>, %51, %cst_22 [2] : vector<2x16x16xf32> to vector<2x16xf32>
    %53 = vector.shape_cast %52 : vector<2x16xf32> to vector<2x16x1xf32>
    %54 = vector.broadcast %53 : vector<2x16x1xf32> to vector<2x16x16xf32>
    %55 = arith.subf %51, %54 : vector<2x16x16xf32>
    %56 = math.exp %55 : vector<2x16x16xf32>
    %cst_23 = arith.constant dense<0.000000e+00> : vector<2x16xf32>
    %57 = vector.multi_reduction <add>, %56, %cst_23 [2] : vector<2x16x16xf32> to vector<2x16xf32>
    %58 = vector.shape_cast %57 : vector<2x16xf32> to vector<2x16x1xf32>
    %59 = tpu.reciprocal %58 {approx = true} : vector<2x16x1xf32> -> vector<2x16x1xf32>
    %60 = vector.broadcast %59 : vector<2x16x1xf32> to vector<2x16x16xf32>
    %61 = arith.mulf %56, %60 : vector<2x16x16xf32>
    "tpu.trace_start"() <{level = 10 : i32, message = "bqk,bkd->bqd"}> : () -> ()
    %cst_24 = arith.constant dense<0.000000e+00> : vector<2x16x16xf32>
    %62 = tpu.matmul %61, %44, %cst_24 {dimension_numbers = #tpu.dot_dimension_numbers<[2], [1], [1], [2], [0, 0, 0, 1, 1, 2], [0], [0]>} : vector<2x16x16xf32>, vector<2x16x16xf32>, vector<2x16x16xf32> -> vector<2x16x16xf32>
    "tpu.trace_stop"() : () -> ()
    %63 = vector.shape_cast %62 : vector<2x16x16xf32> to vector<32x16xf32>
    %c0_25 = arith.constant 0 : index
    %c0_26 = arith.constant 0 : index
    %64 = vector.load %arg19[%c0_25, %c0_26] : memref<32x64xf32, #tpu.memory_space<vmem>>, vector<32x16xf32>
    tpu.vector_store %arg19[%c0_25, %c0_26], %63 {strides = array<i32>} : memref<32x64xf32, #tpu.memory_space<vmem>>, vector<32x16xf32>,
    %65 = vector.extract_strided_slice %37 {offsets = [0, 0, 16], sizes = [2, 16, 16], strides = [1, 1, 1]} : vector<2x16x64xf32> to vector<2x16x16xf32>
    %66 = vector.extract_strided_slice %39 {offsets = [0, 0, 16], sizes = [2, 16, 16], strides = [1, 1, 1]} : vector<2x16x64xf32> to vector<2x16x16xf32>
    %67 = vector.extract_strided_slice %41 {offsets = [0, 0, 16], sizes = [2, 16, 16], strides = [1, 1, 1]} : vector<2x16x64xf32> to vector<2x16x16xf32>
    "tpu.trace_start"() <{level = 10 : i32, message = "bqd,bkd->bqk"}> : () -> ()
    %cst_27 = arith.constant dense<0.000000e+00> : vector<2x16x16xf32>
    %68 = tpu.matmul %65, %66, %cst_27 {dimension_numbers = #tpu.dot_dimension_numbers<[2], [2], [1], [1], [0, 0, 0, 1, 1, 1], [0], [0]>} : vector<2x16x16xf32>, vector<2x16x16xf32>, vector<2x16x16xf32> -> vector<2x16x16xf32>
    "tpu.trace_stop"() : () -> ()
    %cst_28 = arith.constant 2.500000e-01 : f32
    %69 = vector.broadcast %cst_28 : f32 to vector<2x16x16xf32>
    %70 = arith.mulf %68, %69 : vector<2x16x16xf32>
    %cst_29 = arith.constant -3.40282347E+38 : f32
    %71 = vector.shape_cast %28 : vector<2x1x16xi1> to vector<2x1x16xi1>
    %72 = vector.broadcast %71 : vector<2x1x16xi1> to vector<2x16x16xi1>
    %73 = vector.broadcast %cst_29 : f32 to vector<2x16x16xf32>
    %74 = arith.select %72, %70, %73 : vector<2x16x16xi1>, vector<2x16x16xf32>
    %cst_30 = arith.constant dense<0xFF800000> : vector<2x16xf32>
    %75 = vector.multi_reduction <maximumf>, %74, %cst_30 [2] : vector<2x16x16xf32> to vector<2x16xf32>
    %76 = vector.shape_cast %75 : vector<2x16xf32> to vector<2x16x1xf32>
    %77 = vector.broadcast %76 : vector<2x16x1xf32> to vector<2x16x16xf32>
    %78 = arith.subf %74, %77 : vector<2x16x16xf32>
    %79 = math.exp %78 : vector<2x16x16xf32>
    %cst_31 = arith.constant dense<0.000000e+00> : vector<2x16xf32>
    %80 = vector.multi_reduction <add>, %79, %cst_31 [2] : vector<2x16x16xf32> to vector<2x16xf32>
    %81 = vector.shape_cast %80 : vector<2x16xf32> to vector<2x16x1xf32>
    %82 = tpu.reciprocal %81 {approx = true} : vector<2x16x1xf32> -> vector<2x16x1xf32>
    %83 = vector.broadcast %82 : vector<2x16x1xf32> to vector<2x16x16xf32>
    %84 = arith.mulf %79, %83 : vector<2x16x16xf32>
    "tpu.trace_start"() <{level = 10 : i32, message = "bqk,bkd->bqd"}> : () -> ()
    %cst_32 = arith.constant dense<0.000000e+00> : vector<2x16x16xf32>
    %85 = tpu.matmul %84, %67, %cst_32 {dimension_numbers = #tpu.dot_dimension_numbers<[2], [1], [1], [2], [0, 0, 0, 1, 1, 2], [0], [0]>} : vector<2x16x16xf32>, vector<2x16x16xf32>, vector<2x16x16xf32> -> vector<2x16x16xf32>
    "tpu.trace_stop"() : () -> ()
    %86 = vector.shape_cast %85 : vector<2x16x16xf32> to vector<32x16xf32>
    %c0_33 = arith.constant 0 : index
    %c16 = arith.constant 16 : index
    %87 = vector.load %arg19[%c0_33, %c16] : memref<32x64xf32, #tpu.memory_space<vmem>>, vector<32x16xf32>
    tpu.vector_store %arg19[%c0_33, %c16], %86 {strides = array<i32>} : memref<32x64xf32, #tpu.memory_space<vmem>>, vector<32x16xf32>,
    %88 = vector.extract_strided_slice %37 {offsets = [0, 0, 32], sizes = [2, 16, 16], strides = [1, 1, 1]} : vector<2x16x64xf32> to vector<2x16x16xf32>
    %89 = vector.extract_strided_slice %39 {offsets = [0, 0, 32], sizes = [2, 16, 16], strides = [1, 1, 1]} : vector<2x16x64xf32> to vector<2x16x16xf32>
    %90 = vector.extract_strided_slice %41 {offsets = [0, 0, 32], sizes = [2, 16, 16], strides = [1, 1, 1]} : vector<2x16x64xf32> to vector<2x16x16xf32>
    "tpu.trace_start"() <{level = 10 : i32, message = "bqd,bkd->bqk"}> : () -> ()
    %cst_34 = arith.constant dense<0.000000e+00> : vector<2x16x16xf32>
    %91 = tpu.matmul %88, %89, %cst_34 {dimension_numbers = #tpu.dot_dimension_numbers<[2], [2], [1], [1], [0, 0, 0, 1, 1, 1], [0], [0]>} : vector<2x16x16xf32>, vector<2x16x16xf32>, vector<2x16x16xf32> -> vector<2x16x16xf32>
    "tpu.trace_stop"() : () -> ()
    %cst_35 = arith.constant 2.500000e-01 : f32
    %92 = vector.broadcast %cst_35 : f32 to vector<2x16x16xf32>
    %93 = arith.mulf %91, %92 : vector<2x16x16xf32>
    %cst_36 = arith.constant -3.40282347E+38 : f32
    %94 = vector.shape_cast %28 : vector<2x1x16xi1> to vector<2x1x16xi1>
    %95 = vector.broadcast %94 : vector<2x1x16xi1> to vector<2x16x16xi1>
    %96 = vector.broadcast %cst_36 : f32 to vector<2x16x16xf32>
    %97 = arith.select %95, %93, %96 : vector<2x16x16xi1>, vector<2x16x16xf32>
    %cst_37 = arith.constant dense<0xFF800000> : vector<2x16xf32>
    %98 = vector.multi_reduction <maximumf>, %97, %cst_37 [2] : vector<2x16x16xf32> to vector<2x16xf32>
    %99 = vector.shape_cast %98 : vector<2x16xf32> to vector<2x16x1xf32>
    %100 = vector.broadcast %99 : vector<2x16x1xf32> to vector<2x16x16xf32>
    %101 = arith.subf %97, %100 : vector<2x16x16xf32>
    %102 = math.exp %101 : vector<2x16x16xf32>
    %cst_38 = arith.constant dense<0.000000e+00> : vector<2x16xf32>
    %103 = vector.multi_reduction <add>, %102, %cst_38 [2] : vector<2x16x16xf32> to vector<2x16xf32>
    %104 = vector.shape_cast %103 : vector<2x16xf32> to vector<2x16x1xf32>
    %105 = tpu.reciprocal %104 {approx = true} : vector<2x16x1xf32> -> vector<2x16x1xf32>
    %106 = vector.broadcast %105 : vector<2x16x1xf32> to vector<2x16x16xf32>
    %107 = arith.mulf %102, %106 : vector<2x16x16xf32>
    "tpu.trace_start"() <{level = 10 : i32, message = "bqk,bkd->bqd"}> : () -> ()
    %cst_39 = arith.constant dense<0.000000e+00> : vector<2x16x16xf32>
    %108 = tpu.matmul %107, %90, %cst_39 {dimension_numbers = #tpu.dot_dimension_numbers<[2], [1], [1], [2], [0, 0, 0, 1, 1, 2], [0], [0]>} : vector<2x16x16xf32>, vector<2x16x16xf32>, vector<2x16x16xf32> -> vector<2x16x16xf32>
    "tpu.trace_stop"() : () -> ()
    %109 = vector.shape_cast %108 : vector<2x16x16xf32> to vector<32x16xf32>
    %c0_40 = arith.constant 0 : index
    %c32 = arith.constant 32 : index
    %110 = vector.load %arg19[%c0_40, %c32] : memref<32x64xf32, #tpu.memory_space<vmem>>, vector<32x16xf32>
    tpu.vector_store %arg19[%c0_40, %c32], %109 {strides = array<i32>} : memref<32x64xf32, #tpu.memory_space<vmem>>, vector<32x16xf32>,
    %111 = vector.extract_strided_slice %37 {offsets = [0, 0, 48], sizes = [2, 16, 16], strides = [1, 1, 1]} : vector<2x16x64xf32> to vector<2x16x16xf32>
    %112 = vector.extract_strided_slice %39 {offsets = [0, 0, 48], sizes = [2, 16, 16], strides = [1, 1, 1]} : vector<2x16x64xf32> to vector<2x16x16xf32>
    %113 = vector.extract_strided_slice %41 {offsets = [0, 0, 48], sizes = [2, 16, 16], strides = [1, 1, 1]} : vector<2x16x64xf32> to vector<2x16x16xf32>
    "tpu.trace_start"() <{level = 10 : i32, message = "bqd,bkd->bqk"}> : () -> ()
    %cst_41 = arith.constant dense<0.000000e+00> : vector<2x16x16xf32>
    %114 = tpu.matmul %111, %112, %cst_41 {dimension_numbers = #tpu.dot_dimension_numbers<[2], [2], [1], [1], [0, 0, 0, 1, 1, 1], [0], [0]>} : vector<2x16x16xf32>, vector<2x16x16xf32>, vector<2x16x16xf32> -> vector<2x16x16xf32>
    "tpu.trace_stop"() : () -> ()
    %cst_42 = arith.constant 2.500000e-01 : f32
    %115 = vector.broadcast %cst_42 : f32 to vector<2x16x16xf32>
    %116 = arith.mulf %114, %115 : vector<2x16x16xf32>
    %cst_43 = arith.constant -3.40282347E+38 : f32
    %117 = vector.shape_cast %28 : vector<2x1x16xi1> to vector<2x1x16xi1>
    %118 = vector.broadcast %117 : vector<2x1x16xi1> to vector<2x16x16xi1>
    %119 = vector.broadcast %cst_43 : f32 to vector<2x16x16xf32>
    %120 = arith.select %118, %116, %119 : vector<2x16x16xi1>, vector<2x16x16xf32>
    %cst_44 = arith.constant dense<0xFF800000> : vector<2x16xf32>
    %121 = vector.multi_reduction <maximumf>, %120, %cst_44 [2] : vector<2x16x16xf32> to vector<2x16xf32>
    %122 = vector.shape_cast %121 : vector<2x16xf32> to vector<2x16x1xf32>
    %123 = vector.broadcast %122 : vector<2x16x1xf32> to vector<2x16x16xf32>
    %124 = arith.subf %120, %123 : vector<2x16x16xf32>
    %125 = math.exp %124 : vector<2x16x16xf32>
    %cst_45 = arith.constant dense<0.000000e+00> : vector<2x16xf32>
    %126 = vector.multi_reduction <add>, %125, %cst_45 [2] : vector<2x16x16xf32> to vector<2x16xf32>
    %127 = vector.shape_cast %126 : vector<2x16xf32> to vector<2x16x1xf32>
    %128 = tpu.reciprocal %127 {approx = true} : vector<2x16x1xf32> -> vector<2x16x1xf32>
    %129 = vector.broadcast %128 : vector<2x16x1xf32> to vector<2x16x16xf32>
    %130 = arith.mulf %125, %129 : vector<2x16x16xf32>
    "tpu.trace_start"() <{level = 10 : i32, message = "bqk,bkd->bqd"}> : () -> ()
    %cst_46 = arith.constant dense<0.000000e+00> : vector<2x16x16xf32>
    %131 = tpu.matmul %130, %113, %cst_46 {dimension_numbers = #tpu.dot_dimension_numbers<[2], [1], [1], [2], [0, 0, 0, 1, 1, 2], [0], [0]>} : vector<2x16x16xf32>, vector<2x16x16xf32>, vector<2x16x16xf32> -> vector<2x16x16xf32>
    "tpu.trace_stop"() : () -> ()
    %132 = vector.shape_cast %131 : vector<2x16x16xf32> to vector<32x16xf32>
    %c0_47 = arith.constant 0 : index
    %c48 = arith.constant 48 : index
    %133 = vector.load %arg19[%c0_47, %c48] : memref<32x64xf32, #tpu.memory_space<vmem>>, vector<32x16xf32>
    tpu.vector_store %arg19[%c0_47, %c48], %132 {strides = array<i32>} : memref<32x64xf32, #tpu.memory_space<vmem>>, vector<32x16xf32>,
    %c0_48 = arith.constant 0 : index
    %c0_49 = arith.constant 0 : index
    %134 = vector.load %arg19[%c0_48, %c0_49] : memref<32x64xf32, #tpu.memory_space<vmem>>, vector<32x64xf32>
    %c0_50 = arith.constant 0 : index
    %c0_51 = arith.constant 0 : index
    %c0_52 = arith.constant 0 : index
    %135 = vector.load %arg6[%c0_50, %c0_51, %c0_52] : memref<2x64x64xf32, #tpu.memory_space<vmem>>, vector<1x64x64xf32>
    %136 = vector.shape_cast %135 : vector<1x64x64xf32> to vector<64x64xf32>
    %cst_53 = arith.constant dense<0.000000e+00> : vector<32x64xf32>
    %137 = tpu.matmul %134, %136, %cst_53 {dimension_numbers = #tpu.dot_dimension_numbers<[1], [0], [0], [1], [0, 0, 1, 1], [], []>} : vector<32x64xf32>, vector<64x64xf32>, vector<32x64xf32> -> vector<32x64xf32>
    %c0_54 = arith.constant 0 : index
    %c0_55 = arith.constant 0 : index
    %c0_56 = arith.constant 0 : index
    %138 = vector.load %arg7[%c0_54, %c0_55, %c0_56] : memref<2x1x64xf32, #tpu.memory_space<vmem>>, vector<1x1x64xf32>
    %139 = vector.shape_cast %138 : vector<1x1x64xf32> to vector<1x64xf32>
    %140 = vector.broadcast %139 : vector<1x64xf32> to vector<32x64xf32>
    %141 = arith.addf %137, %140 : vector<32x64xf32>
    %142 = arith.addf %141, %24 : vector<32x64xf32>
    %c0_57 = arith.constant 0 : index
    %c0_58 = arith.constant 0 : index
    %c0_59 = arith.constant 0 : index
    %143 = vector.load %arg8[%c0_57, %c0_58, %c0_59] : memref<2x1x64xf32, #tpu.memory_space<vmem>>, vector<1x1x64xf32>
    %144 = vector.shape_cast %143 : vector<1x1x64xf32> to vector<1x64xf32>
    %c0_60 = arith.constant 0 : index
    %c0_61 = arith.constant 0 : index
    %c0_62 = arith.constant 0 : index
    %145 = vector.load %arg9[%c0_60, %c0_61, %c0_62] : memref<2x1x64xf32, #tpu.memory_space<vmem>>, vector<1x1x64xf32>
    %146 = vector.shape_cast %145 : vector<1x1x64xf32> to vector<1x64xf32>
    %cst_63 = arith.constant dense<0.000000e+00> : vector<32xf32>
    %147 = vector.multi_reduction <add>, %142, %cst_63 [1] : vector<32x64xf32> to vector<32xf32>
    %148 = vector.shape_cast %147 : vector<32xf32> to vector<32x1xf32>
    %cst_64 = arith.constant 6.400000e+01 : f32
    %149 = vector.broadcast %cst_64 : f32 to vector<32x1xf32>
    %150 = arith.divf %148, %149 : vector<32x1xf32>
    %151 = vector.broadcast %150 : vector<32x1xf32> to vector<32x64xf32>
    %152 = arith.subf %142, %151 : vector<32x64xf32>
    %153 = arith.mulf %152, %152 : vector<32x64xf32>
    %cst_65 = arith.constant dense<0.000000e+00> : vector<32xf32>
    %154 = vector.multi_reduction <add>, %153, %cst_65 [1] : vector<32x64xf32> to vector<32xf32>
    %155 = vector.shape_cast %154 : vector<32xf32> to vector<32x1xf32>
    %cst_66 = arith.constant 6.400000e+01 : f32
    %156 = vector.broadcast %cst_66 : f32 to vector<32x1xf32>
    %157 = arith.divf %155, %156 : vector<32x1xf32>
    %158 = vector.broadcast %150 : vector<32x1xf32> to vector<32x64xf32>
    %159 = arith.subf %142, %158 : vector<32x64xf32>
    %cst_67 = arith.constant 9.99999996E-13 : f32
    %160 = vector.broadcast %cst_67 : f32 to vector<32x1xf32>
    %161 = arith.addf %157, %160 : vector<32x1xf32>
    %162 = math.rsqrt %161 : vector<32x1xf32>
    %163 = vector.broadcast %162 : vector<32x1xf32> to vector<32x64xf32>
    %164 = arith.mulf %159, %163 : vector<32x64xf32>
    %165 = vector.broadcast %144 : vector<1x64xf32> to vector<32x64xf32>
    %166 = arith.mulf %164, %165 : vector<32x64xf32>
    %167 = vector.broadcast %146 : vector<1x64xf32> to vector<32x64xf32>
    %168 = arith.addf %166, %167 : vector<32x64xf32>
    %c0_68 = arith.constant 0 : index
    %c0_69 = arith.constant 0 : index
    %c0_70 = arith.constant 0 : index
    %169 = vector.load %arg10[%c0_68, %c0_69, %c0_70] : memref<2x64x128xf32, #tpu.memory_space<vmem>>, vector<1x64x128xf32>
    %170 = vector.shape_cast %169 : vector<1x64x128xf32> to vector<64x128xf32>
    %cst_71 = arith.constant dense<0.000000e+00> : vector<32x128xf32>
    %171 = tpu.matmul %168, %170, %cst_71 {dimension_numbers = #tpu.dot_dimension_numbers<[1], [0], [0], [1], [0, 0, 1, 1], [], []>} : vector<32x64xf32>, vector<64x128xf32>, vector<32x128xf32> -> vector<32x128xf32>
    %c0_72 = arith.constant 0 : index
    %c0_73 = arith.constant 0 : index
    %c0_74 = arith.constant 0 : index
    %172 = vector.load %arg11[%c0_72, %c0_73, %c0_74] : memref<2x1x128xf32, #tpu.memory_space<vmem>>, vector<1x1x128xf32>
    %173 = vector.shape_cast %172 : vector<1x1x128xf32> to vector<1x128xf32>
    %174 = vector.broadcast %173 : vector<1x128xf32> to vector<32x128xf32>
    %175 = arith.addf %171, %174 : vector<32x128xf32>
    %cst_75 = arith.constant 5.000000e-01 : f32
    %176 = vector.broadcast %cst_75 : f32 to vector<32x128xf32>
    %177 = arith.mulf %176, %175 : vector<32x128xf32>
    %cst_76 = arith.constant 0.707106769 : f32
    %178 = vector.broadcast %cst_76 : f32 to vector<32x128xf32>
    %179 = arith.mulf %175, %178 : vector<32x128xf32>
    %180 = math.absf %179 : vector<32x128xf32>
    %cst_77 = arith.constant 0.327591091 : f32
    %181 = vector.broadcast %cst_77 : f32 to vector<32x128xf32>
    %182 = arith.mulf %181, %180 : vector<32x128xf32>
    %cst_78 = arith.constant 1.000000e+00 : f32
    %183 = vector.broadcast %cst_78 : f32 to vector<32x128xf32>
    %184 = arith.addf %183, %182 : vector<32x128xf32>
    %cst_79 = arith.constant 1.000000e+00 : f32
    %185 = vector.broadcast %cst_79 : f32 to vector<32x128xf32>
    %186 = arith.divf %185, %184 : vector<32x128xf32>
    %cst_80 = arith.constant 1.06140542 : f32
    %187 = vector.broadcast %cst_80 : f32 to vector<32x128xf32>
    %188 = arith.mulf %187, %186 : vector<32x128xf32>
    %cst_81 = arith.constant -1.45315206 : f32
    %189 = vector.broadcast %cst_81 : f32 to vector<32x128xf32>
    %190 = arith.addf %188, %189 : vector<32x128xf32>
    %191 = arith.mulf %190, %186 : vector<32x128xf32>
    %cst_82 = arith.constant 1.42141378 : f32
    %192 = vector.broadcast %cst_82 : f32 to vector<32x128xf32>
    %193 = arith.addf %191, %192 : vector<32x128xf32>
    %194 = arith.mulf %193, %186 : vector<32x128xf32>
    %cst_83 = arith.constant -0.284496725 : f32
    %195 = vector.broadcast %cst_83 : f32 to vector<32x128xf32>
    %196 = arith.addf %194, %195 : vector<32x128xf32>
    %197 = arith.mulf %196, %186 : vector<32x128xf32>
    %cst_84 = arith.constant 0.254829586 : f32
    %198 = vector.broadcast %cst_84 : f32 to vector<32x128xf32>
    %199 = arith.addf %197, %198 : vector<32x128xf32>
    %200 = arith.mulf %199, %186 : vector<32x128xf32>
    %cst_85 = arith.constant 0.000000e+00 : f32
    %201 = vector.broadcast %cst_85 : f32 to vector<32x128xf32>
    %202 = arith.subf %201, %180 : vector<32x128xf32>
    %203 = arith.mulf %202, %180 : vector<32x128xf32>
    %204 = math.exp %203 : vector<32x128xf32>
    %205 = arith.mulf %200, %204 : vector<32x128xf32>
    %cst_86 = arith.constant 1.000000e+00 : f32
    %206 = vector.broadcast %cst_86 : f32 to vector<32x128xf32>
    %207 = arith.subf %206, %205 : vector<32x128xf32>
    %cst_87 = arith.constant 0.000000e+00 : f32
    %208 = vector.broadcast %cst_87 : f32 to vector<32x128xf32>
    %209 = arith.cmpf oge, %179, %208 : vector<32x128xf32>
    %cst_88 = arith.constant 0.000000e+00 : f32
    %210 = vector.broadcast %cst_88 : f32 to vector<32x128xf32>
    %211 = arith.subf %210, %207 : vector<32x128xf32>
    %212 = arith.select %209, %207, %211 : vector<32x128xi1>, vector<32x128xf32>
    %cst_89 = arith.constant 1.000000e+00 : f32
    %213 = vector.broadcast %cst_89 : f32 to vector<32x128xf32>
    %214 = arith.addf %213, %212 : vector<32x128xf32>
    %215 = arith.mulf %177, %214 : vector<32x128xf32>
    %c0_90 = arith.constant 0 : index
    %c0_91 = arith.constant 0 : index
    %c0_92 = arith.constant 0 : index
    %216 = vector.load %arg12[%c0_90, %c0_91, %c0_92] : memref<2x128x64xf32, #tpu.memory_space<vmem>>, vector<1x128x64xf32>
    %217 = vector.shape_cast %216 : vector<1x128x64xf32> to vector<128x64xf32>
    %cst_93 = arith.constant dense<0.000000e+00> : vector<32x64xf32>
    %218 = tpu.matmul %215, %217, %cst_93 {dimension_numbers = #tpu.dot_dimension_numbers<[1], [0], [0], [1], [0, 0, 1, 1], [], []>} : vector<32x128xf32>, vector<128x64xf32>, vector<32x64xf32> -> vector<32x64xf32>
    %c0_94 = arith.constant 0 : index
    %c0_95 = arith.constant 0 : index
    %c0_96 = arith.constant 0 : index
    %219 = vector.load %arg13[%c0_94, %c0_95, %c0_96] : memref<2x1x64xf32, #tpu.memory_space<vmem>>, vector<1x1x64xf32>
    %220 = vector.shape_cast %219 : vector<1x1x64xf32> to vector<1x64xf32>
    %221 = vector.broadcast %220 : vector<1x64xf32> to vector<32x64xf32>
    %222 = arith.addf %218, %221 : vector<32x64xf32>
    %223 = arith.addf %222, %168 : vector<32x64xf32>
    %c0_97 = arith.constant 0 : index
    %c0_98 = arith.constant 0 : index
    %c0_99 = arith.constant 0 : index
    %224 = vector.load %arg14[%c0_97, %c0_98, %c0_99] : memref<2x1x64xf32, #tpu.memory_space<vmem>>, vector<1x1x64xf32>
    %225 = vector.shape_cast %224 : vector<1x1x64xf32> to vector<1x64xf32>
    %c0_100 = arith.constant 0 : index
    %c0_101 = arith.constant 0 : index
    %c0_102 = arith.constant 0 : index
    %226 = vector.load %arg15[%c0_100, %c0_101, %c0_102] : memref<2x1x64xf32, #tpu.memory_space<vmem>>, vector<1x1x64xf32>
    %227 = vector.shape_cast %226 : vector<1x1x64xf32> to vector<1x64xf32>
    %cst_103 = arith.constant dense<0.000000e+00> : vector<32xf32>
    %228 = vector.multi_reduction <add>, %223, %cst_103 [1] : vector<32x64xf32> to vector<32xf32>
    %229 = vector.shape_cast %228 : vector<32xf32> to vector<32x1xf32>
    %cst_104 = arith.constant 6.400000e+01 : f32
    %230 = vector.broadcast %cst_104 : f32 to vector<32x1xf32>
    %231 = arith.divf %229, %230 : vector<32x1xf32>
    %232 = vector.broadcast %231 : vector<32x1xf32> to vector<32x64xf32>
    %233 = arith.subf %223, %232 : vector<32x64xf32>
    %234 = arith.mulf %233, %233 : vector<32x64xf32>
    %cst_105 = arith.constant dense<0.000000e+00> : vector<32xf32>
    %235 = vector.multi_reduction <add>, %234, %cst_105 [1] : vector<32x64xf32> to vector<32xf32>
    %236 = vector.shape_cast %235 : vector<32xf32> to vector<32x1xf32>
    %cst_106 = arith.constant 6.400000e+01 : f32
    %237 = vector.broadcast %cst_106 : f32 to vector<32x1xf32>
    %238 = arith.divf %236, %237 : vector<32x1xf32>
    %239 = vector.broadcast %231 : vector<32x1xf32> to vector<32x64xf32>
    %240 = arith.subf %223, %239 : vector<32x64xf32>
    %cst_107 = arith.constant 9.99999996E-13 : f32
    %241 = vector.broadcast %cst_107 : f32 to vector<32x1xf32>
    %242 = arith.addf %238, %241 : vector<32x1xf32>
    %243 = math.rsqrt %242 : vector<32x1xf32>
    %244 = vector.broadcast %243 : vector<32x1xf32> to vector<32x64xf32>
    %245 = arith.mulf %240, %244 : vector<32x64xf32>
    %246 = vector.broadcast %225 : vector<1x64xf32> to vector<32x64xf32>
    %247 = arith.mulf %245, %246 : vector<32x64xf32>
    %248 = vector.broadcast %227 : vector<1x64xf32> to vector<32x64xf32>
    %249 = arith.addf %247, %248 : vector<32x64xf32>
    %c1 = arith.constant 1 : index
    %c0_108 = arith.constant 0 : index
    %c0_109 = arith.constant 0 : index
    %250 = vector.load %arg4[%c1, %c0_108, %c0_109] : memref<2x64x192xf32, #tpu.memory_space<vmem>>, vector<1x64x192xf32>
    %251 = vector.shape_cast %250 : vector<1x64x192xf32> to vector<64x192xf32>
    %cst_110 = arith.constant dense<0.000000e+00> : vector<32x192xf32>
    %252 = tpu.matmul %249, %251, %cst_110 {dimension_numbers = #tpu.dot_dimension_numbers<[1], [0], [0], [1], [0, 0, 1, 1], [], []>} : vector<32x64xf32>, vector<64x192xf32>, vector<32x192xf32> -> vector<32x192xf32>
    %c1_111 = arith.constant 1 : index
    %c0_112 = arith.constant 0 : index
    %c0_113 = arith.constant 0 : index
    %253 = vector.load %arg5[%c1_111, %c0_112, %c0_113] : memref<2x1x192xf32, #tpu.memory_space<vmem>>, vector<1x1x192xf32>
    %254 = vector.shape_cast %253 : vector<1x1x192xf32> to vector<1x192xf32>
    %255 = vector.broadcast %254 : vector<1x192xf32> to vector<32x192xf32>
    %256 = arith.addf %252, %255 : vector<32x192xf32>
    %257 = vector.extract_strided_slice %256 {offsets = [0, 0], sizes = [32, 64], strides = [1, 1]} : vector<32x192xf32> to vector<32x64xf32>
    %258 = vector.shape_cast %257 : vector<32x64xf32> to vector<2x16x64xf32>
    %259 = vector.extract_strided_slice %256 {offsets = [0, 64], sizes = [32, 64], strides = [1, 1]} : vector<32x192xf32> to vector<32x64xf32>
    %260 = vector.shape_cast %259 : vector<32x64xf32> to vector<2x16x64xf32>
    %261 = vector.extract_strided_slice %256 {offsets = [0, 128], sizes = [32, 64], strides = [1, 1]} : vector<32x192xf32> to vector<32x64xf32>
    %262 = vector.shape_cast %261 : vector<32x64xf32> to vector<2x16x64xf32>
    %263 = vector.extract_strided_slice %258 {offsets = [0, 0, 0], sizes = [2, 16, 16], strides = [1, 1, 1]} : vector<2x16x64xf32> to vector<2x16x16xf32>
    %264 = vector.extract_strided_slice %260 {offsets = [0, 0, 0], sizes = [2, 16, 16], strides = [1, 1, 1]} : vector<2x16x64xf32> to vector<2x16x16xf32>
    %265 = vector.extract_strided_slice %262 {offsets = [0, 0, 0], sizes = [2, 16, 16], strides = [1, 1, 1]} : vector<2x16x64xf32> to vector<2x16x16xf32>
    "tpu.trace_start"() <{level = 10 : i32, message = "bqd,bkd->bqk"}> : () -> ()
    %cst_114 = arith.constant dense<0.000000e+00> : vector<2x16x16xf32>
    %266 = tpu.matmul %263, %264, %cst_114 {dimension_numbers = #tpu.dot_dimension_numbers<[2], [2], [1], [1], [0, 0, 0, 1, 1, 1], [0], [0]>} : vector<2x16x16xf32>, vector<2x16x16xf32>, vector<2x16x16xf32> -> vector<2x16x16xf32>
    "tpu.trace_stop"() : () -> ()
    %cst_115 = arith.constant 2.500000e-01 : f32
    %267 = vector.broadcast %cst_115 : f32 to vector<2x16x16xf32>
    %268 = arith.mulf %266, %267 : vector<2x16x16xf32>
    %cst_116 = arith.constant -3.40282347E+38 : f32
    %269 = vector.shape_cast %28 : vector<2x1x16xi1> to vector<2x1x16xi1>
    %270 = vector.broadcast %269 : vector<2x1x16xi1> to vector<2x16x16xi1>
    %271 = vector.broadcast %cst_116 : f32 to vector<2x16x16xf32>
    %272 = arith.select %270, %268, %271 : vector<2x16x16xi1>, vector<2x16x16xf32>
    %cst_117 = arith.constant dense<0xFF800000> : vector<2x16xf32>
    %273 = vector.multi_reduction <maximumf>, %272, %cst_117 [2] : vector<2x16x16xf32> to vector<2x16xf32>
    %274 = vector.shape_cast %273 : vector<2x16xf32> to vector<2x16x1xf32>
    %275 = vector.broadcast %274 : vector<2x16x1xf32> to vector<2x16x16xf32>
    %276 = arith.subf %272, %275 : vector<2x16x16xf32>
    %277 = math.exp %276 : vector<2x16x16xf32>
    %cst_118 = arith.constant dense<0.000000e+00> : vector<2x16xf32>
    %278 = vector.multi_reduction <add>, %277, %cst_118 [2] : vector<2x16x16xf32> to vector<2x16xf32>
    %279 = vector.shape_cast %278 : vector<2x16xf32> to vector<2x16x1xf32>
    %280 = tpu.reciprocal %279 {approx = true} : vector<2x16x1xf32> -> vector<2x16x1xf32>
    %281 = vector.broadcast %280 : vector<2x16x1xf32> to vector<2x16x16xf32>
    %282 = arith.mulf %277, %281 : vector<2x16x16xf32>
    "tpu.trace_start"() <{level = 10 : i32, message = "bqk,bkd->bqd"}> : () -> ()
    %cst_119 = arith.constant dense<0.000000e+00> : vector<2x16x16xf32>
    %283 = tpu.matmul %282, %265, %cst_119 {dimension_numbers = #tpu.dot_dimension_numbers<[2], [1], [1], [2], [0, 0, 0, 1, 1, 2], [0], [0]>} : vector<2x16x16xf32>, vector<2x16x16xf32>, vector<2x16x16xf32> -> vector<2x16x16xf32>
    "tpu.trace_stop"() : () -> ()
    %284 = vector.shape_cast %283 : vector<2x16x16xf32> to vector<32x16xf32>
    %c0_120 = arith.constant 0 : index
    %c0_121 = arith.constant 0 : index
    %285 = vector.load %arg19[%c0_120, %c0_121] : memref<32x64xf32, #tpu.memory_space<vmem>>, vector<32x16xf32>
    tpu.vector_store %arg19[%c0_120, %c0_121], %284 {strides = array<i32>} : memref<32x64xf32, #tpu.memory_space<vmem>>, vector<32x16xf32>,
    %286 = vector.extract_strided_slice %258 {offsets = [0, 0, 16], sizes = [2, 16, 16], strides = [1, 1, 1]} : vector<2x16x64xf32> to vector<2x16x16xf32>
    %287 = vector.extract_strided_slice %260 {offsets = [0, 0, 16], sizes = [2, 16, 16], strides = [1, 1, 1]} : vector<2x16x64xf32> to vector<2x16x16xf32>
    %288 = vector.extract_strided_slice %262 {offsets = [0, 0, 16], sizes = [2, 16, 16], strides = [1, 1, 1]} : vector<2x16x64xf32> to vector<2x16x16xf32>
    "tpu.trace_start"() <{level = 10 : i32, message = "bqd,bkd->bqk"}> : () -> ()
    %cst_122 = arith.constant dense<0.000000e+00> : vector<2x16x16xf32>
    %289 = tpu.matmul %286, %287, %cst_122 {dimension_numbers = #tpu.dot_dimension_numbers<[2], [2], [1], [1], [0, 0, 0, 1, 1, 1], [0], [0]>} : vector<2x16x16xf32>, vector<2x16x16xf32>, vector<2x16x16xf32> -> vector<2x16x16xf32>
    "tpu.trace_stop"() : () -> ()
    %cst_123 = arith.constant 2.500000e-01 : f32
    %290 = vector.broadcast %cst_123 : f32 to vector<2x16x16xf32>
    %291 = arith.mulf %289, %290 : vector<2x16x16xf32>
    %cst_124 = arith.constant -3.40282347E+38 : f32
    %292 = vector.shape_cast %28 : vector<2x1x16xi1> to vector<2x1x16xi1>
    %293 = vector.broadcast %292 : vector<2x1x16xi1> to vector<2x16x16xi1>
    %294 = vector.broadcast %cst_124 : f32 to vector<2x16x16xf32>
    %295 = arith.select %293, %291, %294 : vector<2x16x16xi1>, vector<2x16x16xf32>
    %cst_125 = arith.constant dense<0xFF800000> : vector<2x16xf32>
    %296 = vector.multi_reduction <maximumf>, %295, %cst_125 [2] : vector<2x16x16xf32> to vector<2x16xf32>
    %297 = vector.shape_cast %296 : vector<2x16xf32> to vector<2x16x1xf32>
    %298 = vector.broadcast %297 : vector<2x16x1xf32> to vector<2x16x16xf32>
    %299 = arith.subf %295, %298 : vector<2x16x16xf32>
    %300 = math.exp %299 : vector<2x16x16xf32>
    %cst_126 = arith.constant dense<0.000000e+00> : vector<2x16xf32>
    %301 = vector.multi_reduction <add>, %300, %cst_126 [2] : vector<2x16x16xf32> to vector<2x16xf32>
    %302 = vector.shape_cast %301 : vector<2x16xf32> to vector<2x16x1xf32>
    %303 = tpu.reciprocal %302 {approx = true} : vector<2x16x1xf32> -> vector<2x16x1xf32>
    %304 = vector.broadcast %303 : vector<2x16x1xf32> to vector<2x16x16xf32>
    %305 = arith.mulf %300, %304 : vector<2x16x16xf32>
    "tpu.trace_start"() <{level = 10 : i32, message = "bqk,bkd->bqd"}> : () -> ()
    %cst_127 = arith.constant dense<0.000000e+00> : vector<2x16x16xf32>
    %306 = tpu.matmul %305, %288, %cst_127 {dimension_numbers = #tpu.dot_dimension_numbers<[2], [1], [1], [2], [0, 0, 0, 1, 1, 2], [0], [0]>} : vector<2x16x16xf32>, vector<2x16x16xf32>, vector<2x16x16xf32> -> vector<2x16x16xf32>
    "tpu.trace_stop"() : () -> ()
    %307 = vector.shape_cast %306 : vector<2x16x16xf32> to vector<32x16xf32>
    %c0_128 = arith.constant 0 : index
    %c16_129 = arith.constant 16 : index
    %308 = vector.load %arg19[%c0_128, %c16_129] : memref<32x64xf32, #tpu.memory_space<vmem>>, vector<32x16xf32>
    tpu.vector_store %arg19[%c0_128, %c16_129], %307 {strides = array<i32>} : memref<32x64xf32, #tpu.memory_space<vmem>>, vector<32x16xf32>,
    %309 = vector.extract_strided_slice %258 {offsets = [0, 0, 32], sizes = [2, 16, 16], strides = [1, 1, 1]} : vector<2x16x64xf32> to vector<2x16x16xf32>
    %310 = vector.extract_strided_slice %260 {offsets = [0, 0, 32], sizes = [2, 16, 16], strides = [1, 1, 1]} : vector<2x16x64xf32> to vector<2x16x16xf32>
    %311 = vector.extract_strided_slice %262 {offsets = [0, 0, 32], sizes = [2, 16, 16], strides = [1, 1, 1]} : vector<2x16x64xf32> to vector<2x16x16xf32>
    "tpu.trace_start"() <{level = 10 : i32, message = "bqd,bkd->bqk"}> : () -> ()
    %cst_130 = arith.constant dense<0.000000e+00> : vector<2x16x16xf32>
    %312 = tpu.matmul %309, %310, %cst_130 {dimension_numbers = #tpu.dot_dimension_numbers<[2], [2], [1], [1], [0, 0, 0, 1, 1, 1], [0], [0]>} : vector<2x16x16xf32>, vector<2x16x16xf32>, vector<2x16x16xf32> -> vector<2x16x16xf32>
    "tpu.trace_stop"() : () -> ()
    %cst_131 = arith.constant 2.500000e-01 : f32
    %313 = vector.broadcast %cst_131 : f32 to vector<2x16x16xf32>
    %314 = arith.mulf %312, %313 : vector<2x16x16xf32>
    %cst_132 = arith.constant -3.40282347E+38 : f32
    %315 = vector.shape_cast %28 : vector<2x1x16xi1> to vector<2x1x16xi1>
    %316 = vector.broadcast %315 : vector<2x1x16xi1> to vector<2x16x16xi1>
    %317 = vector.broadcast %cst_132 : f32 to vector<2x16x16xf32>
    %318 = arith.select %316, %314, %317 : vector<2x16x16xi1>, vector<2x16x16xf32>
    %cst_133 = arith.constant dense<0xFF800000> : vector<2x16xf32>
    %319 = vector.multi_reduction <maximumf>, %318, %cst_133 [2] : vector<2x16x16xf32> to vector<2x16xf32>
    %320 = vector.shape_cast %319 : vector<2x16xf32> to vector<2x16x1xf32>
    %321 = vector.broadcast %320 : vector<2x16x1xf32> to vector<2x16x16xf32>
    %322 = arith.subf %318, %321 : vector<2x16x16xf32>
    %323 = math.exp %322 : vector<2x16x16xf32>
    %cst_134 = arith.constant dense<0.000000e+00> : vector<2x16xf32>
    %324 = vector.multi_reduction <add>, %323, %cst_134 [2] : vector<2x16x16xf32> to vector<2x16xf32>
    %325 = vector.shape_cast %324 : vector<2x16xf32> to vector<2x16x1xf32>
    %326 = tpu.reciprocal %325 {approx = true} : vector<2x16x1xf32> -> vector<2x16x1xf32>
    %327 = vector.broadcast %326 : vector<2x16x1xf32> to vector<2x16x16xf32>
    %328 = arith.mulf %323, %327 : vector<2x16x16xf32>
    "tpu.trace_start"() <{level = 10 : i32, message = "bqk,bkd->bqd"}> : () -> ()
    %cst_135 = arith.constant dense<0.000000e+00> : vector<2x16x16xf32>
    %329 = tpu.matmul %328, %311, %cst_135 {dimension_numbers = #tpu.dot_dimension_numbers<[2], [1], [1], [2], [0, 0, 0, 1, 1, 2], [0], [0]>} : vector<2x16x16xf32>, vector<2x16x16xf32>, vector<2x16x16xf32> -> vector<2x16x16xf32>
    "tpu.trace_stop"() : () -> ()
    %330 = vector.shape_cast %329 : vector<2x16x16xf32> to vector<32x16xf32>
    %c0_136 = arith.constant 0 : index
    %c32_137 = arith.constant 32 : index
    %331 = vector.load %arg19[%c0_136, %c32_137] : memref<32x64xf32, #tpu.memory_space<vmem>>, vector<32x16xf32>
    tpu.vector_store %arg19[%c0_136, %c32_137], %330 {strides = array<i32>} : memref<32x64xf32, #tpu.memory_space<vmem>>, vector<32x16xf32>,
    %332 = vector.extract_strided_slice %258 {offsets = [0, 0, 48], sizes = [2, 16, 16], strides = [1, 1, 1]} : vector<2x16x64xf32> to vector<2x16x16xf32>
    %333 = vector.extract_strided_slice %260 {offsets = [0, 0, 48], sizes = [2, 16, 16], strides = [1, 1, 1]} : vector<2x16x64xf32> to vector<2x16x16xf32>
    %334 = vector.extract_strided_slice %262 {offsets = [0, 0, 48], sizes = [2, 16, 16], strides = [1, 1, 1]} : vector<2x16x64xf32> to vector<2x16x16xf32>
    "tpu.trace_start"() <{level = 10 : i32, message = "bqd,bkd->bqk"}> : () -> ()
    %cst_138 = arith.constant dense<0.000000e+00> : vector<2x16x16xf32>
    %335 = tpu.matmul %332, %333, %cst_138 {dimension_numbers = #tpu.dot_dimension_numbers<[2], [2], [1], [1], [0, 0, 0, 1, 1, 1], [0], [0]>} : vector<2x16x16xf32>, vector<2x16x16xf32>, vector<2x16x16xf32> -> vector<2x16x16xf32>
    "tpu.trace_stop"() : () -> ()
    %cst_139 = arith.constant 2.500000e-01 : f32
    %336 = vector.broadcast %cst_139 : f32 to vector<2x16x16xf32>
    %337 = arith.mulf %335, %336 : vector<2x16x16xf32>
    %cst_140 = arith.constant -3.40282347E+38 : f32
    %338 = vector.shape_cast %28 : vector<2x1x16xi1> to vector<2x1x16xi1>
    %339 = vector.broadcast %338 : vector<2x1x16xi1> to vector<2x16x16xi1>
    %340 = vector.broadcast %cst_140 : f32 to vector<2x16x16xf32>
    %341 = arith.select %339, %337, %340 : vector<2x16x16xi1>, vector<2x16x16xf32>
    %cst_141 = arith.constant dense<0xFF800000> : vector<2x16xf32>
    %342 = vector.multi_reduction <maximumf>, %341, %cst_141 [2] : vector<2x16x16xf32> to vector<2x16xf32>
    %343 = vector.shape_cast %342 : vector<2x16xf32> to vector<2x16x1xf32>
    %344 = vector.broadcast %343 : vector<2x16x1xf32> to vector<2x16x16xf32>
    %345 = arith.subf %341, %344 : vector<2x16x16xf32>
    %346 = math.exp %345 : vector<2x16x16xf32>
    %cst_142 = arith.constant dense<0.000000e+00> : vector<2x16xf32>
    %347 = vector.multi_reduction <add>, %346, %cst_142 [2] : vector<2x16x16xf32> to vector<2x16xf32>
    %348 = vector.shape_cast %347 : vector<2x16xf32> to vector<2x16x1xf32>
    %349 = tpu.reciprocal %348 {approx = true} : vector<2x16x1xf32> -> vector<2x16x1xf32>
    %350 = vector.broadcast %349 : vector<2x16x1xf32> to vector<2x16x16xf32>
    %351 = arith.mulf %346, %350 : vector<2x16x16xf32>
    "tpu.trace_start"() <{level = 10 : i32, message = "bqk,bkd->bqd"}> : () -> ()
    %cst_143 = arith.constant dense<0.000000e+00> : vector<2x16x16xf32>
    %352 = tpu.matmul %351, %334, %cst_143 {dimension_numbers = #tpu.dot_dimension_numbers<[2], [1], [1], [2], [0, 0, 0, 1, 1, 2], [0], [0]>} : vector<2x16x16xf32>, vector<2x16x16xf32>, vector<2x16x16xf32> -> vector<2x16x16xf32>
    "tpu.trace_stop"() : () -> ()
    %353 = vector.shape_cast %352 : vector<2x16x16xf32> to vector<32x16xf32>
    %c0_144 = arith.constant 0 : index
    %c48_145 = arith.constant 48 : index
    %354 = vector.load %arg19[%c0_144, %c48_145] : memref<32x64xf32, #tpu.memory_space<vmem>>, vector<32x16xf32>
    tpu.vector_store %arg19[%c0_144, %c48_145], %353 {strides = array<i32>} : memref<32x64xf32, #tpu.memory_space<vmem>>, vector<32x16xf32>,
    %c0_146 = arith.constant 0 : index
    %c0_147 = arith.constant 0 : index
    %355 = vector.load %arg19[%c0_146, %c0_147] : memref<32x64xf32, #tpu.memory_space<vmem>>, vector<32x64xf32>
    %c1_148 = arith.constant 1 : index
    %c0_149 = arith.constant 0 : index
    %c0_150 = arith.constant 0 : index
    %356 = vector.load %arg6[%c1_148, %c0_149, %c0_150] : memref<2x64x64xf32, #tpu.memory_space<vmem>>, vector<1x64x64xf32>
    %357 = vector.shape_cast %356 : vector<1x64x64xf32> to vector<64x64xf32>
    %cst_151 = arith.constant dense<0.000000e+00> : vector<32x64xf32>
    %358 = tpu.matmul %355, %357, %cst_151 {dimension_numbers = #tpu.dot_dimension_numbers<[1], [0], [0], [1], [0, 0, 1, 1], [], []>} : vector<32x64xf32>, vector<64x64xf32>, vector<32x64xf32> -> vector<32x64xf32>
    %c1_152 = arith.constant 1 : index
    %c0_153 = arith.constant 0 : index
    %c0_154 = arith.constant 0 : index
    %359 = vector.load %arg7[%c1_152, %c0_153, %c0_154] : memref<2x1x64xf32, #tpu.memory_space<vmem>>, vector<1x1x64xf32>
    %360 = vector.shape_cast %359 : vector<1x1x64xf32> to vector<1x64xf32>
    %361 = vector.broadcast %360 : vector<1x64xf32> to vector<32x64xf32>
    %362 = arith.addf %358, %361 : vector<32x64xf32>
    %363 = arith.addf %362, %249 : vector<32x64xf32>
    %c1_155 = arith.constant 1 : index
    %c0_156 = arith.constant 0 : index
    %c0_157 = arith.constant 0 : index
    %364 = vector.load %arg8[%c1_155, %c0_156, %c0_157] : memref<2x1x64xf32, #tpu.memory_space<vmem>>, vector<1x1x64xf32>
    %365 = vector.shape_cast %364 : vector<1x1x64xf32> to vector<1x64xf32>
    %c1_158 = arith.constant 1 : index
    %c0_159 = arith.constant 0 : index
    %c0_160 = arith.constant 0 : index
    %366 = vector.load %arg9[%c1_158, %c0_159, %c0_160] : memref<2x1x64xf32, #tpu.memory_space<vmem>>, vector<1x1x64xf32>
    %367 = vector.shape_cast %366 : vector<1x1x64xf32> to vector<1x64xf32>
    %cst_161 = arith.constant dense<0.000000e+00> : vector<32xf32>
    %368 = vector.multi_reduction <add>, %363, %cst_161 [1] : vector<32x64xf32> to vector<32xf32>
    %369 = vector.shape_cast %368 : vector<32xf32> to vector<32x1xf32>
    %cst_162 = arith.constant 6.400000e+01 : f32
    %370 = vector.broadcast %cst_162 : f32 to vector<32x1xf32>
    %371 = arith.divf %369, %370 : vector<32x1xf32>
    %372 = vector.broadcast %371 : vector<32x1xf32> to vector<32x64xf32>
    %373 = arith.subf %363, %372 : vector<32x64xf32>
    %374 = arith.mulf %373, %373 : vector<32x64xf32>
    %cst_163 = arith.constant dense<0.000000e+00> : vector<32xf32>
    %375 = vector.multi_reduction <add>, %374, %cst_163 [1] : vector<32x64xf32> to vector<32xf32>
    %376 = vector.shape_cast %375 : vector<32xf32> to vector<32x1xf32>
    %cst_164 = arith.constant 6.400000e+01 : f32
    %377 = vector.broadcast %cst_164 : f32 to vector<32x1xf32>
    %378 = arith.divf %376, %377 : vector<32x1xf32>
    %379 = vector.broadcast %371 : vector<32x1xf32> to vector<32x64xf32>
    %380 = arith.subf %363, %379 : vector<32x64xf32>
    %cst_165 = arith.constant 9.99999996E-13 : f32
    %381 = vector.broadcast %cst_165 : f32 to vector<32x1xf32>
    %382 = arith.addf %378, %381 : vector<32x1xf32>
    %383 = math.rsqrt %382 : vector<32x1xf32>
    %384 = vector.broadcast %383 : vector<32x1xf32> to vector<32x64xf32>
    %385 = arith.mulf %380, %384 : vector<32x64xf32>
    %386 = vector.broadcast %365 : vector<1x64xf32> to vector<32x64xf32>
    %387 = arith.mulf %385, %386 : vector<32x64xf32>
    %388 = vector.broadcast %367 : vector<1x64xf32> to vector<32x64xf32>
    %389 = arith.addf %387, %388 : vector<32x64xf32>
    %c1_166 = arith.constant 1 : index
    %c0_167 = arith.constant 0 : index
    %c0_168 = arith.constant 0 : index
    %390 = vector.load %arg10[%c1_166, %c0_167, %c0_168] : memref<2x64x128xf32, #tpu.memory_space<vmem>>, vector<1x64x128xf32>
    %391 = vector.shape_cast %390 : vector<1x64x128xf32> to vector<64x128xf32>
    %cst_169 = arith.constant dense<0.000000e+00> : vector<32x128xf32>
    %392 = tpu.matmul %389, %391, %cst_169 {dimension_numbers = #tpu.dot_dimension_numbers<[1], [0], [0], [1], [0, 0, 1, 1], [], []>} : vector<32x64xf32>, vector<64x128xf32>, vector<32x128xf32> -> vector<32x128xf32>
    %c1_170 = arith.constant 1 : index
    %c0_171 = arith.constant 0 : index
    %c0_172 = arith.constant 0 : index
    %393 = vector.load %arg11[%c1_170, %c0_171, %c0_172] : memref<2x1x128xf32, #tpu.memory_space<vmem>>, vector<1x1x128xf32>
    %394 = vector.shape_cast %393 : vector<1x1x128xf32> to vector<1x128xf32>
    %395 = vector.broadcast %394 : vector<1x128xf32> to vector<32x128xf32>
    %396 = arith.addf %392, %395 : vector<32x128xf32>
    %cst_173 = arith.constant 5.000000e-01 : f32
    %397 = vector.broadcast %cst_173 : f32 to vector<32x128xf32>
    %398 = arith.mulf %397, %396 : vector<32x128xf32>
    %cst_174 = arith.constant 0.707106769 : f32
    %399 = vector.broadcast %cst_174 : f32 to vector<32x128xf32>
    %400 = arith.mulf %396, %399 : vector<32x128xf32>
    %401 = math.absf %400 : vector<32x128xf32>
    %cst_175 = arith.constant 0.327591091 : f32
    %402 = vector.broadcast %cst_175 : f32 to vector<32x128xf32>
    %403 = arith.mulf %402, %401 : vector<32x128xf32>
    %cst_176 = arith.constant 1.000000e+00 : f32
    %404 = vector.broadcast %cst_176 : f32 to vector<32x128xf32>
    %405 = arith.addf %404, %403 : vector<32x128xf32>
    %cst_177 = arith.constant 1.000000e+00 : f32
    %406 = vector.broadcast %cst_177 : f32 to vector<32x128xf32>
    %407 = arith.divf %406, %405 : vector<32x128xf32>
    %cst_178 = arith.constant 1.06140542 : f32
    %408 = vector.broadcast %cst_178 : f32 to vector<32x128xf32>
    %409 = arith.mulf %408, %407 : vector<32x128xf32>
    %cst_179 = arith.constant -1.45315206 : f32
    %410 = vector.broadcast %cst_179 : f32 to vector<32x128xf32>
    %411 = arith.addf %409, %410 : vector<32x128xf32>
    %412 = arith.mulf %411, %407 : vector<32x128xf32>
    %cst_180 = arith.constant 1.42141378 : f32
    %413 = vector.broadcast %cst_180 : f32 to vector<32x128xf32>
    %414 = arith.addf %412, %413 : vector<32x128xf32>
    %415 = arith.mulf %414, %407 : vector<32x128xf32>
    %cst_181 = arith.constant -0.284496725 : f32
    %416 = vector.broadcast %cst_181 : f32 to vector<32x128xf32>
    %417 = arith.addf %415, %416 : vector<32x128xf32>
    %418 = arith.mulf %417, %407 : vector<32x128xf32>
    %cst_182 = arith.constant 0.254829586 : f32
    %419 = vector.broadcast %cst_182 : f32 to vector<32x128xf32>
    %420 = arith.addf %418, %419 : vector<32x128xf32>
    %421 = arith.mulf %420, %407 : vector<32x128xf32>
    %cst_183 = arith.constant 0.000000e+00 : f32
    %422 = vector.broadcast %cst_183 : f32 to vector<32x128xf32>
    %423 = arith.subf %422, %401 : vector<32x128xf32>
    %424 = arith.mulf %423, %401 : vector<32x128xf32>
    %425 = math.exp %424 : vector<32x128xf32>
    %426 = arith.mulf %421, %425 : vector<32x128xf32>
    %cst_184 = arith.constant 1.000000e+00 : f32
    %427 = vector.broadcast %cst_184 : f32 to vector<32x128xf32>
    %428 = arith.subf %427, %426 : vector<32x128xf32>
    %cst_185 = arith.constant 0.000000e+00 : f32
    %429 = vector.broadcast %cst_185 : f32 to vector<32x128xf32>
    %430 = arith.cmpf oge, %400, %429 : vector<32x128xf32>
    %cst_186 = arith.constant 0.000000e+00 : f32
    %431 = vector.broadcast %cst_186 : f32 to vector<32x128xf32>
    %432 = arith.subf %431, %428 : vector<32x128xf32>
    %433 = arith.select %430, %428, %432 : vector<32x128xi1>, vector<32x128xf32>
    %cst_187 = arith.constant 1.000000e+00 : f32
    %434 = vector.broadcast %cst_187 : f32 to vector<32x128xf32>
    %435 = arith.addf %434, %433 : vector<32x128xf32>
    %436 = arith.mulf %398, %435 : vector<32x128xf32>
    %c1_188 = arith.constant 1 : index
    %c0_189 = arith.constant 0 : index
    %c0_190 = arith.constant 0 : index
    %437 = vector.load %arg12[%c1_188, %c0_189, %c0_190] : memref<2x128x64xf32, #tpu.memory_space<vmem>>, vector<1x128x64xf32>
    %438 = vector.shape_cast %437 : vector<1x128x64xf32> to vector<128x64xf32>
    %cst_191 = arith.constant dense<0.000000e+00> : vector<32x64xf32>
    %439 = tpu.matmul %436, %438, %cst_191 {dimension_numbers = #tpu.dot_dimension_numbers<[1], [0], [0], [1], [0, 0, 1, 1], [], []>} : vector<32x128xf32>, vector<128x64xf32>, vector<32x64xf32> -> vector<32x64xf32>
    %c1_192 = arith.constant 1 : index
    %c0_193 = arith.constant 0 : index
    %c0_194 = arith.constant 0 : index
    %440 = vector.load %arg13[%c1_192, %c0_193, %c0_194] : memref<2x1x64xf32, #tpu.memory_space<vmem>>, vector<1x1x64xf32>
    %441 = vector.shape_cast %440 : vector<1x1x64xf32> to vector<1x64xf32>
    %442 = vector.broadcast %441 : vector<1x64xf32> to vector<32x64xf32>
    %443 = arith.addf %439, %442 : vector<32x64xf32>
    %444 = arith.addf %443, %389 : vector<32x64xf32>
    %c1_195 = arith.constant 1 : index
    %c0_196 = arith.constant 0 : index
    %c0_197 = arith.constant 0 : index
    %445 = vector.load %arg14[%c1_195, %c0_196, %c0_197] : memref<2x1x64xf32, #tpu.memory_space<vmem>>, vector<1x1x64xf32>
    %446 = vector.shape_cast %445 : vector<1x1x64xf32> to vector<1x64xf32>
    %c1_198 = arith.constant 1 : index
    %c0_199 = arith.constant 0 : index
    %c0_200 = arith.constant 0 : index
    %447 = vector.load %arg15[%c1_198, %c0_199, %c0_200] : memref<2x1x64xf32, #tpu.memory_space<vmem>>, vector<1x1x64xf32>
    %448 = vector.shape_cast %447 : vector<1x1x64xf32> to vector<1x64xf32>
    %cst_201 = arith.constant dense<0.000000e+00> : vector<32xf32>
    %449 = vector.multi_reduction <add>, %444, %cst_201 [1] : vector<32x64xf32> to vector<32xf32>
    %450 = vector.shape_cast %449 : vector<32xf32> to vector<32x1xf32>
    %cst_202 = arith.constant 6.400000e+01 : f32
    %451 = vector.broadcast %cst_202 : f32 to vector<32x1xf32>
    %452 = arith.divf %450, %451 : vector<32x1xf32>
    %453 = vector.broadcast %452 : vector<32x1xf32> to vector<32x64xf32>
    %454 = arith.subf %444, %453 : vector<32x64xf32>
    %455 = arith.mulf %454, %454 : vector<32x64xf32>
    %cst_203 = arith.constant dense<0.000000e+00> : vector<32xf32>
    %456 = vector.multi_reduction <add>, %455, %cst_203 [1] : vector<32x64xf32> to vector<32xf32>
    %457 = vector.shape_cast %456 : vector<32xf32> to vector<32x1xf32>
    %cst_204 = arith.constant 6.400000e+01 : f32
    %458 = vector.broadcast %cst_204 : f32 to vector<32x1xf32>
    %459 = arith.divf %457, %458 : vector<32x1xf32>
    %460 = vector.broadcast %452 : vector<32x1xf32> to vector<32x64xf32>
    %461 = arith.subf %444, %460 : vector<32x64xf32>
    %cst_205 = arith.constant 9.99999996E-13 : f32
    %462 = vector.broadcast %cst_205 : f32 to vector<32x1xf32>
    %463 = arith.addf %459, %462 : vector<32x1xf32>
    %464 = math.rsqrt %463 : vector<32x1xf32>
    %465 = vector.broadcast %464 : vector<32x1xf32> to vector<32x64xf32>
    %466 = arith.mulf %461, %465 : vector<32x64xf32>
    %467 = vector.broadcast %446 : vector<1x64xf32> to vector<32x64xf32>
    %468 = arith.mulf %466, %467 : vector<32x64xf32>
    %469 = vector.broadcast %448 : vector<1x64xf32> to vector<32x64xf32>
    %470 = arith.addf %468, %469 : vector<32x64xf32>
    %c0_206 = arith.constant 0 : index
    %c0_207 = arith.constant 0 : index
    %471 = vector.load %arg16[%c0_206, %c0_207] : memref<64x128xf32, #tpu.memory_space<vmem>>, vector<64x128xf32>
    %cst_208 = arith.constant dense<0.000000e+00> : vector<32x128xf32>
    %472 = tpu.matmul %470, %471, %cst_208 {dimension_numbers = #tpu.dot_dimension_numbers<[1], [0], [0], [1], [0, 0, 1, 1], [], []>} : vector<32x64xf32>, vector<64x128xf32>, vector<32x128xf32> -> vector<32x128xf32>
    %c0_209 = arith.constant 0 : index
    %c0_210 = arith.constant 0 : index
    %473 = vector.load %arg17[%c0_209, %c0_210] : memref<1x128xf32, #tpu.memory_space<vmem>>, vector<1x128xf32>
    %474 = vector.broadcast %473 : vector<1x128xf32> to vector<32x128xf32>
    %475 = arith.addf %472, %474 : vector<32x128xf32>
    %c0_211 = arith.constant 0 : index
    %c0_212 = arith.constant 0 : index
    %476 = vector.load %arg18[%c0_211, %c0_212] : memref<32x128xf32, #tpu.memory_space<vmem>>, vector<32x128xf32>
    tpu.vector_store %arg18[%c0_211, %c0_212], %475 {strides = array<i32>} : memref<32x128xf32, #tpu.memory_space<vmem>>, vector<32x128xf32>,
    return
  }
}

</mosaic_0001>

<bundles_post_ra>
// kernel: bertax_forward.1
= control target key start
LH: loop header
LB: loop body
LE: loop exit
PB: predicated region body
PF: predicated region fallthrough
CT: control target
= control target key end

     0   :  { %s7988_s0 = inlined_call_operand.vmem [shape: f32[32,64], index: 0, kind: input, shape index: {}]   ;;  %s7989_s1 = inlined_call_operand.vmem [shape: f32[2,16], index: 1, kind: input, shape index: {}]   ;;  %s7990_s2 = inlined_call_operand.vmem [shape: f32[1,64], index: 2, kind: input, shape index: {}]   ;;  %s7991_s3 = inlined_call_operand.vmem [shape: f32[1,64], index: 3, kind: input, shape index: {}]   ;;  %s7992_s4 = inlined_call_operand.vmem [shape: f32[2,64,192], index: 4, kind: input, shape index: {}]   ;;  %s7993_s5 = inlined_call_operand.vmem [shape: f32[2,1,192], index: 5, kind: input, shape index: {}]   ;;  %s7994_s6 = inlined_call_operand.vmem [shape: f32[2,64,64], index: 6, kind: input, shape index: {}]   ;;  %s7995_s7 = inlined_call_operand.vmem [shape: f32[2,1,64], index: 7, kind: input, shape index: {}]   ;;  %s7996_s8 = inlined_call_operand.vmem [shape: f32[2,1,64], index: 8, kind: input, shape index: {}]   ;;  %s7997_s9 = inlined_call_operand.vmem [shape: f32[2,1,64], index: 9, kind: input, shape index: {}]   ;;  %s7998_s10 = inlined_call_operand.vmem [shape: f32[2,64,128], index: 10, kind: input, shape index: {}]   ;;  %s7999_s11 = inlined_call_operand.vmem [shape: f32[2,1,128], index: 11, kind: input, shape index: {}]   ;;  %s8000_s12 = inlined_call_operand.vmem [shape: f32[2,128,64], index: 12, kind: input, shape index: {}]   ;;  %s8001_s13 = inlined_call_operand.vmem [shape: f32[2,1,64], index: 13, kind: input, shape index: {}]   ;;  %s8002_s14 = inlined_call_operand.vmem [shape: f32[2,1,64], index: 14, kind: input, shape index: {}]   ;;  %s8003_s15 = inlined_call_operand.vmem [shape: f32[2,1,64], index: 15, kind: input, shape index: {}]   ;;  %s8004_s16 = inlined_call_operand.vmem [shape: f32[64,128], index: 16, kind: input, shape index: {}]   ;;  %s8005_s17 = inlined_call_operand.vmem [shape: f32[1,128], index: 17, kind: input, shape index: {}]   ;;  %s8006_s18 = inlined_call_operand.hbm [shape: f32[32,128], index: 18, kind: output, shape index: {}]  }
   0x1   :  { %8010 = sst [smem:[#allocation6_spill]] %s7988_s0 }
   0x2   :  { %8011 = sst [smem:[#allocation7_spill]] %s7989_s1 }
   0x3   :  { %8012 = sst [smem:[#allocation8_spill]] %s7990_s2 }
   0x4   :  { %s8013_s29 = sld [smem:[#allocation6_spill]]  ;;  %vm66_vm0 = vcmask 523264  }
   0xa   :  { %v60_v0 = vld [vmem:[%s8013_s29] sm:$0xff]  ;;  %v62_v1 = vld [vmem:[%s8013_s29 + $0x10] sm:$0xff]  ;;  %v61_v2 = vld [vmem:[%s8013_s29 + $0x8] sm:$0xff] }
   0xb   :  { %v67_v3 = vsel %vm66_vm0, %v60_v0, 0.0  ;;  %v73_v4 = vsel %vm66_vm0, %v62_v1, 0.0  ;;  %v63_v5 = vld [vmem:[%s8013_s29 + $0x18] sm:$0xff] }
   0xc   :  { %23 = vsyncpa [#allocation4], 0  ;;  %68 = vadd.xlane.f32.xlu0 %v67_v3  ;;  %74 = vadd.xlane.f32.xlu1 %v73_v4  ;;  %v70_v6 = vsel %vm66_vm0, %v61_v2, 0.0  ;;  %v76_v7 = vsel %vm66_vm0, %v63_v5, 0.0  ;;  %v168_v28 = vld [vmem:[%s7992_s4 + $0x8] sm:$0xff]  ;;  %v170_v29 = vld [vmem:[%s7992_s4 + $0x18] sm:$0xff] }
   0xd   :  { %v5988_v30 = vpack.c.bf16 %v170_v29, %v168_v28  ;;  %v167_v31 = vld [vmem:[%s7992_s4] sm:$0xff]  ;;  %v169_v32 = vld [vmem:[%s7992_s4 + $0x10] sm:$0xff]  ;;  %v172_v34 = vld [vmem:[%s7992_s4 + $0x28] sm:$0xff]  ;;  %v6701_v50 = vmov 0.0   ;;  %s8014_s25 = sld [smem:[#allocation8_spill]]  ;;  %vm302_vm1 = vcmask 130048  }
   0xe   :  { %v5990_v33 = vpack.c.bf16 %v169_v32, %v167_v31  ;;  %v174_v35 = vld [vmem:[%s7992_s4 + $0x38] sm:$0xff]  ;;  %v171_v37 = vld [vmem:[%s7992_s4 + $0x20] sm:$0xff]  ;;  %v173_v38 = vld [vmem:[%s7992_s4 + $0x30] sm:$0xff]  ;;  %271 = vmatprep.mubr.f32.mxu0 %v6701_v50  ;;  %s6702_s29 = smov 64   ;;  %s8017_s19 = sld [smem:[#allocation7_spill]]  ;;  %vm1133_vm8 = vcmask 261248  }
   0xf   :  { %5989 = vmatprep.subr.bf16.mxu0 %v5988_v30  ;;  %v5992_v36 = vpack.c.bf16 %v174_v35, %v172_v34  ;;  %v5994_v39 = vpack.c.bf16 %v173_v38, %v171_v37  ;;  %v176_v40 = vld [vmem:[%s7992_s4 + $0x48] sm:$0xff]  ;;  %v178_v41 = vld [vmem:[%s7992_s4 + $0x58] sm:$0xff]  ;;  %v175_v43 = vld [vmem:[%s7992_s4 + $0x40] sm:$0xff]  ;;  %s6705_s1 = smov 112   ;;  %s6706_s20 = smov 48   ;;  %vm1562_vm9 = vcmask 392448  }
  0x10   :  { %71 = vadd.xlane.f32.xlu0 %v70_v6  ;;  %77 = vadd.xlane.f32.xlu1 %v76_v7  ;;  %v5996_v42 = vpack.c.bf16 %v178_v41, %v176_v40  ;;  %v177_v44 = vld [vmem:[%s7992_s4 + $0x50] sm:$0xff]  ;;  %v180_v45 = vld [vmem:[%s7992_s4 + $0x68] sm:$0xff]  ;;  %v182_v47 = vld [vmem:[%s7992_s4 + $0x78] sm:$0xff]  ;;  %s6707_s21 = smov 32   ;;  %s6708_s22 = smov 96   ;;  %vm1991_vm10 = vcmask 523648  }
  0x11   :  { %5991 = vmatpush1.bf16.msra.mxu0 %v5990_v33  ;;  %v5998_v46 = vpack.c.bf16 %v177_v44, %v175_v43  ;;  %v179_v48 = vld [vmem:[%s7992_s4 + $0x60] sm:$0xff]  ;;  %v181_v49 = vld [vmem:[%s7992_s4 + $0x70] sm:$0xff]  ;;  %v6000_v51 = vpack.c.bf16 %v182_v47, %v180_v45  ;;  %vm6965_vm2 = vmpackc.low %vm302_vm1, %vm302_vm1  ;;  %s6709_s2 = smov 16   ;;  %s8008_s23 = smov 80  }
  0x12   :  { %5993 = vmatprep.subr.bf16.mxu0 %v5992_v36  ;;  %v6002_v52 = vpack.c.bf16 %v181_v49, %v179_v48  ;;  %v5154_v4 = vld [vmem:[%s7991_s3] ss:$0 sm:$0xff] }
  0x15   :  { %5995 = vmatpush1.bf16.msra.mxu0 %v5994_v39 }
  0x16   :  { %5997 = vmatprep.subr.bf16.mxu0 %v5996_v42 }
  0x19   :  { %5999 = vmatpush1.bf16.msra.mxu0 %v5998_v46 }
  0x1a   :  { %6001 = vmatprep.subr.bf16.mxu0 %v6000_v51 }
  0x1d   :  { %6003 = vmatpush1.bf16.msra.mxu0 %v6002_v52 }
  0x99   :  { %v69_v8 = vpop.xlane.xlu0 %68  ;;  %v75_v9 = vpop.xlane.xlu1 %74 }
  0x9a   :  { %v80_v10 = vmul.f32 0.015625, %v69_v8  ;;  %v82_v11 = vmul.f32 0.015625, %v75_v9 }
  0x9c   :  { %v6825_v12 = vsub.f32 %v60_v0, %v80_v10  ;;  %v6827_v13 = vsub.f32 %v62_v1, %v82_v11 }
  0x9d   :  { %v72_v14 = vpop.xlane.xlu0 %71  ;;  %v78_v15 = vpop.xlane.xlu1 %77 }
  0x9e   :  { %v81_v16 = vmul.f32 0.015625, %v72_v14  ;;  %v83_v17 = vmul.f32 0.015625, %v78_v15  ;;  %v88_v18 = vmul.f32 %v6825_v12, %v6825_v12  ;;  %v90_v19 = vmul.f32 %v6827_v13, %v6827_v13 }
  0xa0   :  { %v6833_v20 = vsub.f32 %v61_v2, %v81_v16  ;;  %v6835_v21 = vsub.f32 %v63_v5, %v83_v17  ;;  %v92_v22 = vsel %vm66_vm0, %v88_v18, 0.0  ;;  %v98_v23 = vsel %vm66_vm0, %v90_v19, 0.0  ;;  %v5153_v2 = vld [vmem:[%s8014_s25] ss:$0 sm:$0xff] }
  0xa1   :  { %93 = vadd.xlane.f32.xlu0 %v92_v22  ;;  %v146_v19 = vlaneseq  ;;  %v183_v22 = vld [vmem:[%s7993_s5] sm:$0x3] }
  0xa2   :  { %v89_v24 = vmul.f32 %v6833_v20, %v6833_v20  ;;  %v91_v25 = vmul.f32 %v6835_v21, %v6835_v21 }
  0xa4   :  { %v95_v26 = vsel %vm66_vm0, %v89_v24, 0.0  ;;  %v101_v27 = vsel %vm66_vm0, %v91_v25, 0.0 }
  0xa5   :  { %99 = vadd.xlane.f32.xlu0 %v98_v23  ;;  %96 = vadd.xlane.f32.xlu1 %v95_v26 }
  0xa9   :  { %102 = vadd.xlane.f32.xlu1 %v101_v27 }
 0x12e   :  { %v94_v53 = vpop.xlane.xlu0 %93 }
 0x12f   :  { %v104_v54 = vmul.f32 0.015625, %v94_v53 }
 0x131   :  { %v108_v55 = vadd.f32 1e-12, %v104_v54 }
 0x132   :  { %v97_v56 = vpop.xlane.xlu1 %96  ;;  %v100_v57 = vpop.xlane.xlu0 %99 }
 0x133   :  { %6477 = vrsqrt.f32 %v108_v55  ;;  %v105_v58 = vmul.f32 0.015625, %v97_v56  ;;  %v106_v59 = vmul.f32 0.015625, %v100_v57 }
 0x135   :  { %v109_v60 = vadd.f32 1e-12, %v105_v58  ;;  %v110_v61 = vadd.f32 1e-12, %v106_v59  ;;  %v6703_v58 = vmov 1966171168  }
 0x136   :  { %v103_v62 = vpop.xlane.xlu1 %102  ;;  %v144_v59 = vunpack.c.l.s4 %v6703_v58 }
 0x137   :  { %6479 = vrsqrt.f32 %v109_v60  ;;  %v107_v63 = vmul.f32 0.015625, %v103_v62  ;;  %v140_v60 = vld [vmem:[%s8017_s19] sm:$0x3] }
 0x138   :  { %6481 = vrsqrt.f32 %v110_v61  ;;  %v145_v61 = vunpack.c.0.s8 %v144_v59  ;;  %vm141_vm3 = vcmp.gt.f32.partialorder %v140_v60, 0.0 }
 0x139   :  { %v111_v0 = vadd.f32 1e-12, %v107_v63  ;;  %v6704_v63 = vmov 0  }
 0x13b   :  { %6483 = vrsqrt.f32 %v111_v0  ;;  %v142_v0 = vsel %vm141_vm3, 1, %v6704_v63 }
 0x13d   :  { %v6478_v1 = vpop.eup %6477 }
 0x13e   :  { %v116_v3 = vmul.f32 %v6478_v1, %v6825_v12 }
 0x140   :  { %v126_v5 = vmul.f32 %v5153_v2, %v116_v3 }
 0x141   :  { %v6480_v6 = vpop.eup %6479 }
 0x142   :  { %v6482_v7 = vpop.eup %6481  ;;  %v6901_v8 = vadd.f32 %v5154_v4, %v126_v5  ;;  %v117_v9 = vmul.f32 %v6480_v6, %v6833_v20  ;;  %v6923_v20 = vshrl.u32 %v146_v19, 7 }
 0x143   :  { %v118_v10 = vmul.f32 %v6482_v7, %v6827_v13 }
 0x144   :  { %5155 = vmatmul.mubr.msk.f32.vlgmr.msra.gmra.mrb[0].mxu0 %vm66_vm0, %v6901_v8  ;;  %v127_v11 = vmul.f32 %v5153_v2, %v117_v9  ;;  %v191_v24 = vsub.s32 1, %v6923_v20  ;;  %v148_v62 = vsub.s32 %v145_v61, %v6923_v20 }
 0x145   :  { %v6484_v14 = vpop.eup %6483  ;;  %277 = vmatprep.mubr.f32.mxu0 %v6701_v50  ;;  %v128_v15 = vmul.f32 %v5153_v2, %v118_v10 }
 0x146   :  { %v6908_v12 = vadd.f32 %v5154_v4, %v127_v11  ;;  %v119_v16 = vmul.f32 %v6484_v14, %v6835_v21  ;;  %v6926_v21 = vsub.s32 0, %v6923_v20  ;;  %v192_v28 = vrot.slane %v183_v22, %v191_v24 }
 0x147   :  { %v6914_v17 = vadd.f32 %v5154_v4, %v128_v15  ;;  %v149_v1 = vrot.slane %v142_v0, %v148_v62 }
 0x148   :  { %5156 = vmatmul.mubr.msk.f32.gmra.mrb[2].mxu0 %vm66_vm0, %v6908_v12  ;;  %v129_v13 = vmul.f32 %v5153_v2, %v119_v16  ;;  %v188_v23 = vrot.slane %v183_v22, %v6926_v21 }
 0x149   :  { %283 = vmatprep.mubr.f32.mxu0 %v6701_v50  ;;  %v157_v2 = vrot.slane %v149_v1, %v148_v62  ;;  %v150_v3 = vcombine.high %v149_v1, %v149_v1 }
 0x14a   :  { %v6919_v18 = vadd.f32 %v5154_v4, %v129_v13 }
 0x14b   :  { %vm165_vm4 = vcmp.ne.s32.totalorder %v157_v2, 0  ;;  %v164_v5 = vrot.slane %v150_v3, %v148_v62 }
 0x14c   :  { %5157 = vmatmul.mubr.msk.f32.gmra.mrb[4].mxu0 %vm66_vm0, %v6914_v17  ;;  %v479_v4 = vsel %vm165_vm4, 1, %v6704_v63 }
 0x14d   :  { %289 = vmatprep.mubr.f32.mxu0 %v6701_v50  ;;  %v484_v6 = vrot.slane %v479_v4, %v6926_v21  ;;  %vm166_vm5 = vcmp.ne.s32.totalorder %v164_v5, 0 }
 0x14e   :  { %v480_v10 = vsel %vm166_vm5, 1, %v6704_v63 }
 0x14f   :  { %vm6989_vm6 = vcmp.eq.s32.totalorder %v484_v6, 1  ;;  %v488_v13 = vrot.slane %v480_v10, %v6926_v21 }
 0x150   :  { %5158 = vmatmul.mubr.msk.f32.gmra.mrb[6].mxu0 %vm66_vm0, %v6919_v18 }
 0x151   :  { %vm7000_vm7 = vcmp.eq.s32.totalorder %v488_v13, 1 }
 0x217   :  { %v273_v25 = vpop.f32.mrb[0].mxu0 }
 0x218   :  { %v6933_v26 = vadd.f32 %v273_v25, %v188_v23  ;;  %v275_v27 = vpop.f32.mrb[1].mxu0 }
 0x219   :  { %v276_v32 = vadd.f32 %v275_v27, %v192_v28 }
 0x21a   :  { %5582 = vmatprep.mubr.msk.f32.mxu1 %vm302_vm1, %v6933_v26 }
 0x21b   :  { %v279_v29 = vpop.f32.mrb[2].mxu0 }
 0x21c   :  { %v6939_v30 = vadd.f32 %v279_v29, %v188_v23  ;;  %v281_v31 = vpop.f32.mrb[3].mxu0 }
 0x21d   :  { %v282_v33 = vadd.f32 %v281_v31, %v192_v28 }
 0x21e   :  { %v6943_v34 = vpack.i.bf16 %v6939_v30, %v6933_v26 }
 0x21f   :  { %v285_v35 = vpop.f32.mrb[4].mxu0  ;;  %v6016_v36 = vpack.c.bf16 %v282_v33, %v276_v32  ;;  %v6945_v37 = vpack.i.bf16 %v282_v33, %v276_v32 }
 0x220   :  { %6338 = vrot.lane.b32.xlu0 %v6943_v34, %s6702_s29  ;;  %v287_v38 = vpop.f32.mrb[5].mxu0  ;;  %v6949_v40 = vadd.f32 %v285_v35, %v188_v23 }
 0x221   :  { %v288_v43 = vadd.f32 %v287_v38, %v192_v28 }
 0x223   :  { %v291_v39 = vpop.f32.mrb[6].mxu0 }
 0x224   :  { %v6951_v41 = vadd.f32 %v291_v39, %v188_v23  ;;  %v293_v42 = vpop.f32.mrb[7].mxu0 }
 0x225   :  { %v294_v44 = vadd.f32 %v293_v42, %v192_v28 }
 0x226   :  { %v6955_v45 = vpack.i.bf16 %v6951_v41, %v6949_v40 }
 0x227   :  { %v6957_v46 = vpack.c.bf16 %v294_v44, %v288_v43  ;;  %v6959_v47 = vpack.i.bf16 %v294_v44, %v288_v43 }
 0x228   :  { %6343 = vrot.lane.b32.xlu1 %v6955_v45, %s6702_s29 }
 0x292   :  { %v6339_v48 = vpop.permute.xlu0 %6338 }
 0x293   :  { %v6341_v49 = vunpack.i.h.bf16 %v6339_v48  ;;  %v6340_v51 = vunpack.i.l.bf16 %v6339_v48 }
 0x295   :  { %v6004_v53 = vpack.c.bf16 %v6341_v49, %v6340_v51 }
 0x297   :  { %6006 = vmatprep.subr.msk.bf16.mxu1 %vm6965_vm2, %v6004_v53 }
 0x298   :  { %6009 = vmatpush3.bf16.xpose.msk.msra.mxu1 %vm6965_vm2, %v6004_v53 }
 0x29a   :  { %v6344_v54 = vpop.permute.xlu1 %6343 }
 0x29b   :  { %v6346_v55 = vunpack.i.h.bf16 %v6344_v54  ;;  %v6345_v56 = vunpack.i.l.bf16 %v6344_v54 }
 0x29d   :  { %v6010_v57 = vpack.c.bf16 %v6346_v55, %v6345_v56 }
 0x29f   :  { %5583 = vmatmul.mubr.msk.f32.vlgmr.msra.gmra.mrb[0].mxu1 %vm302_vm1, %v6939_v30  ;;  %6012 = vmatprep.subr.msk.bf16.mxu1 %vm6965_vm2, %v6010_v57 }
 0x2a0   :  { %6015 = vmatpush3.bf16.xpose.msk.msra.mxu1 %vm6965_vm2, %v6010_v57  ;;  %5589 = vmatprep.mubr.msk.f32.mxu1 %vm302_vm1, %v6949_v40 }
 0x2a1   :  { %6017 = vmatprep.subr.bf16.mxu1 %v6016_v36 }
 0x2a7   :  { %5590 = vmatmul.mubr.msk.f32.vlgmr.msra.gmra.mrb[2].mxu1 %vm302_vm1, %v6951_v41 }
 0x2a8   :  { %6019 = vmatpush3.bf16.msra.mxu1 %v6016_v36 }
 0x2a9   :  { %6021 = vmatprep.subr.bf16.mxu1 %v6957_v46 }
 0x372   :  { %v5584_v9 = vpop.f32.mrb[0].mxu1 }
 0x373   :  { %v476_v11 = vmul.f32 0.25, %v5584_v9  ;;  %v377_v14 = vpop.f32.mrb[1].mxu1 }
 0x374   :  { %v475_v15 = vmul.f32 0.25, %v377_v14 }
 0x375   :  { %v492_v16 = vsel %vm6989_vm6, %v476_v11, -3.4028235e+38 }
 0x376   :  { %v498_v19 = vsel %vm302_vm1, %v492_v16, -inf  ;;  %v491_v22 = vsel %vm6989_vm6, %v475_v15, -3.4028235e+38 }
 0x377   :  { %499 = vmax.xlane.f32.xlu0 %v498_v19  ;;  %v495_v23 = vsel %vm302_vm1, %v491_v22, -inf }
 0x378   :  { %496 = vmax.xlane.f32.xlu1 %v495_v23 }
 0x37a   :  { %v5591_v27 = vpop.f32.mrb[2].mxu1 }
 0x37b   :  { %v478_v28 = vmul.f32 0.25, %v5591_v27  ;;  %v466_v29 = vpop.f32.mrb[3].mxu1 }
 0x37c   :  { %v477_v31 = vmul.f32 0.25, %v466_v29 }
 0x37d   :  { %v494_v32 = vsel %vm7000_vm7, %v478_v28, -3.4028235e+38 }
 0x37e   :  { %v504_v33 = vsel %vm302_vm1, %v494_v32, -inf  ;;  %v493_v35 = vsel %vm7000_vm7, %v477_v31, -3.4028235e+38 }
 0x37f   :  { %505 = vmax.xlane.f32.xlu1 %v504_v33  ;;  %v501_v36 = vsel %vm302_vm1, %v493_v35, -inf }
 0x380   :  { %502 = vmax.xlane.f32.xlu0 %v501_v36 }
 0x404   :  { %v500_v38 = vpop.xlane.xlu0 %499 }
 0x405   :  { %v508_v39 = vsub.f32 %v492_v16, %v500_v38  ;;  %v497_v42 = vpop.xlane.xlu1 %496 }
 0x406   :  { %v507_v43 = vsub.f32 %v491_v22, %v497_v42 }
 0x407   :  { %v513_v44 = vmul.f32 1.442695, %v508_v39 }
 0x408   :  { %v511_v48 = vmul.f32 1.442695, %v507_v43 }
 0x409   :  { %6485 = vpow2.f32 %v513_v44 }
 0x40a   :  { %6487 = vpow2.f32 %v511_v48 }
 0x40c   :  { %v506_v49 = vpop.xlane.xlu1 %505 }
 0x40d   :  { %v510_v51 = vsub.f32 %v494_v32, %v506_v49  ;;  %v503_v53 = vpop.xlane.xlu0 %502 }
 0x40e   :  { %v509_v54 = vsub.f32 %v493_v35, %v503_v53 }
 0x40f   :  { %v517_v55 = vmul.f32 1.442695, %v510_v51 }
 0x410   :  { %v515_v56 = vmul.f32 1.442695, %v509_v54 }
 0x411   :  { %6489 = vpow2.f32 %v517_v55 }
 0x412   :  { %6491 = vpow2.f32 %v515_v56 }
 0x413   :  { %v6486_v57 = vpop.eup %6485 }
 0x414   :  { %v6488_v58 = vpop.eup %6487  ;;  %v522_v59 = vsel %vm302_vm1, %v6486_v57, 0.0 }
 0x415   :  { %523 = vadd.xlane.f32.xlu1 %v522_v59  ;;  %v519_v60 = vsel %vm302_vm1, %v6488_v58, 0.0 }
 0x416   :  { %520 = vadd.xlane.f32.xlu0 %v519_v60 }
 0x41b   :  { %v6490_v61 = vpop.eup %6489 }
 0x41c   :  { %v6492_v62 = vpop.eup %6491  ;;  %v528_v63 = vsel %vm302_vm1, %v6490_v61, 0.0 }
 0x41d   :  { %529 = vadd.xlane.f32.xlu1 %v528_v63  ;;  %v525_v0 = vsel %vm302_vm1, %v6492_v62, 0.0 }
 0x41e   :  { %526 = vadd.xlane.f32.xlu0 %v525_v0 }
 0x42e   :  { %796 = vrot.lane.b32.xlu1 %v6949_v40, %s6705_s1 }
 0x432   :  { %798 = vrot.lane.b32.xlu1 %v6951_v41, %s6705_s1 }
 0x434   :  { %6348 = vrot.lane.b32.xlu0 %v6955_v45, %s6706_s20 }
 0x4a2   :  { %v524_v1 = vpop.xlane.xlu1 %523 }
 0x4a3   :  { %6493 = vrcp.f32 %v524_v1  ;;  %v521_v2 = vpop.xlane.xlu0 %520 }
 0x4a4   :  { %6495 = vrcp.f32 %v521_v2 }
 0x4aa   :  { %v530_v3 = vpop.xlane.xlu1 %529 }
 0x4ab   :  { %6497 = vrcp.f32 %v530_v3  ;;  %v527_v4 = vpop.xlane.xlu0 %526 }
 0x4ac   :  { %6499 = vrcp.f32 %v527_v4 }
 0x4ad   :  { %v6494_v5 = vpop.eup %6493 }
 0x4ae   :  { %v6496_v6 = vpop.eup %6495  ;;  %v536_v15 = vmul.f32 %v6494_v5, %v6486_v57  ;;  %v797_v27 = vpop.permute.xlu1 %796 }
 0x4af   :  { %v6349_v9 = vpop.permute.xlu0 %6348  ;;  %v535_v10 = vmul.f32 %v6496_v6, %v6488_v58 }
 0x4b0   :  { %v6351_v11 = vunpack.i.h.bf16 %v6349_v9  ;;  %v6350_v14 = vunpack.i.l.bf16 %v6349_v9 }
 0x4b1   :  { %5596 = vmatprep.mubr.msk.f32.mxu1 %vm302_vm1, %v535_v10 }
 0x4b2   :  { %v6030_v16 = vpack.c.bf16 %v6351_v11, %v6350_v14  ;;  %5597 = vmatmul.mubr.msk.f32.vlgmr.msra.gmra.mrb[4].mxu1 %vm302_vm1, %v536_v15  ;;  %v799_v28 = vpop.permute.xlu1 %798 }
 0x4b3   :  { %6023 = vmatpush3.bf16.msra.mxu1 %v6957_v46 }
 0x4b4   :  { %6032 = vmatprep.subr.msk.bf16.mxu1 %vm6965_vm2, %v6030_v16 }
 0x4b5   :  { %v6498_v13 = vpop.eup %6497 }
 0x4b6   :  { %v6500_v19 = vpop.eup %6499  ;;  %v538_v23 = vmul.f32 %v6498_v13, %v6490_v61 }
 0x4b7   :  { %v537_v22 = vmul.f32 %v6500_v19, %v6492_v62 }
 0x4b9   :  { %5603 = vmatprep.mubr.msk.f32.mxu1 %vm302_vm1, %v537_v22 }
 0x4ba   :  { %5604 = vmatmul.mubr.msk.f32.vlgmr.msra.gmra.mrb[6].mxu1 %vm302_vm1, %v538_v23 }
 0x4bb   :  { %5617 = vmatprep.mubr.msk.f32.mxu1 %vm302_vm1, %v797_v27 }
 0x4bc   :  { %6035 = vmatpush3.bf16.xpose.msk.msra.mxu1 %vm6965_vm2, %v6030_v16 }
 0x4c3   :  { %5618 = vmatmul.mubr.msk.f32.vlgmr.msra.gmra.mrb[8].mxu1 %vm302_vm1, %v799_v28 }
 0x585   :  { %v5598_v46 = vpop.f32.mrb[4].mxu1 }
 0x586   :  { %702 = vst.msk [vmem:[#allocation2 + $0x8] sm:$0xff] %vm302_vm1, %v5598_v46  ;;  %v611_v29 = vpop.f32.mrb[5].mxu1 }
 0x587   :  { %701 = vst.msk [vmem:[#allocation2] sm:$0xff] %vm302_vm1, %v611_v29 }
 0x58d   :  { %v5605_v31 = vpop.f32.mrb[6].mxu1 }
 0x58e   :  { %704 = vst.msk [vmem:[#allocation2 + $0x18] sm:$0xff] %vm302_vm1, %v5605_v31  ;;  %v692_v32 = vpop.f32.mrb[7].mxu1 }
 0x58f   :  { %703 = vst.msk [vmem:[#allocation2 + $0x10] sm:$0xff] %vm302_vm1, %v692_v32 }
 0x596   :  { %v5619_v33 = vpop.f32.mrb[8].mxu1 }
 0x597   :  { %v890_v35 = vmul.f32 0.25, %v5619_v33  ;;  %v878_v36 = vpop.f32.mrb[9].mxu1 }
 0x598   :  { %v889_v38 = vmul.f32 0.25, %v878_v36 }
 0x599   :  { %v894_v39 = vsel %vm7000_vm7, %v890_v35, -3.4028235e+38 }
 0x59a   :  { %v904_v42 = vsel %vm302_vm1, %v894_v39, -inf  ;;  %v893_v43 = vsel %vm7000_vm7, %v889_v38, -3.4028235e+38 }
 0x59b   :  { %905 = vmax.xlane.f32.xlu0 %v904_v42  ;;  %v901_v44 = vsel %vm302_vm1, %v893_v43, -inf }
 0x59c   :  { %902 = vmax.xlane.f32.xlu1 %v901_v44 }
 0x5ad   :  { %6353 = vrot.lane.b32.xlu1 %v6943_v34, %s6706_s20 }
 0x5b1   :  { %6358 = vrot.lane.b32.xlu0 %v6959_v47, %s6705_s1  ;;  %705 = vrot.lane.b32.xlu1 %v6933_v26, %s6705_s1 }
 0x5b5   :  { %6363 = vrot.lane.b32.xlu1 %v6943_v34, %s6707_s21 }
 0x5b9   :  { %707 = vrot.lane.b32.xlu1 %v6939_v30, %s6705_s1 }
 0x5bd   :  { %6368 = vrot.lane.b32.xlu1 %v6955_v45, %s6707_s21 }
 0x5c1   :  { %1229 = vrot.lane.b32.xlu1 %v6949_v40, %s6708_s22 }
 0x628   :  { %v906_v48 = vpop.xlane.xlu0 %905 }
 0x629   :  { %v910_v49 = vsub.f32 %v894_v39, %v906_v48  ;;  %v903_v51 = vpop.xlane.xlu1 %902 }
 0x62a   :  { %v909_v53 = vsub.f32 %v893_v43, %v903_v51 }
 0x62b   :  { %v917_v54 = vmul.f32 1.442695, %v910_v49 }
 0x62c   :  { %v915_v55 = vmul.f32 1.442695, %v909_v53  ;;  %v6359_v56 = vpop.permute.xlu0 %6358 }
 0x62d   :  { %6501 = vpow2.f32 %v917_v54  ;;  %v6361_v57 = vunpack.i.h.bf16 %v6359_v56  ;;  %v6360_v58 = vunpack.i.l.bf16 %v6359_v56  ;;  %v6354_v59 = vpop.permute.xlu1 %6353 }
 0x62e   :  { %v6356_v60 = vunpack.i.h.bf16 %v6354_v59  ;;  %v6355_v61 = vunpack.i.l.bf16 %v6354_v59  ;;  %6503 = vpow2.f32 %v915_v55 }
 0x62f   :  { %v6040_v62 = vpack.c.bf16 %v6361_v57, %v6360_v58 }
 0x630   :  { %v6024_v63 = vpack.c.bf16 %v6356_v60, %v6355_v61 }
 0x631   :  { %6041 = vmatprep.subr.bf16.mxu1 %v6040_v62  ;;  %v706_v0 = vpop.permute.xlu1 %705 }
 0x632   :  { %6026 = vmatprep.subr.msk.bf16.mxu0 %vm6965_vm2, %v6024_v63  ;;  %5610 = vmatprep.mubr.msk.f32.mxu0 %vm302_vm1, %v706_v0 }
 0x633   :  { %6043 = vmatpush3.bf16.msra.mxu1 %v6040_v62  ;;  %6029 = vmatpush3.bf16.xpose.msk.msra.mxu0 %vm6965_vm2, %v6024_v63 }
 0x635   :  { %v6364_v1 = vpop.permute.xlu1 %6363 }
 0x636   :  { %v6366_v2 = vunpack.i.h.bf16 %v6364_v1  ;;  %v6365_v3 = vunpack.i.l.bf16 %v6364_v1 }
 0x637   :  { %v6502_v4 = vpop.eup %6501 }
 0x638   :  { %v6044_v5 = vpack.c.bf16 %v6366_v2, %v6365_v3  ;;  %v928_v6 = vsel %vm302_vm1, %v6502_v4, 0.0  ;;  %v6504_v9 = vpop.eup %6503 }
 0x639   :  { %929 = vadd.xlane.f32.xlu0 %v928_v6  ;;  %v708_v10 = vpop.permute.xlu1 %707  ;;  %v925_v11 = vsel %vm302_vm1, %v6504_v9, 0.0 }
 0x63a   :  { %5611 = vmatmul.mubr.msk.f32.vlgmr.msra.gmra.mrb[8].mxu0 %vm302_vm1, %v708_v10  ;;  %6046 = vmatprep.subr.msk.bf16.mxu1 %vm6965_vm2, %v6044_v5 }
 0x63d   :  { %926 = vadd.xlane.f32.xlu0 %v925_v11  ;;  %v6369_v16 = vpop.permute.xlu1 %6368 }
 0x63e   :  { %v6371_v22 = vunpack.i.h.bf16 %v6369_v16  ;;  %v6370_v23 = vunpack.i.l.bf16 %v6369_v16 }
 0x640   :  { %v6050_v46 = vpack.c.bf16 %v6371_v22, %v6370_v23 }
 0x641   :  { %v1230_v32 = vpop.permute.xlu1 %1229 }
 0x653   :  { %1138 = vrot.lane.b32.xlu0 %v6933_v26, %s6708_s22 }
 0x657   :  { %1140 = vrot.lane.b32.xlu0 %v6939_v30, %s6708_s22 }
 0x65b   :  { %1231 = vrot.lane.b32.xlu0 %v6951_v41, %s6708_s22 }
 0x6c6   :  { %v930_v14 = vpop.xlane.xlu0 %929 }
 0x6c7   :  { %6505 = vrcp.f32 %v930_v14 }
 0x6ca   :  { %v927_v15 = vpop.xlane.xlu0 %926 }
 0x6cb   :  { %6507 = vrcp.f32 %v927_v15 }
 0x6ce   :  { %v1139_v29 = vpop.permute.xlu0 %1138 }
 0x6d1   :  { %v6506_v13 = vpop.eup %6505 }
 0x6d2   :  { %v938_v28 = vmul.f32 %v6506_v13, %v6502_v4  ;;  %v1141_v31 = vpop.permute.xlu0 %1140 }
 0x6d5   :  { %v6508_v19 = vpop.eup %6507 }
 0x6d6   :  { %v937_v27 = vmul.f32 %v6508_v19, %v6504_v9  ;;  %v1232_v33 = vpop.permute.xlu0 %1231 }
 0x6d8   :  { %5631 = vmatprep.mubr.msk.f32.mxu1 %vm302_vm1, %v937_v27 }
 0x6d9   :  { %5632 = vmatmul.mubr.msk.f32.vlgmr.msra.gmra.mrb[10].mxu1 %vm302_vm1, %v938_v28 }
 0x6da   :  { %6049 = vmatpush3.bf16.xpose.msk.msra.mxu1 %vm6965_vm2, %v6044_v5  ;;  %5638 = vmatprep.mubr.msk.f32.mxu1 %vm302_vm1, %v1139_v29 }
 0x6db   :  { %6052 = vmatprep.subr.msk.bf16.mxu1 %vm6965_vm2, %v6050_v46 }
 0x6e1   :  { %5639 = vmatmul.mubr.msk.f32.vlgmr.msra.gmra.mrb[12].mxu1 %vm302_vm1, %v1141_v31 }
 0x6e2   :  { %6055 = vmatpush3.bf16.xpose.msk.msra.mxu1 %vm6965_vm2, %v6050_v46  ;;  %5645 = vmatprep.mubr.msk.f32.mxu1 %vm302_vm1, %v1230_v32 }
 0x6e9   :  { %5646 = vmatmul.mubr.msk.f32.vlgmr.msra.gmra.mrb[14].mxu1 %vm302_vm1, %v1232_v33 }
 0x70d   :  { %v5612_v35 = vpop.f32.mrb[8].mxu0 }
 0x70e   :  { %v888_v36 = vmul.f32 0.25, %v5612_v35  ;;  %v787_v38 = vpop.f32.mrb[9].mxu0 }
 0x70f   :  { %v887_v39 = vmul.f32 0.25, %v787_v38 }
 0x710   :  { %v892_v42 = vsel %vm6989_vm6, %v888_v36, -3.4028235e+38 }
 0x711   :  { %v898_v43 = vsel %vm302_vm1, %v892_v42, -inf  ;;  %v891_v44 = vsel %vm6989_vm6, %v887_v39, -3.4028235e+38 }
 0x712   :  { %899 = vmax.xlane.f32.xlu0 %v898_v43  ;;  %v895_v48 = vsel %vm302_vm1, %v891_v44, -inf }
 0x713   :  { %896 = vmax.xlane.f32.xlu1 %v895_v48 }
 0x79f   :  { %v900_v55 = vpop.xlane.xlu0 %899 }
 0x7a0   :  { %v897_v49 = vpop.xlane.xlu1 %896  ;;  %v908_v58 = vsub.f32 %v892_v42, %v900_v55 }
 0x7a1   :  { %v907_v51 = vsub.f32 %v891_v44, %v897_v49 }
 0x7a2   :  { %v913_v60 = vmul.f32 1.442695, %v908_v58 }
 0x7a3   :  { %v911_v53 = vmul.f32 1.442695, %v907_v51 }
 0x7a5   :  { %6509 = vpow2.f32 %v911_v53 }
 0x7a6   :  { %6511 = vpow2.f32 %v913_v60 }
 0x7ac   :  { %v7089_v54 = vpop.f32.mrb[10].mxu1 }
 0x7ad   :  { %v7091_v56 = vpop.f32.mrb[11].mxu1 }
 0x7af   :  { %v6510_v57 = vpop.eup %6509 }
 0x7b0   :  { %v919_v59 = vsel %vm302_vm1, %v6510_v57, 0.0  ;;  %v7103_v14 = vpop.eup %6511 }
 0x7b1   :  { %920 = vadd.xlane.f32.xlu1 %v919_v59  ;;  %v922_v15 = vsel %vm302_vm1, %v7103_v14, 0.0 }
 0x7b4   :  { %v5640_v61 = vpop.f32.mrb[12].mxu1 }
 0x7b5   :  { %v1220_v62 = vpop.f32.mrb[13].mxu1  ;;  %v1321_v63 = vmul.f32 0.25, %v5640_v61 }
 0x7b6   :  { %v1320_v0 = vmul.f32 0.25, %v1220_v62 }
 0x7b7   :  { %v1325_v3 = vsel %vm6989_vm6, %v1321_v63, -3.4028235e+38 }
 0x7b8   :  { %v1324_v1 = vsel %vm6989_vm6, %v1320_v0, -3.4028235e+38  ;;  %v1331_v9 = vsel %vm302_vm1, %v1325_v3, -inf }
 0x7b9   :  { %v1328_v2 = vsel %vm302_vm1, %v1324_v1, -inf }
 0x7ba   :  { %1329 = vmax.xlane.f32.xlu0 %v1328_v2 }
 0x7bc   :  { %v5647_v4 = vpop.f32.mrb[14].mxu1 }
 0x7bd   :  { %v1323_v5 = vmul.f32 0.25, %v5647_v4  ;;  %v1311_v6 = vpop.f32.mrb[15].mxu1 }
 0x7be   :  { %1332 = vmax.xlane.f32.xlu0 %v1331_v9  ;;  %v1322_v16 = vmul.f32 0.25, %v1311_v6 }
 0x7bf   :  { %v1327_v10 = vsel %vm7000_vm7, %v1323_v5, -3.4028235e+38 }
 0x7c0   :  { %v1337_v11 = vsel %vm302_vm1, %v1327_v10, -inf  ;;  %v7117_v13 = vsel %vm7000_vm7, %v1322_v16, -3.4028235e+38 }
 0x7c1   :  { %v1334_v19 = vsel %vm302_vm1, %v7117_v13, -inf }
 0x7c2   :  { %1338 = vmax.xlane.f32.xlu0 %v1337_v11  ;;  %6373 = vrot.lane.b32.xlu1 %v6945_v37, %s6705_s1 }
 0x7c6   :  { %923 = vadd.xlane.f32.xlu0 %v922_v15  ;;  %6383 = vrot.lane.b32.xlu1 %v6959_v47, %s6708_s22 }
 0x7ca   :  { %6388 = vrot.lane.b32.xlu1 %v6943_v34, %s6709_s2 }
 0x7dc   :  { %6378 = vrot.lane.b32.xlu0 %v6945_v37, %s6708_s22 }
 0x7ee   :  { %1335 = vmax.xlane.f32.xlu1 %v1334_v19 }
 0x7ff   :  { %1567 = vrot.lane.b32.xlu1 %v6933_v26, %s8008_s23 }
 0x83e   :  { %v921_v22 = vpop.xlane.xlu1 %920 }
 0x83f   :  { %6513 = vrcp.f32 %v921_v22 }
 0x842   :  { %v6374_v23 = vpop.permute.xlu1 %6373 }
 0x843   :  { %v6376_v34 = vunpack.i.h.bf16 %v6374_v23  ;;  %v6375_v27 = vunpack.i.l.bf16 %v6374_v23 }
 0x845   :  { %v6036_v28 = vpack.c.bf16 %v6376_v34, %v6375_v27 }
 0x846   :  { %v6384_v46 = vpop.permute.xlu1 %6383 }
 0x847   :  { %v1330_v29 = vpop.xlane.xlu0 %1329  ;;  %v6386_v31 = vunpack.i.h.bf16 %v6384_v46  ;;  %v6385_v32 = vunpack.i.l.bf16 %v6384_v46  ;;  %6037 = vmatprep.subr.bf16.mxu0 %v6036_v28 }
 0x848   :  { %v1340_v33 = vsub.f32 %v1324_v1, %v1330_v29  ;;  %6039 = vmatpush3.bf16.msra.mxu0 %v6036_v28 }
 0x849   :  { %v6514_v35 = vpop.eup %6513  ;;  %v6060_v36 = vpack.c.bf16 %v6386_v31, %v6385_v32 }
 0x84a   :  { %v1344_v38 = vmul.f32 1.442695, %v1340_v33  ;;  %v935_v39 = vmul.f32 %v6514_v35, %v6510_v57  ;;  %v6389_v62 = vpop.permute.xlu1 %6388 }
 0x84b   :  { %v1333_v42 = vpop.xlane.xlu0 %1332  ;;  %6061 = vmatprep.subr.bf16.mxu1 %v6060_v36  ;;  %v6391_v1 = vunpack.i.h.bf16 %v6389_v62  ;;  %v6390_v2 = vunpack.i.l.bf16 %v6389_v62 }
 0x84c   :  { %6515 = vpow2.f32 %v1344_v38  ;;  %v1341_v26 = vsub.f32 %v1325_v3, %v1333_v42  ;;  %5624 = vmatprep.mubr.msk.f32.mxu0 %vm302_vm1, %v935_v39  ;;  %6063 = vmatpush3.bf16.msra.mxu1 %v6060_v36 }
 0x84d   :  { %v6064_v6 = vpack.c.bf16 %v6391_v1, %v6390_v2 }
 0x84e   :  { %v1346_v43 = vmul.f32 1.442695, %v1341_v26 }
 0x84f   :  { %v1339_v44 = vpop.xlane.xlu0 %1338 }
 0x850   :  { %6517 = vpow2.f32 %v1346_v43  ;;  %v1343_v48 = vsub.f32 %v1327_v10, %v1339_v44 }
 0x852   :  { %v1350_v49 = vmul.f32 1.442695, %v1343_v48 }
 0x853   :  { %v924_v51 = vpop.xlane.xlu0 %923 }
 0x854   :  { %6519 = vpow2.f32 %v1350_v49 }
 0x855   :  { %6521 = vrcp.f32 %v924_v51 }
 0x856   :  { %v6516_v53 = vpop.eup %6515 }
 0x857   :  { %v6379_v55 = vpop.permute.xlu0 %6378  ;;  %v1352_v58 = vsel %vm302_vm1, %v6516_v53, 0.0 }
 0x858   :  { %v6381_v57 = vunpack.i.h.bf16 %v6379_v55  ;;  %v6380_v59 = vunpack.i.l.bf16 %v6379_v55  ;;  %1353 = vadd.xlane.f32.xlu1 %v1352_v58 }
 0x85a   :  { %v6518_v60 = vpop.eup %6517  ;;  %v6056_v61 = vpack.c.bf16 %v6381_v57, %v6380_v59 }
 0x85b   :  { %v1355_v63 = vsel %vm302_vm1, %v6518_v60, 0.0 }
 0x85c   :  { %1356 = vadd.xlane.f32.xlu0 %v1355_v63  ;;  %6057 = vmatprep.subr.bf16.mxu0 %v6056_v61 }
 0x85e   :  { %v6520_v0 = vpop.eup %6519 }
 0x85f   :  { %v6522_v3 = vpop.eup %6521  ;;  %v1361_v4 = vsel %vm302_vm1, %v6520_v0, 0.0 }
 0x860   :  { %1362 = vadd.xlane.f32.xlu0 %v1361_v4  ;;  %v936_v5 = vmul.f32 %v6522_v3, %v7103_v14 }
 0x862   :  { %5625 = vmatmul.mubr.msk.f32.vlgmr.msra.gmra.mrb[10].mxu0 %vm302_vm1, %v936_v5 }
 0x863   :  { %6059 = vmatpush3.bf16.msra.mxu0 %v6056_v61 }
 0x864   :  { %6066 = vmatprep.subr.msk.bf16.mxu0 %vm6965_vm2, %v6064_v6 }
 0x869   :  { %1569 = vrot.lane.b32.xlu1 %v6939_v30, %s8008_s23 }
 0x876   :  { %6393 = vrot.lane.b32.xlu0 %v6955_v45, %s6709_s2 }
 0x87a   :  { %1658 = vrot.lane.b32.xlu0 %v6949_v40, %s8008_s23 }
 0x87b   :  { %v1336_v9 = vpop.xlane.xlu1 %1335 }
 0x87c   :  { %v1342_v10 = vsub.f32 %v7117_v13, %v1336_v9 }
 0x87e   :  { %v1348_v11 = vmul.f32 1.442695, %v1342_v10 }
 0x87f   :  { %v1568_v16 = vpop.permute.xlu1 %1567 }
 0x880   :  { %6523 = vpow2.f32 %v1348_v11 }
 0x88a   :  { %v6524_v14 = vpop.eup %6523 }
 0x88b   :  { %v1358_v15 = vsel %vm302_vm1, %v6524_v14, 0.0 }
 0x88d   :  { %1359 = vadd.xlane.f32.xlu1 %v1358_v15 }
 0x89e   :  { %1660 = vrot.lane.b32.xlu1 %v6951_v41, %s8008_s23 }
 0x8e5   :  { %v1354_v30 = vpop.xlane.xlu1 %1353 }
 0x8e6   :  { %6525 = vrcp.f32 %v1354_v30 }
 0x8e9   :  { %v1357_v19 = vpop.xlane.xlu0 %1356  ;;  %v1570_v41 = vpop.permute.xlu1 %1569 }
 0x8ea   :  { %6527 = vrcp.f32 %v1357_v19 }
 0x8ed   :  { %v1363_v45 = vpop.xlane.xlu0 %1362 }
 0x8ee   :  { %6529 = vrcp.f32 %v1363_v45 }
 0x8f0   :  { %v6526_v22 = vpop.eup %6525 }
 0x8f1   :  { %v6394_v40 = vpop.permute.xlu0 %6393  ;;  %v1368_v23 = vmul.f32 %v6526_v22, %v6516_v53 }
 0x8f2   :  { %v6396_v34 = vunpack.i.h.bf16 %v6394_v40  ;;  %v6395_v13 = vunpack.i.l.bf16 %v6394_v40 }
 0x8f3   :  { %5652 = vmatprep.mubr.msk.f32.mxu0 %vm302_vm1, %v1368_v23 }
 0x8f4   :  { %v6528_v27 = vpop.eup %6527  ;;  %v6070_v28 = vpack.c.bf16 %v6396_v34, %v6395_v13 }
 0x8f5   :  { %v1369_v46 = vmul.f32 %v6528_v27, %v6518_v60  ;;  %v1659_v36 = vpop.permute.xlu0 %1658 }
 0x8f6   :  { %6072 = vmatprep.subr.msk.bf16.mxu1 %vm6965_vm2, %v6070_v28 }
 0x8f7   :  { %5653 = vmatmul.mubr.msk.f32.vlgmr.msra.gmra.mrb[12].mxu0 %vm302_vm1, %v1369_v46 }
 0x8f8   :  { %6069 = vmatpush3.bf16.xpose.msk.msra.mxu0 %vm6965_vm2, %v6064_v6  ;;  %5666 = vmatprep.mubr.msk.f32.mxu0 %vm302_vm1, %v1568_v16  ;;  %v6530_v31 = vpop.eup %6529 }
 0x8f9   :  { %v1371_v35 = vmul.f32 %v6530_v31, %v6520_v0 }
 0x8ff   :  { %5667 = vmatmul.mubr.msk.f32.vlgmr.msra.gmra.mrb[14].mxu0 %vm302_vm1, %v1570_v41 }
 0x91a   :  { %v1360_v29 = vpop.xlane.xlu1 %1359 }
 0x91b   :  { %6531 = vrcp.f32 %v1360_v29 }
 0x91e   :  { %v1661_v38 = vpop.permute.xlu1 %1660 }
 0x925   :  { %v6532_v32 = vpop.eup %6531 }
 0x926   :  { %v1370_v33 = vmul.f32 %v6532_v32, %v6524_v14 }
 0x928   :  { %5659 = vmatprep.mubr.msk.f32.mxu1 %vm302_vm1, %v1370_v33 }
 0x929   :  { %5660 = vmatmul.mubr.msk.f32.vlgmr.msra.gmra.mrb[16].mxu1 %vm302_vm1, %v1371_v35 }
 0x92a   :  { %6075 = vmatpush3.bf16.xpose.msk.msra.mxu1 %vm6965_vm2, %v6070_v28  ;;  %5673 = vmatprep.mubr.msk.f32.mxu1 %vm302_vm1, %v1659_v36 }
 0x931   :  { %5674 = vmatmul.mubr.msk.f32.vlgmr.msra.gmra.mrb[18].mxu1 %vm302_vm1, %v1661_v38 }
 0x935   :  { %v5626_v39 = vpop.f32.mrb[10].mxu0 }
 0x936   :  { %v1019_v42 = vpop.f32.mrb[11].mxu0 }
 0x9ca   :  { %v5654_v26 = vpop.f32.mrb[12].mxu0 }
 0x9cb   :  { %v1450_v43 = vpop.f32.mrb[13].mxu0 }
 0x9d2   :  { %v5668_v44 = vpop.f32.mrb[14].mxu0 }
 0x9d3   :  { %v1750_v48 = vmul.f32 0.25, %v5668_v44  ;;  %v1649_v49 = vpop.f32.mrb[15].mxu0 }
 0x9d4   :  { %v1749_v51 = vmul.f32 0.25, %v1649_v49 }
 0x9d5   :  { %v1754_v53 = vsel %vm6989_vm6, %v1750_v48, -3.4028235e+38 }
 0x9d6   :  { %v1760_v55 = vsel %vm302_vm1, %v1754_v53, -inf  ;;  %v1753_v58 = vsel %vm6989_vm6, %v1749_v51, -3.4028235e+38 }
 0x9d7   :  { %1761 = vmax.xlane.f32.xlu1 %v1760_v55  ;;  %v1757_v57 = vsel %vm302_vm1, %v1753_v58, -inf }
 0x9d8   :  { %1758 = vmax.xlane.f32.xlu0 %v1757_v57 }
 0x9fc   :  { %v7161_v59 = vpop.f32.mrb[16].mxu1 }
 0x9fd   :  { %v7163_v60 = vpop.f32.mrb[17].mxu1 }
 0xa04   :  { %v5675_v61 = vpop.f32.mrb[18].mxu1 }
 0xa05   :  { %v1740_v62 = vpop.f32.mrb[19].mxu1  ;;  %v1752_v63 = vmul.f32 0.25, %v5675_v61 }
 0xa06   :  { %v1751_v0 = vmul.f32 0.25, %v1740_v62 }
 0xa07   :  { %v1756_v3 = vsel %vm7000_vm7, %v1752_v63, -3.4028235e+38 }
 0xa08   :  { %v1755_v1 = vsel %vm7000_vm7, %v1751_v0, -3.4028235e+38  ;;  %v1766_v4 = vsel %vm302_vm1, %v1756_v3, -inf  ;;  %v2000_v0 = vld [vmem:[%s7994_s6] sm:$0xff] }
 0xa09   :  { %v1763_v2 = vsel %vm302_vm1, %v1755_v1, -inf }
 0xa0a   :  { %1764 = vmax.xlane.f32.xlu0 %v1763_v2  ;;  %v2002_v2 = vld [vmem:[%s7994_s6 + $0x10] sm:$0xff] }
 0xa0e   :  { %1767 = vmax.xlane.f32.xlu0 %v1766_v4  ;;  %v2003_v4 = vld [vmem:[%s7994_s6 + $0x18] sm:$0xff] }
 0xa64   :  { %v1762_v5 = vpop.xlane.xlu1 %1761 }
 0xa65   :  { %v1770_v6 = vsub.f32 %v1754_v53, %v1762_v5  ;;  %v1759_v9 = vpop.xlane.xlu0 %1758  ;;  %v6088_v5 = vpack.c.bf16 %v2003_v4, %v2002_v2 }
 0xa66   :  { %v1769_v10 = vsub.f32 %v1753_v58, %v1759_v9  ;;  %v2005_v9 = vld [vmem:[%s7994_s6 + $0x28] sm:$0xff] }
 0xa67   :  { %v1775_v11 = vmul.f32 1.442695, %v1770_v6  ;;  %v2004_v6 = vld [vmem:[%s7994_s6 + $0x20] sm:$0xff] }
 0xa68   :  { %v1773_v14 = vmul.f32 1.442695, %v1769_v10  ;;  %v6092_v10 = vpack.c.bf16 %v2005_v9, %v2004_v6 }
 0xa69   :  { %6533 = vpow2.f32 %v1775_v11  ;;  %v2006_v11 = vld [vmem:[%s7994_s6 + $0x30] sm:$0xff] }
 0xa6a   :  { %6535 = vpow2.f32 %v1773_v14  ;;  %v2007_v14 = vld [vmem:[%s7994_s6 + $0x38] sm:$0xff] }
 0xa73   :  { %v6534_v15 = vpop.eup %6533 }
 0xa74   :  { %v6536_v16 = vpop.eup %6535  ;;  %v1784_v30 = vsel %vm302_vm1, %v6534_v15, 0.0 }
 0xa75   :  { %1785 = vadd.xlane.f32.xlu1 %v1784_v30  ;;  %v1781_v19 = vsel %vm302_vm1, %v6536_v16, 0.0 }
 0xa76   :  { %1782 = vadd.xlane.f32.xlu0 %v1781_v19 }
 0xa97   :  { %v1765_v45 = vpop.xlane.xlu0 %1764 }
 0xa98   :  { %v1771_v22 = vsub.f32 %v1755_v1, %v1765_v45  ;;  %v2001_v1 = vld [vmem:[%s7994_s6 + $0x8] sm:$0xff] }
 0xa9a   :  { %v1777_v40 = vmul.f32 1.442695, %v1771_v22 }
 0xa9b   :  { %v1768_v23 = vpop.xlane.xlu0 %1767 }
 0xa9c   :  { %6537 = vpow2.f32 %v1777_v40  ;;  %v1772_v34 = vsub.f32 %v1756_v3, %v1768_v23  ;;  %v6084_v3 = vpack.c.bf16 %v2001_v1, %v2000_v0 }
 0xa9e   :  { %v1779_v13 = vmul.f32 1.442695, %v1772_v34 }
 0xaa0   :  { %6539 = vpow2.f32 %v1779_v13 }
 0xaa6   :  { %v6538_v27 = vpop.eup %6537 }
 0xaa7   :  { %v1787_v28 = vsel %vm302_vm1, %v6538_v27, 0.0 }
 0xaa8   :  { %1788 = vadd.xlane.f32.xlu0 %v1787_v28 }
 0xaaa   :  { %v6540_v46 = vpop.eup %6539 }
 0xaab   :  { %v1790_v41 = vsel %vm302_vm1, %v6540_v46, 0.0 }
 0xaac   :  { %1791 = vadd.xlane.f32.xlu1 %v1790_v41  ;;  %v5207_v41 = vld [vmem:[%s7995_s7] ss:$0 sm:$0xff] }
 0xabd   :  { %6403 = vrot.lane.b32.xlu1 %v6959_v47, %s8008_s23 }
 0xabe   :  { %6398 = vrot.lane.b32.xlu0 %v6945_v37, %s8008_s23 }
 0xac1   :  { %1121 = vrot.lane.b32.xlu1 %v1019_v42, %s6709_s2 }
 0xac2   :  { %1550 = vrot.lane.b32.xlu0 %v1450_v43, %s6707_s21 }
 0xac5   :  { %1123 = vrot.lane.b32.xlu1 %v5626_v39, %s6709_s2 }
 0xac9   :  { %1552 = vrot.lane.b32.xlu1 %v5654_v26, %s6707_s21 }
 0xb02   :  { %v1786_v33 = vpop.xlane.xlu1 %1785 }
 0xb03   :  { %v1783_v29 = vpop.xlane.xlu0 %1782 }
 0xb04   :  { %6541 = vrcp.f32 %v1783_v29 }
 0xb05   :  { %6543 = vrcp.f32 %v1786_v33 }
 0xb0e   :  { %v6542_v31 = vpop.eup %6541 }
 0xb0f   :  { %v1797_v32 = vmul.f32 %v6542_v31, %v6536_v16  ;;  %v6544_v43 = vpop.eup %6543 }
 0xb10   :  { %v1798_v49 = vmul.f32 %v6544_v43, %v6534_v15  ;;  %v6096_v15 = vpack.c.bf16 %v2007_v14, %v2006_v11  ;;  %v2191_v11 = vld [vmem:[%s7998_s10 + $0x8] sm:$0xff] }
 0xb11   :  { %5680 = vmatprep.mubr.msk.f32.mxu0 %vm302_vm1, %v1797_v32 }
 0xb35   :  { %v1789_v47 = vpop.xlane.xlu0 %1788 }
 0xb36   :  { %6545 = vrcp.f32 %v1789_v47 }
 0xb39   :  { %v1792_v35 = vpop.xlane.xlu1 %1791  ;;  %v6399_v37 = vpop.permute.xlu0 %6398 }
 0xb3a   :  { %6547 = vrcp.f32 %v1792_v35  ;;  %v6401_v36 = vunpack.i.h.bf16 %v6399_v37  ;;  %v6400_v38 = vunpack.i.l.bf16 %v6399_v37 }
 0xb3c   :  { %v6076_v42 = vpack.c.bf16 %v6401_v36, %v6400_v38 }
 0xb3d   :  { %v6404_v39 = vpop.permute.xlu1 %6403  ;;  %v1551_v58 = vpop.permute.xlu0 %1550 }
 0xb3e   :  { %v6406_v44 = vunpack.i.h.bf16 %v6404_v39  ;;  %v6405_v26 = vunpack.i.l.bf16 %v6404_v39  ;;  %6077 = vmatprep.subr.bf16.mxu0 %v6076_v42 }
 0xb3f   :  { %6079 = vmatpush3.bf16.msra.mxu0 %v6076_v42 }
 0xb40   :  { %v6546_v48 = vpop.eup %6545  ;;  %v6080_v51 = vpack.c.bf16 %v6406_v44, %v6405_v26  ;;  %6085 = vmatprep.subr.bf16.mxu0 %v6084_v3 }
 0xb41   :  { %v1122_v53 = vpop.permute.xlu1 %1121  ;;  %v1799_v55 = vmul.f32 %v6546_v48, %v6538_v27 }
 0xb42   :  { %1134 = vst.msk [vmem:[#allocation2] sm:$0xff] %vm1133_vm8, %v1122_v53  ;;  %5681 = vmatmul.mubr.msk.f32.vlgmr.msra.gmra.mrb[16].mxu0 %vm302_vm1, %v1798_v49  ;;  %6081 = vmatprep.subr.bf16.mxu1 %v6080_v51 }
 0xb43   :  { %6083 = vmatpush3.bf16.msra.mxu1 %v6080_v51  ;;  %5687 = vmatprep.mubr.msk.f32.mxu1 %vm302_vm1, %v1799_v55  ;;  %1563 = vst.msk [vmem:[#allocation2] sm:$0xff] %vm1562_vm9, %v1551_v58 }
 0xb44   :  { %v6548_v57 = vpop.eup %6547  ;;  %6087 = vmatpush3.bf16.msra.mxu0 %v6084_v3 }
 0xb45   :  { %v1124_v61 = vpop.permute.xlu1 %1123  ;;  %v1800_v62 = vmul.f32 %v6548_v57, %v6540_v46  ;;  %6089 = vmatprep.subr.bf16.mxu0 %v6088_v5 }
 0xb46   :  { %1135 = vst.msk [vmem:[#allocation2 + $0x8] sm:$0xff] %vm1133_vm8, %v1124_v61 }
 0xb47   :  { %5688 = vmatmul.mubr.msk.f32.vlgmr.msra.gmra.mrb[20].mxu1 %vm302_vm1, %v1800_v62 }
 0xb48   :  { %6091 = vmatpush3.bf16.msra.mxu0 %v6088_v5 }
 0xb49   :  { %v1553_v63 = vpop.permute.xlu1 %1552  ;;  %6093 = vmatprep.subr.bf16.mxu0 %v6092_v10 }
 0xb4a   :  { %1564 = vst.msk [vmem:[#allocation2 + $0x8] sm:$0xff] %vm1562_vm9, %v1553_v63 }
 0xb4c   :  { %6095 = vmatpush3.bf16.msra.mxu0 %v6092_v10  ;;  %v2190_v10 = vld [vmem:[%s7998_s10] sm:$0xff] }
 0xb4d   :  { %6097 = vmatprep.subr.bf16.mxu0 %v6096_v15  ;;  %v6100_v14 = vpack.c.bf16 %v2191_v11, %v2190_v10  ;;  %v2420_v10 = vld [vmem:[%s8000_s12 + $0x50] sm:$0xff]  ;;  %v2421_v11 = vld [vmem:[%s8000_s12 + $0x58] sm:$0xff] }
 0xb4f   :  { %6101 = vmatprep.subr.bf16.mxu1 %v6100_v14 }
 0xb50   :  { %6099 = vmatpush3.bf16.msra.mxu0 %v6096_v15  ;;  %6103 = vmatpush3.bf16.msra.mxu1 %v6100_v14  ;;  %v2192_v15 = vld [vmem:[%s7998_s10 + $0x10] sm:$0xff]  ;;  %v6136_v14 = vpack.c.bf16 %v2421_v11, %v2420_v10 }
 0xc15   :  { %v5682_v16 = vpop.f32.mrb[16].mxu0 }
 0xc16   :  { %1981 = vrot.lane.b32.xlu1 %v5682_v16, %s6706_s20  ;;  %v1879_v30 = vpop.f32.mrb[17].mxu0  ;;  %v2193_v16 = vld [vmem:[%s7998_s10 + $0x18] sm:$0xff] }
 0xc17   :  { %1979 = vrot.lane.b32.xlu0 %v1879_v30, %s6706_s20  ;;  %v6104_v30 = vpack.c.bf16 %v2193_v16, %v2192_v15  ;;  %v2422_v15 = vld [vmem:[%s8000_s12 + $0x60] sm:$0xff]  ;;  %v2423_v16 = vld [vmem:[%s8000_s12 + $0x68] sm:$0xff] }
 0xc19   :  { %6105 = vmatprep.subr.bf16.mxu1 %v6104_v30 }
 0xc1a   :  { %v5689_v19 = vpop.f32.mrb[20].mxu1  ;;  %1127 = vrot.lane.b32.xlu1 %v7089_v54, %s6709_s2  ;;  %6107 = vmatpush3.bf16.msra.mxu1 %v6104_v30  ;;  %v6140_v30 = vpack.c.bf16 %v2423_v16, %v2422_v15 }
 0xc1b   :  { %v1966_v45 = vpop.f32.mrb[21].mxu1  ;;  %1125 = vrot.lane.b32.xlu0 %v7091_v56, %s6709_s2 }
 0xc1e   :  { %1556 = vrot.lane.b32.xlu1 %v7161_v59, %s6707_s21 }
 0xc1f   :  { %1554 = vrot.lane.b32.xlu0 %v7163_v60, %s6707_s21 }
 0xc22   :  { %1985 = vrot.lane.b32.xlu1 %v5689_v19, %s6706_s20  ;;  %v2194_v19 = vld [vmem:[%s7998_s10 + $0x20] sm:$0xff] }
 0xc23   :  { %1983 = vrot.lane.b32.xlu0 %v1966_v45, %s6706_s20  ;;  %v2195_v45 = vld [vmem:[%s7998_s10 + $0x28] sm:$0xff] }
 0xc88   :  { %v1982_v22 = vpop.permute.xlu1 %1981 }
 0xc89   :  { %1993 = vst.msk [vmem:[#allocation2 + $0x8] sm:$0xff] %vm1991_vm10, %v1982_v22  ;;  %v1980_v40 = vpop.permute.xlu0 %1979  ;;  %v6108_v22 = vpack.c.bf16 %v2195_v45, %v2194_v19  ;;  %v2424_v19 = vld [vmem:[%s8000_s12 + $0x70] sm:$0xff]  ;;  %v2425_v45 = vld [vmem:[%s8000_s12 + $0x78] sm:$0xff] }
 0xc8a   :  { %1992 = vst.msk [vmem:[#allocation2] sm:$0xff] %vm1991_vm10, %v1980_v40  ;;  %v2196_v40 = vld [vmem:[%s7998_s10 + $0x30] sm:$0xff] }
 0xc8b   :  { %6109 = vmatprep.subr.bf16.mxu1 %v6108_v22 }
 0xc8c   :  { %v1128_v54 = vpop.permute.xlu1 %1127  ;;  %6111 = vmatpush3.bf16.msra.mxu1 %v6108_v22  ;;  %v6144_v22 = vpack.c.bf16 %v2425_v45, %v2424_v19 }
 0xc8d   :  { %1137 = vst.msk [vmem:[#allocation2 + $0x18] sm:$0xff] %vm1133_vm8, %v1128_v54  ;;  %v1126_v56 = vpop.permute.xlu0 %1125  ;;  %v2197_v54 = vld [vmem:[%s7998_s10 + $0x38] sm:$0xff] }
 0xc8e   :  { %1136 = vst.msk [vmem:[#allocation2 + $0x10] sm:$0xff] %vm1133_vm8, %v1126_v56  ;;  %v6112_v56 = vpack.c.bf16 %v2197_v54, %v2196_v40  ;;  %v5214_v40 = vld [vmem:[%s7999_s11] ss:$0 sm:$0xff] }
 0xc90   :  { %v1557_v59 = vpop.permute.xlu1 %1556  ;;  %v1997_v34 = vld [vmem:[#allocation2 + $0x8] sm:$0xff]  ;;  %6113 = vmatprep.subr.bf16.mxu1 %v6112_v56 }
 0xc91   :  { %1566 = vst.msk [vmem:[#allocation2 + $0x18] sm:$0xff] %vm1562_vm9, %v1557_v59  ;;  %v1555_v60 = vpop.permute.xlu0 %1554  ;;  %v1996_v23 = vld [vmem:[#allocation2] sm:$0xff]  ;;  %6115 = vmatpush3.bf16.msra.mxu1 %v6112_v56 }
 0xc92   :  { %1565 = vst.msk [vmem:[#allocation2 + $0x10] sm:$0xff] %vm1562_vm9, %v1555_v60  ;;  %5706 = vmatprep.mubr.msk.f32.mxu0 %vm66_vm0, %v1996_v23 }
 0xc93   :  { %5707 = vmatmul.mubr.msk.f32.vlgmr.msra.gmra.mrb[18].mxu0 %vm66_vm0, %v1997_v34 }
 0xc94   :  { %v1986_v13 = vpop.permute.xlu1 %1985 }
 0xc95   :  { %1995 = vst.msk [vmem:[#allocation2 + $0x18] sm:$0xff] %vm1991_vm10, %v1986_v13  ;;  %v1984_v27 = vpop.permute.xlu0 %1983 }
 0xc96   :  { %1994 = vst.msk [vmem:[#allocation2 + $0x10] sm:$0xff] %vm1991_vm10, %v1984_v27 }
 0xc9c   :  { %v1999_v46 = vld [vmem:[#allocation2 + $0x18] sm:$0xff] }
 0xc9d   :  { %v1998_v28 = vld [vmem:[#allocation2 + $0x10] sm:$0xff] }
 0xc9e   :  { %5709 = vmatprep.mubr.msk.f32.mxu0 %vm66_vm0, %v1998_v28 }
 0xc9f   :  { %5710 = vmatmul.mubr.msk.f32.gmra.mrb[20].mxu0 %vm66_vm0, %v1999_v46 }
 0xd66   :  { %v5708_v29 = vpop.f32.mrb[18].mxu0 }
 0xd67   :  { %v2099_v31 = vadd.f32 %v5708_v29, %v5207_v41  ;;  %v2093_v32 = vpop.f32.mrb[19].mxu0  ;;  %v5212_v29 = vld [vmem:[%s7996_s8] ss:$0 sm:$0xff] }
 0xd68   :  { %v2094_v33 = vadd.f32 %v5207_v41, %v2093_v32 }
 0xd69   :  { %v2113_v47 = vadd.f32 %v2099_v31, %v6908_v12 }
 0xd6a   :  { %v2112_v35 = vadd.f32 %v2094_v33, %v6901_v8 }
 0xd6b   :  { %v2121_v37 = vsel %vm66_vm0, %v2113_v47, 0.0 }
 0xd6c   :  { %2122 = vadd.xlane.f32.xlu1 %v2121_v37  ;;  %v2118_v36 = vsel %vm66_vm0, %v2112_v35, 0.0 }
 0xd6d   :  { %2119 = vadd.xlane.f32.xlu0 %v2118_v36  ;;  %v5213_v36 = vld [vmem:[%s7997_s9] ss:$0 sm:$0xff] }
 0xd72   :  { %v5711_v38 = vpop.f32.mrb[20].mxu0 }
 0xd73   :  { %v2103_v42 = vpop.f32.mrb[21].mxu0  ;;  %v2109_v43 = vadd.f32 %v5711_v38, %v5207_v41 }
 0xd74   :  { %v2104_v39 = vadd.f32 %v5207_v41, %v2103_v42 }
 0xd75   :  { %v2115_v48 = vadd.f32 %v2109_v43, %v6919_v18 }
 0xd76   :  { %v2114_v44 = vadd.f32 %v2104_v39, %v6914_v17 }
 0xd77   :  { %v2127_v12 = vsel %vm66_vm0, %v2115_v48, 0.0 }
 0xd78   :  { %v2124_v26 = vsel %vm66_vm0, %v2114_v44, 0.0 }
 0xd79   :  { %2125 = vadd.xlane.f32.xlu0 %v2124_v26 }
 0xd7d   :  { %2128 = vadd.xlane.f32.xlu0 %v2127_v12 }
 0xdf9   :  { %v2123_v8 = vpop.xlane.xlu1 %2122 }
 0xdfa   :  { %v2131_v49 = vmul.f32 0.015625, %v2123_v8  ;;  %v2120_v51 = vpop.xlane.xlu0 %2119 }
 0xdfb   :  { %v2130_v53 = vmul.f32 0.015625, %v2120_v51 }
 0xdfc   :  { %v2135_v55 = vsub.f32 %v2113_v47, %v2131_v49 }
 0xdfd   :  { %v2134_v58 = vsub.f32 %v2112_v35, %v2130_v53 }
 0xdfe   :  { %v2139_v57 = vmul.f32 %v2135_v55, %v2135_v55 }
 0xdff   :  { %v2138_v61 = vmul.f32 %v2134_v58, %v2134_v58 }
 0xe00   :  { %v2145_v62 = vsel %vm66_vm0, %v2139_v57, 0.0  ;;  %v2411_v57 = vld [vmem:[%s8000_s12 + $0x8] sm:$0xff] }
 0xe01   :  { %2146 = vadd.xlane.f32.xlu1 %v2145_v62  ;;  %v2142_v17 = vsel %vm66_vm0, %v2138_v61, 0.0  ;;  %v2412_v62 = vld [vmem:[%s8000_s12 + $0x10] sm:$0xff] }
 0xe02   :  { %2143 = vadd.xlane.f32.xlu0 %v2142_v17  ;;  %v2413_v17 = vld [vmem:[%s8000_s12 + $0x18] sm:$0xff] }
 0xe06   :  { %v2126_v63 = vpop.xlane.xlu0 %2125 }
 0xe07   :  { %v2132_v18 = vmul.f32 0.015625, %v2126_v63  ;;  %v6120_v63 = vpack.c.bf16 %v2413_v17, %v2412_v62 }
 0xe09   :  { %v2136_v0 = vsub.f32 %v2114_v44, %v2132_v18  ;;  %v2414_v18 = vld [vmem:[%s8000_s12 + $0x20] sm:$0xff] }
 0xe0a   :  { %v2129_v1 = vpop.xlane.xlu0 %2128 }
 0xe0b   :  { %v2133_v2 = vmul.f32 0.015625, %v2129_v1  ;;  %v2140_v3 = vmul.f32 %v2136_v0, %v2136_v0 }
 0xe0d   :  { %v2137_v4 = vsub.f32 %v2115_v48, %v2133_v2  ;;  %v2148_v5 = vsel %vm66_vm0, %v2140_v3, 0.0  ;;  %v2416_v2 = vld [vmem:[%s8000_s12 + $0x30] sm:$0xff]  ;;  %v2417_v3 = vld [vmem:[%s8000_s12 + $0x38] sm:$0xff] }
 0xe0e   :  { %2149 = vadd.xlane.f32.xlu0 %v2148_v5  ;;  %v2418_v5 = vld [vmem:[%s8000_s12 + $0x40] sm:$0xff] }
 0xe0f   :  { %v2141_v6 = vmul.f32 %v2137_v4, %v2137_v4 }
 0xe11   :  { %v2151_v9 = vsel %vm66_vm0, %v2141_v6, 0.0  ;;  %v2419_v6 = vld [vmem:[%s8000_s12 + $0x48] sm:$0xff] }
 0xe12   :  { %2152 = vadd.xlane.f32.xlu1 %v2151_v9  ;;  %v6132_v9 = vpack.c.bf16 %v2419_v6, %v2418_v5 }
 0xe8e   :  { %v2147_v59 = vpop.xlane.xlu1 %2146 }
 0xe8f   :  { %v2155_v60 = vmul.f32 0.015625, %v2147_v59  ;;  %v2144_v23 = vpop.xlane.xlu0 %2143 }
 0xe90   :  { %v2154_v34 = vmul.f32 0.015625, %v2144_v23 }
 0xe91   :  { %v2159_v13 = vadd.f32 1e-12, %v2155_v60 }
 0xe92   :  { %v2158_v27 = vadd.f32 1e-12, %v2154_v34 }
 0xe93   :  { %6549 = vrsqrt.f32 %v2159_v13 }
 0xe94   :  { %6551 = vrsqrt.f32 %v2158_v27 }
 0xe9b   :  { %v2150_v28 = vpop.xlane.xlu0 %2149 }
 0xe9c   :  { %v2156_v46 = vmul.f32 0.015625, %v2150_v28 }
 0xe9d   :  { %v6550_v41 = vpop.eup %6549 }
 0xe9e   :  { %v6552_v31 = vpop.eup %6551  ;;  %v2167_v32 = vmul.f32 %v6550_v41, %v2135_v55  ;;  %v2160_v33 = vadd.f32 1e-12, %v2156_v46 }
 0xe9f   :  { %v2153_v47 = vpop.xlane.xlu1 %2152  ;;  %v2166_v35 = vmul.f32 %v6552_v31, %v2134_v58  ;;  %v2410_v58 = vld [vmem:[%s8000_s12] sm:$0xff] }
 0xea0   :  { %6553 = vrsqrt.f32 %v2160_v33  ;;  %v2157_v37 = vmul.f32 0.015625, %v2153_v47  ;;  %v2177_v38 = vmul.f32 %v5212_v29, %v2167_v32  ;;  %v6116_v61 = vpack.c.bf16 %v2411_v57, %v2410_v58 }
 0xea1   :  { %v2176_v42 = vmul.f32 %v5212_v29, %v2166_v35 }
 0xea2   :  { %v2161_v43 = vadd.f32 1e-12, %v2157_v37  ;;  %v7286_v44 = vadd.f32 %v5213_v36, %v2177_v38  ;;  %6117 = vmatprep.subr.bf16.mxu0 %v6116_v61 }
 0xea3   :  { %v7284_v39 = vadd.f32 %v5213_v36, %v2176_v42  ;;  %6119 = vmatpush3.bf16.msra.mxu0 %v6116_v61 }
 0xea4   :  { %6555 = vrsqrt.f32 %v2161_v43  ;;  %6121 = vmatprep.subr.bf16.mxu0 %v6120_v63 }
 0xea5   :  { %5728 = vmatprep.mubr.msk.f32.mxu1 %vm66_vm0, %v7284_v39 }
 0xea6   :  { %5729 = vmatmul.mubr.msk.f32.vlgmr.msra.gmra.mrb[22].mxu1 %vm66_vm0, %v7286_v44 }
 0xea7   :  { %6123 = vmatpush3.bf16.msra.mxu0 %v6120_v63 }
 0xeaa   :  { %v6554_v26 = vpop.eup %6553 }
 0xeab   :  { %v2168_v48 = vmul.f32 %v6554_v26, %v2136_v0  ;;  %v2415_v0 = vld [vmem:[%s8000_s12 + $0x28] sm:$0xff] }
 0xeac   :  { %v6124_v1 = vpack.c.bf16 %v2415_v0, %v2414_v18 }
 0xead   :  { %v2178_v12 = vmul.f32 %v5212_v29, %v2168_v48 }
 0xeae   :  { %v6556_v8 = vpop.eup %6555  ;;  %6125 = vmatprep.subr.bf16.mxu0 %v6124_v1 }
 0xeaf   :  { %v7292_v49 = vadd.f32 %v5213_v36, %v2178_v12  ;;  %v2169_v51 = vmul.f32 %v6556_v8, %v2137_v4  ;;  %6127 = vmatpush3.bf16.msra.mxu0 %v6124_v1  ;;  %v6128_v4 = vpack.c.bf16 %v2417_v3, %v2416_v2 }
 0xeb1   :  { %5731 = vmatprep.mubr.msk.f32.mxu1 %vm66_vm0, %v7292_v49  ;;  %v2179_v53 = vmul.f32 %v5212_v29, %v2169_v51  ;;  %6129 = vmatprep.subr.bf16.mxu0 %v6128_v4 }
 0xeb3   :  { %v7296_v55 = vadd.f32 %v5213_v36, %v2179_v53  ;;  %6131 = vmatpush3.bf16.msra.mxu0 %v6128_v4 }
 0xeb4   :  { %6133 = vmatprep.subr.bf16.mxu0 %v6132_v9 }
 0xeb5   :  { %5732 = vmatmul.mubr.msk.f32.gmra.mrb[24].mxu1 %vm66_vm0, %v7296_v55 }
 0xeb6   :  { %2702 = vmatprep.mubr.f32.mxu1 %v6701_v50 }
 0xeb7   :  { %6135 = vmatpush3.bf16.msra.mxu0 %v6132_v9 }
 0xeb8   :  { %6137 = vmatprep.subr.bf16.mxu0 %v6136_v14 }
 0xebb   :  { %6139 = vmatpush3.bf16.msra.mxu0 %v6136_v14 }
 0xebc   :  { %6141 = vmatprep.subr.bf16.mxu0 %v6140_v30 }
 0xebf   :  { %6143 = vmatpush3.bf16.msra.mxu0 %v6140_v30 }
 0xec0   :  { %6145 = vmatprep.subr.bf16.mxu0 %v6144_v22 }
 0xec3   :  { %6147 = vmatpush3.bf16.msra.mxu0 %v6144_v22 }
 0xf79   :  { %v5730_v54 = vpop.f32.mrb[22].mxu1 }
 0xf7a   :  { %v7352_v56 = vadd.f32 %v5730_v54, %v5214_v40  ;;  %v2283_v59 = vpop.f32.mrb[23].mxu1 }
 0xf7b   :  { %v7354_v60 = vadd.f32 %v5214_v40, %v2283_v59 }
 0xf7c   :  { %v7357_v23 = vmul.f32 0.70710677, %v7352_v56 }
 0xf7d   :  { %v7360_v34 = vmul.f32 0.70710677, %v7354_v60 }
 0xf7e   :  { %v2311_v13 = vand.u32 2147483647, %v7357_v23  ;;  %vm2391_vm11 = vcmp.ge.f32.partialorder %v7357_v23, 0.0 }
 0xf7f   :  { %v2310_v27 = vand.u32 2147483647, %v7360_v34  ;;  %vm2390_vm12 = vcmp.ge.f32.partialorder %v7360_v34, 0.0 }
 0xf80   :  { %v2315_v28 = vmul.f32 0.3275911, %v2311_v13  ;;  %v2367_v47 = vsub.f32 0.0, %v2311_v13 }
 0xf81   :  { %v2314_v46 = vmul.f32 0.3275911, %v2310_v27  ;;  %v2366_v37 = vsub.f32 0.0, %v2310_v27 }
 0xf82   :  { %v2319_v41 = vadd.f32 1.0, %v2315_v28  ;;  %v2371_v26 = vmul.f32 %v2367_v47, %v2311_v13 }
 0xf83   :  { %v2318_v29 = vadd.f32 1.0, %v2314_v46  ;;  %v2370_v51 = vmul.f32 %v2366_v37, %v2310_v27 }
 0xf84   :  { %6557 = vrcp.f32 %v2319_v41  ;;  %v2376_v17 = vmul.f32 1.442695, %v2371_v26 }
 0xf85   :  { %6559 = vrcp.f32 %v2318_v29  ;;  %v2374_v1 = vmul.f32 1.442695, %v2370_v51 }
 0xf88   :  { %v5733_v31 = vpop.f32.mrb[24].mxu1 }
 0xf89   :  { %v7364_v32 = vadd.f32 %v5733_v31, %v5214_v40  ;;  %v2293_v33 = vpop.f32.mrb[25].mxu1 }
 0xf8a   :  { %v7366_v35 = vadd.f32 %v5214_v40, %v2293_v33 }
 0xf8b   :  { %v7369_v36 = vmul.f32 0.70710677, %v7364_v32 }
 0xf8c   :  { %v7372_v38 = vmul.f32 0.70710677, %v7366_v35 }
 0xf8d   :  { %v2313_v42 = vand.u32 2147483647, %v7369_v36  ;;  %vm2393_vm13 = vcmp.ge.f32.partialorder %v7369_v36, 0.0 }
 0xf8e   :  { %v6558_v43 = vpop.eup %6557  ;;  %v2312_v48 = vand.u32 2147483647, %v7372_v38  ;;  %vm2392_vm14 = vcmp.ge.f32.partialorder %v7372_v38, 0.0 }
 0xf8f   :  { %v6560_v12 = vpop.eup %6559  ;;  %v2331_v8 = vmul.f32 1.0614054, %v6558_v43  ;;  %v2317_v53 = vmul.f32 0.3275911, %v2313_v42  ;;  %v2369_v10 = vsub.f32 0.0, %v2313_v42 }
 0xf90   :  { %v2316_v58 = vmul.f32 0.3275911, %v2312_v48  ;;  %v2330_v57 = vmul.f32 1.0614054, %v6560_v12  ;;  %v2368_v11 = vsub.f32 0.0, %v2312_v48 }
 0xf91   :  { %v2335_v61 = vadd.f32 -1.4531521, %v2331_v8  ;;  %v2321_v62 = vadd.f32 1.0, %v2317_v53  ;;  %v2373_v45 = vmul.f32 %v2369_v10, %v2313_v42 }
 0xf92   :  { %v2320_v63 = vadd.f32 1.0, %v2316_v58  ;;  %v2334_v18 = vadd.f32 -1.4531521, %v2330_v57  ;;  %v2372_v40 = vmul.f32 %v2368_v11, %v2312_v48 }
 0xf93   :  { %v2339_v0 = vmul.f32 %v6558_v43, %v2335_v61  ;;  %6561 = vrcp.f32 %v2321_v62  ;;  %v2380_v33 = vmul.f32 1.442695, %v2373_v45 }
 0xf94   :  { %6563 = vrcp.f32 %v2320_v63  ;;  %v2338_v2 = vmul.f32 %v6560_v12, %v2334_v18  ;;  %v2378_v37 = vmul.f32 1.442695, %v2372_v40 }
 0xf95   :  { %v2343_v3 = vadd.f32 1.4214138, %v2339_v0  ;;  %6565 = vpow2.f32 %v2376_v17  ;;  %v2302_v0 = vmul.f32 0.5, %v7354_v60 }
 0xf96   :  { %v2342_v4 = vadd.f32 1.4214138, %v2338_v2  ;;  %6567 = vpow2.f32 %v2374_v1 }
 0xf97   :  { %v2347_v5 = vmul.f32 %v6558_v43, %v2343_v3  ;;  %6569 = vpow2.f32 %v2380_v33  ;;  %v2303_v3 = vmul.f32 0.5, %v7352_v56 }
 0xf98   :  { %v2346_v6 = vmul.f32 %v6560_v12, %v2342_v4  ;;  %6571 = vpow2.f32 %v2378_v37 }
 0xf99   :  { %v2351_v9 = vadd.f32 -0.28449672, %v2347_v5 }
 0xf9a   :  { %v2350_v14 = vadd.f32 -0.28449672, %v2346_v6 }
 0xf9b   :  { %v2355_v15 = vmul.f32 %v6558_v43, %v2351_v9 }
 0xf9c   :  { %v2354_v16 = vmul.f32 %v6560_v12, %v2350_v14 }
 0xf9d   :  { %v6562_v30 = vpop.eup %6561  ;;  %v2359_v19 = vadd.f32 0.2548296, %v2355_v15 }
 0xf9e   :  { %v6564_v22 = vpop.eup %6563  ;;  %v2358_v54 = vadd.f32 0.2548296, %v2354_v16  ;;  %v2333_v59 = vmul.f32 1.0614054, %v6562_v30 }
 0xf9f   :  { %v2363_v13 = vmul.f32 %v6558_v43, %v2359_v19  ;;  %v2332_v27 = vmul.f32 1.0614054, %v6564_v22  ;;  %v6566_v28 = vpop.eup %6565 }
 0xfa0   :  { %v2362_v46 = vmul.f32 %v6560_v12, %v2358_v54  ;;  %v2337_v41 = vadd.f32 -1.4531521, %v2333_v59  ;;  %v6568_v29 = vpop.eup %6567 }
 0xfa1   :  { %v2383_v31 = vmul.f32 %v6566_v28, %v2363_v13  ;;  %v2336_v47 = vadd.f32 -1.4531521, %v2332_v27  ;;  %v6570_v34 = vpop.eup %6569  ;;  %v2304_v27 = vmul.f32 0.5, %v7366_v35 }
 0xfa2   :  { %v2382_v26 = vmul.f32 %v6568_v29, %v2362_v46  ;;  %v2341_v8 = vmul.f32 %v6562_v30, %v2337_v41  ;;  %v6572_v15 = vpop.eup %6571  ;;  %v5219_v41 = vld [vmem:[%s8001_s13] ss:$0 sm:$0xff] }
 0xfa3   :  { %v2387_v51 = vsub.f32 1.0, %v2383_v31  ;;  %v2340_v53 = vmul.f32 %v6564_v22, %v2336_v47 }
 0xfa4   :  { %v2386_v58 = vsub.f32 1.0, %v2382_v26  ;;  %v2345_v42 = vadd.f32 1.4214138, %v2341_v8 }
 0xfa5   :  { %v2395_v57 = vsub.f32 0.0, %v2387_v51  ;;  %v2344_v48 = vadd.f32 1.4214138, %v2340_v53 }
 0xfa6   :  { %v2394_v43 = vsub.f32 0.0, %v2386_v58  ;;  %v2349_v12 = vmul.f32 %v6562_v30, %v2345_v42 }
 0xfa7   :  { %v2399_v61 = vsel %vm2391_vm11, %v2387_v51, %v2395_v57  ;;  %v2348_v62 = vmul.f32 %v6564_v22, %v2344_v48 }
 0xfa8   :  { %v2403_v17 = vadd.f32 1.0, %v2399_v61  ;;  %v2398_v63 = vsel %vm2390_vm12, %v2386_v58, %v2394_v43  ;;  %v2353_v18 = vadd.f32 -0.28449672, %v2349_v12 }
 0xfa9   :  { %v2402_v1 = vadd.f32 1.0, %v2398_v63  ;;  %v2352_v2 = vadd.f32 -0.28449672, %v2348_v62 }
 0xfaa   :  { %v2357_v4 = vmul.f32 %v6562_v30, %v2353_v18  ;;  %v2407_v23 = vmul.f32 %v2403_v17, %v2303_v3 }
 0xfab   :  { %v2406_v5 = vmul.f32 %v2402_v1, %v2302_v0  ;;  %v2356_v6 = vmul.f32 %v6564_v22, %v2352_v2 }
 0xfac   :  { %v2361_v9 = vadd.f32 0.2548296, %v2357_v4 }
 0xfad   :  { %5766 = vmatprep.mubr.f32.mxu0 %v2406_v5  ;;  %v2360_v10 = vadd.f32 0.2548296, %v2356_v6 }
 0xfae   :  { %5767 = vmatmul.mubr.f32.vlgmr.msra.gmra.mrb[22].mxu0 %v2407_v23  ;;  %v2365_v11 = vmul.f32 %v6562_v30, %v2361_v9  ;;  %v2305_v30 = vmul.f32 0.5, %v7364_v32  ;;  %v5223_v9 = vld [vmem:[%s7992_s4 + $0x88] sm:$0xff] }
 0xfaf   :  { %v2364_v14 = vmul.f32 %v6564_v22, %v2360_v10  ;;  %v5225_v10 = vld [vmem:[%s7992_s4 + $0x98] sm:$0xff] }
 0xfb0   :  { %v2385_v16 = vmul.f32 %v6570_v34, %v2365_v11  ;;  %v5222_v11 = vld [vmem:[%s7992_s4 + $0x80] sm:$0xff]  ;;  %v5224_v34 = vld [vmem:[%s7992_s4 + $0x90] sm:$0xff] }
 0xfb1   :  { %v2384_v19 = vmul.f32 %v6572_v15, %v2364_v14  ;;  %v6148_v14 = vpack.c.bf16 %v5225_v10, %v5223_v9  ;;  %v6150_v15 = vpack.c.bf16 %v5224_v34, %v5222_v11 }
 0xfb2   :  { %v2389_v45 = vsub.f32 1.0, %v2385_v16  ;;  %v5227_v16 = vld [vmem:[%s7992_s4 + $0xa8] sm:$0xff] }
 0xfb3   :  { %v2388_v60 = vsub.f32 1.0, %v2384_v19  ;;  %6149 = vmatprep.subr.bf16.mxu1 %v6148_v14  ;;  %v5229_v19 = vld [vmem:[%s7992_s4 + $0xb8] sm:$0xff] }
 0xfb4   :  { %v2397_v40 = vsub.f32 0.0, %v2389_v45  ;;  %6151 = vmatpush1.bf16.msra.mxu1 %v6150_v15 }
 0xfb5   :  { %v2396_v56 = vsub.f32 0.0, %v2388_v60 }
 0xfb6   :  { %v2401_v54 = vsel %vm2393_vm13, %v2389_v45, %v2397_v40  ;;  %v6152_v45 = vpack.c.bf16 %v5229_v19, %v5227_v16  ;;  %v5228_v40 = vld [vmem:[%s7992_s4 + $0xb0] sm:$0xff] }
 0xfb7   :  { %v2400_v59 = vsel %vm2392_vm14, %v2388_v60, %v2396_v56  ;;  %v2405_v13 = vadd.f32 1.0, %v2401_v54  ;;  %v5226_v60 = vld [vmem:[%s7992_s4 + $0xa0] sm:$0xff]  ;;  %v5231_v54 = vld [vmem:[%s7992_s4 + $0xc8] sm:$0xff] }
 0xfb8   :  { %v2404_v28 = vadd.f32 1.0, %v2400_v59  ;;  %v6154_v56 = vpack.c.bf16 %v5228_v40, %v5226_v60  ;;  %6153 = vmatprep.subr.bf16.mxu1 %v6152_v45  ;;  %v5233_v59 = vld [vmem:[%s7992_s4 + $0xd8] sm:$0xff] }
 0xfb9   :  { %v2409_v46 = vmul.f32 %v2405_v13, %v2305_v30  ;;  %v6156_v13 = vpack.c.bf16 %v5233_v59, %v5231_v54 }
 0xfba   :  { %v2408_v22 = vmul.f32 %v2404_v28, %v2304_v27  ;;  %6155 = vmatpush1.bf16.msra.mxu1 %v6154_v56  ;;  %v5230_v27 = vld [vmem:[%s7992_s4 + $0xc0] sm:$0xff]  ;;  %v5232_v28 = vld [vmem:[%s7992_s4 + $0xd0] sm:$0xff] }
 0xfbb   :  { %v6158_v30 = vpack.c.bf16 %v5232_v28, %v5230_v27  ;;  %6157 = vmatprep.subr.bf16.mxu1 %v6156_v13 }
 0xfbc   :  { %5769 = vmatprep.mubr.f32.mxu0 %v2408_v22  ;;  %v5235_v22 = vld [vmem:[%s7992_s4 + $0xe8] sm:$0xff] }
 0xfbd   :  { %5770 = vmatmul.mubr.f32.gmra.mrb[24].mxu0 %v2409_v46  ;;  %v5237_v46 = vld [vmem:[%s7992_s4 + $0xf8] sm:$0xff] }
 0xfbe   :  { %6159 = vmatpush1.bf16.msra.mxu1 %v6158_v30 }
0x1081   :  { %v5768_v36 = vpop.f32.mrb[22].mxu0 }
0x1082   :  { %v2505_v29 = vadd.f32 %v5768_v36, %v5219_v41  ;;  %v2499_v31 = vpop.f32.mrb[23].mxu0  ;;  %v5234_v36 = vld [vmem:[%s7992_s4 + $0xe0] sm:$0xff] }
0x1083   :  { %v2500_v38 = vadd.f32 %v5219_v41, %v2499_v31 }
0x1084   :  { %v2519_v33 = vadd.f32 %v2505_v29, %v7286_v44  ;;  %v5236_v29 = vld [vmem:[%s7992_s4 + $0xf0] sm:$0xff] }
0x1085   :  { %v2518_v47 = vadd.f32 %v2500_v38, %v7284_v39  ;;  %v6162_v31 = vpack.c.bf16 %v5236_v29, %v5234_v36 }
0x1086   :  { %v2527_v35 = vsel %vm66_vm0, %v2519_v33, 0.0 }
0x1087   :  { %2528 = vadd.xlane.f32.xlu1 %v2527_v35  ;;  %v2524_v32 = vsel %vm66_vm0, %v2518_v47, 0.0 }
0x1088   :  { %2525 = vadd.xlane.f32.xlu0 %v2524_v32 }
0x1090   :  { %v5771_v37 = vpop.f32.mrb[24].mxu0 }
0x1091   :  { %v2515_v26 = vadd.f32 %v5771_v37, %v5219_v41  ;;  %v2509_v8 = vpop.f32.mrb[25].mxu0 }
0x1092   :  { %v2510_v51 = vadd.f32 %v5219_v41, %v2509_v8  ;;  %v6160_v41 = vpack.c.bf16 %v5237_v46, %v5235_v22 }
0x1093   :  { %v2521_v53 = vadd.f32 %v2515_v26, %v7296_v55 }
0x1094   :  { %v2520_v58 = vadd.f32 %v2510_v51, %v7292_v49  ;;  %6161 = vmatprep.subr.bf16.mxu1 %v6160_v41 }
0x1095   :  { %v2533_v42 = vsel %vm66_vm0, %v2521_v53, 0.0  ;;  %6163 = vmatpush1.bf16.msra.mxu1 %v6162_v31 }
0x1096   :  { %2534 = vadd.xlane.f32.xlu1 %v2533_v42  ;;  %v2530_v44 = vsel %vm66_vm0, %v2520_v58, 0.0 }
0x1097   :  { %2531 = vadd.xlane.f32.xlu0 %v2530_v44 }
0x1114   :  { %v2529_v39 = vpop.xlane.xlu1 %2528 }
0x1115   :  { %v2537_v57 = vmul.f32 0.015625, %v2529_v39  ;;  %v2526_v48 = vpop.xlane.xlu0 %2525 }
0x1116   :  { %v2536_v43 = vmul.f32 0.015625, %v2526_v48  ;;  %v5221_v48 = vld [vmem:[%s8003_s15] ss:$0 sm:$0xff] }
0x1117   :  { %v7395_v12 = vsub.f32 %v2519_v33, %v2537_v57 }
0x1118   :  { %v7397_v61 = vsub.f32 %v2518_v47, %v2536_v43 }
0x1119   :  { %v2545_v62 = vmul.f32 %v7395_v12, %v7395_v12 }
0x111a   :  { %v2544_v49 = vmul.f32 %v7397_v61, %v7397_v61 }
0x111b   :  { %v2551_v55 = vsel %vm66_vm0, %v2545_v62, 0.0 }
0x111c   :  { %2552 = vadd.xlane.f32.xlu1 %v2551_v55  ;;  %v2548_v17 = vsel %vm66_vm0, %v2544_v49, 0.0 }
0x111d   :  { %2549 = vadd.xlane.f32.xlu0 %v2548_v17 }
0x1123   :  { %v2535_v63 = vpop.xlane.xlu1 %2534 }
0x1124   :  { %v2539_v18 = vmul.f32 0.015625, %v2535_v63  ;;  %v2532_v0 = vpop.xlane.xlu0 %2531 }
0x1125   :  { %v2538_v1 = vmul.f32 0.015625, %v2532_v0 }
0x1126   :  { %v7405_v2 = vsub.f32 %v2521_v53, %v2539_v18  ;;  %v5220_v53 = vld [vmem:[%s8002_s14] ss:$0 sm:$0xff] }
0x1127   :  { %v7407_v3 = vsub.f32 %v2520_v58, %v2538_v1 }
0x1128   :  { %v2547_v4 = vmul.f32 %v7405_v2, %v7405_v2 }
0x1129   :  { %v2546_v5 = vmul.f32 %v7407_v3, %v7407_v3 }
0x112a   :  { %v2557_v6 = vsel %vm66_vm0, %v2547_v4, 0.0 }
0x112b   :  { %2558 = vadd.xlane.f32.xlu1 %v2557_v6  ;;  %v2554_v23 = vsel %vm66_vm0, %v2546_v5, 0.0 }
0x112c   :  { %2555 = vadd.xlane.f32.xlu0 %v2554_v23 }
0x11a9   :  { %v2553_v38 = vpop.xlane.xlu1 %2552 }
0x11aa   :  { %v2561_v33 = vmul.f32 0.015625, %v2553_v38  ;;  %v2550_v47 = vpop.xlane.xlu0 %2549 }
0x11ab   :  { %v2560_v35 = vmul.f32 0.015625, %v2550_v47 }
0x11ac   :  { %v2565_v32 = vadd.f32 1e-12, %v2561_v33 }
0x11ad   :  { %v2564_v37 = vadd.f32 1e-12, %v2560_v35 }
0x11ae   :  { %6573 = vrsqrt.f32 %v2565_v32 }
0x11af   :  { %6575 = vrsqrt.f32 %v2564_v37 }
0x11b8   :  { %v6574_v26 = vpop.eup %6573  ;;  %v2559_v8 = vpop.xlane.xlu1 %2558 }
0x11b9   :  { %v6576_v51 = vpop.eup %6575  ;;  %v2563_v58 = vmul.f32 0.015625, %v2559_v8  ;;  %v2556_v42 = vpop.xlane.xlu0 %2555  ;;  %v2573_v57 = vmul.f32 %v6574_v26, %v7395_v12 }
0x11ba   :  { %v2572_v44 = vmul.f32 %v6576_v51, %v7397_v61  ;;  %v2562_v39 = vmul.f32 0.015625, %v2556_v42 }
0x11bb   :  { %v2567_v43 = vadd.f32 1e-12, %v2563_v58  ;;  %v2583_v17 = vmul.f32 %v5220_v53, %v2573_v57 }
0x11bc   :  { %v2582_v62 = vmul.f32 %v5220_v53, %v2572_v44  ;;  %v2566_v49 = vadd.f32 1e-12, %v2562_v39 }
0x11bd   :  { %6577 = vrsqrt.f32 %v2567_v43  ;;  %v7476_v61 = vadd.f32 %v5221_v48, %v2583_v17 }
0x11be   :  { %v7471_v55 = vadd.f32 %v5221_v48, %v2582_v62  ;;  %6579 = vrsqrt.f32 %v2566_v49 }
0x11c0   :  { %5239 = vmatmul.mubr.msk.f32.vlgmr.msra.gmra.mrb[26].mxu1 %vm66_vm0, %v7471_v55 }
0x11c1   :  { %2708 = vmatprep.mubr.f32.mxu1 %v6701_v50 }
0x11c4   :  { %5240 = vmatmul.mubr.msk.f32.gmra.mrb[28].mxu1 %vm66_vm0, %v7476_v61 }
0x11c5   :  { %2714 = vmatprep.mubr.f32.mxu1 %v6701_v50 }
0x11c7   :  { %v6578_v12 = vpop.eup %6577 }
0x11c8   :  { %v6580_v63 = vpop.eup %6579  ;;  %v2575_v0 = vmul.f32 %v6578_v12, %v7405_v2 }
0x11c9   :  { %v2574_v18 = vmul.f32 %v6580_v63, %v7407_v3  ;;  %v5238_v3 = vld [vmem:[%s7993_s5 + $0x2] sm:$0x3]  ;;  %s8022_s5 = smov 80  }
0x11ca   :  { %v2585_v5 = vmul.f32 %v5220_v53, %v2575_v0  ;;  %v2619_v2 = vrot.slane %v5238_v3, %v6926_v21  ;;  %v2623_v11 = vrot.slane %v5238_v3, %v191_v24 }
0x11cb   :  { %v2584_v1 = vmul.f32 %v5220_v53, %v2574_v18 }
0x11cc   :  { %v7488_v6 = vadd.f32 %v5221_v48, %v2585_v5 }
0x11cd   :  { %v7483_v4 = vadd.f32 %v5221_v48, %v2584_v1 }
0x11cf   :  { %5241 = vmatmul.mubr.msk.f32.gmra.mrb[30].mxu1 %vm66_vm0, %v7483_v4 }
0x11d0   :  { %2720 = vmatprep.mubr.f32.mxu1 %v6701_v50 }
0x11d3   :  { %5242 = vmatmul.mubr.msk.f32.gmra.mrb[32].mxu1 %vm66_vm0, %v7488_v6 }
0x1293   :  { %v2704_v23 = vpop.f32.mrb[26].mxu1 }
0x1294   :  { %v7496_v9 = vadd.f32 %v2704_v23, %v2619_v2  ;;  %v2706_v10 = vpop.f32.mrb[27].mxu1 }
0x1295   :  { %v2707_v15 = vadd.f32 %v2706_v10, %v2623_v11 }
0x1296   :  { %5776 = vmatprep.mubr.msk.f32.mxu1 %vm302_vm1, %v7496_v9 }
0x1297   :  { %v2710_v50 = vpop.f32.mrb[28].mxu1 }
0x1298   :  { %v7502_v34 = vadd.f32 %v2710_v50, %v2619_v2  ;;  %v2712_v14 = vpop.f32.mrb[29].mxu1 }
0x1299   :  { %v2713_v16 = vadd.f32 %v2712_v14, %v2623_v11 }
0x129a   :  { %v7506_v19 = vpack.i.bf16 %v7502_v34, %v7496_v9 }
0x129b   :  { %v6176_v21 = vpack.c.bf16 %v2713_v16, %v2707_v15  ;;  %v7508_v45 = vpack.i.bf16 %v2713_v16, %v2707_v15 }
0x129c   :  { %6408 = vrot.lane.b32.xlu0 %v7506_v19, %s6702_s29 }
0x12a2   :  { %v2716_v20 = vpop.f32.mrb[30].mxu1 }
0x12a3   :  { %v7512_v24 = vadd.f32 %v2716_v20, %v2619_v2  ;;  %v2718_v60 = vpop.f32.mrb[31].mxu1 }
0x12a4   :  { %v2719_v59 = vadd.f32 %v2718_v60, %v2623_v11 }
0x12a5   :  { %5783 = vmatprep.mubr.msk.f32.mxu0 %vm302_vm1, %v7512_v24 }
0x12a6   :  { %v2722_v40 = vpop.f32.mrb[32].mxu1 }
0x12a7   :  { %v7516_v56 = vadd.f32 %v2722_v40, %v2619_v2  ;;  %v2724_v54 = vpop.f32.mrb[33].mxu1 }
0x12a8   :  { %v2725_v13 = vadd.f32 %v2724_v54, %v2623_v11 }
0x12a9   :  { %v7520_v27 = vpack.i.bf16 %v7516_v56, %v7512_v24 }
0x12aa   :  { %v7522_v28 = vpack.c.bf16 %v2725_v13, %v2719_v59  ;;  %v7524_v30 = vpack.i.bf16 %v2725_v13, %v2719_v59 }
0x12ab   :  { %6413 = vrot.lane.b32.xlu1 %v7520_v27, %s6702_s29 }
0x130e   :  { %v6409_v22 = vpop.permute.xlu0 %6408 }
0x130f   :  { %v6411_v46 = vunpack.i.h.bf16 %v6409_v22  ;;  %v6410_v41 = vunpack.i.l.bf16 %v6409_v22 }
0x1311   :  { %v6164_v36 = vpack.c.bf16 %v6411_v46, %v6410_v41 }
0x1313   :  { %6166 = vmatprep.subr.msk.bf16.mxu1 %vm6965_vm2, %v6164_v36 }
0x1314   :  { %6169 = vmatpush3.bf16.xpose.msk.msra.mxu1 %vm6965_vm2, %v6164_v36 }
0x1315   :  { %6177 = vmatprep.subr.bf16.mxu1 %v6176_v21 }
0x131b   :  { %5777 = vmatmul.mubr.msk.f32.vlgmr.msra.gmra.mrb[34].mxu1 %vm302_vm1, %v7502_v34 }
0x131c   :  { %6179 = vmatpush3.bf16.msra.mxu1 %v6176_v21 }
0x131d   :  { %v6414_v29 = vpop.permute.xlu1 %6413  ;;  %6181 = vmatprep.subr.bf16.mxu1 %v7522_v28 }
0x131e   :  { %v6416_v31 = vunpack.i.h.bf16 %v6414_v29  ;;  %v6415_v38 = vunpack.i.l.bf16 %v6414_v29 }
0x1320   :  { %v6170_v33 = vpack.c.bf16 %v6416_v31, %v6415_v38 }
0x1322   :  { %6172 = vmatprep.subr.msk.bf16.mxu0 %vm6965_vm2, %v6170_v33 }
0x1323   :  { %6175 = vmatpush3.bf16.xpose.msk.msra.mxu0 %vm6965_vm2, %v6170_v33 }
0x132a   :  { %5784 = vmatmul.mubr.msk.f32.vlgmr.msra.gmra.mrb[26].mxu0 %vm302_vm1, %v7516_v56 }
0x13ee   :  { %v5778_v47 = vpop.f32.mrb[34].mxu1 }
0x13ef   :  { %v2906_v35 = vmul.f32 0.25, %v5778_v47  ;;  %v2807_v32 = vpop.f32.mrb[35].mxu1 }
0x13f0   :  { %v2905_v37 = vmul.f32 0.25, %v2807_v32 }
0x13f1   :  { %v2910_v26 = vsel %vm6989_vm6, %v2906_v35, -3.4028235e+38 }
0x13f2   :  { %v2916_v8 = vsel %vm302_vm1, %v2910_v26, -inf  ;;  %v2909_v51 = vsel %vm6989_vm6, %v2905_v37, -3.4028235e+38 }
0x13f3   :  { %2917 = vmax.xlane.f32.xlu0 %v2916_v8  ;;  %v2913_v53 = vsel %vm302_vm1, %v2909_v51, -inf }
0x13f4   :  { %2914 = vmax.xlane.f32.xlu1 %v2913_v53 }
0x13fd   :  { %v5785_v58 = vpop.f32.mrb[26].mxu0 }
0x13fe   :  { %v2908_v42 = vmul.f32 0.25, %v5785_v58  ;;  %v2896_v44 = vpop.f32.mrb[27].mxu0 }
0x13ff   :  { %v2907_v39 = vmul.f32 0.25, %v2896_v44 }
0x1400   :  { %v2912_v57 = vsel %vm7000_vm7, %v2908_v42, -3.4028235e+38 }
0x1401   :  { %v2911_v48 = vsel %vm7000_vm7, %v2907_v39, -3.4028235e+38  ;;  %v2922_v43 = vsel %vm302_vm1, %v2912_v57, -inf }
0x1402   :  { %2923 = vmax.xlane.f32.xlu1 %v2922_v43  ;;  %v2919_v62 = vsel %vm302_vm1, %v2911_v48, -inf }
0x1403   :  { %2920 = vmax.xlane.f32.xlu0 %v2919_v62 }
0x1480   :  { %v2918_v49 = vpop.xlane.xlu0 %2917 }
0x1481   :  { %v2926_v17 = vsub.f32 %v2910_v26, %v2918_v49  ;;  %v2915_v12 = vpop.xlane.xlu1 %2914 }
0x1482   :  { %v2925_v63 = vsub.f32 %v2909_v51, %v2915_v12 }
0x1483   :  { %v2931_v18 = vmul.f32 1.442695, %v2926_v17 }
0x1484   :  { %v2929_v0 = vmul.f32 1.442695, %v2925_v63 }
0x1485   :  { %6581 = vpow2.f32 %v2931_v18 }
0x1486   :  { %6583 = vpow2.f32 %v2929_v0 }
0x148f   :  { %v6582_v1 = vpop.eup %6581  ;;  %v2924_v5 = vpop.xlane.xlu1 %2923 }
0x1490   :  { %v6584_v3 = vpop.eup %6583  ;;  %v2928_v2 = vsub.f32 %v2912_v57, %v2924_v5  ;;  %v2921_v23 = vpop.xlane.xlu0 %2920  ;;  %v2940_v10 = vsel %vm302_vm1, %v6582_v1, 0.0 }
0x1491   :  { %v2927_v11 = vsub.f32 %v2911_v48, %v2921_v23  ;;  %2941 = vadd.xlane.f32.xlu1 %v2940_v10  ;;  %v2937_v50 = vsel %vm302_vm1, %v6584_v3, 0.0 }
0x1492   :  { %v2935_v14 = vmul.f32 1.442695, %v2928_v2  ;;  %2938 = vadd.xlane.f32.xlu0 %v2937_v50 }
0x1493   :  { %v2933_v15 = vmul.f32 1.442695, %v2927_v11 }
0x1494   :  { %6585 = vpow2.f32 %v2935_v14 }
0x1495   :  { %6587 = vpow2.f32 %v2933_v15 }
0x149e   :  { %v6586_v16 = vpop.eup %6585 }
0x149f   :  { %v6588_v21 = vpop.eup %6587  ;;  %v2946_v20 = vsel %vm302_vm1, %v6586_v16, 0.0 }
0x14a0   :  { %2947 = vadd.xlane.f32.xlu1 %v2946_v20  ;;  %v2943_v60 = vsel %vm302_vm1, %v6588_v21, 0.0 }
0x14a1   :  { %2944 = vadd.xlane.f32.xlu0 %v2943_v60 }
0x14b1   :  { %6423 = vrot.lane.b32.xlu1 %v7520_v27, %s6706_s20 }
0x14b5   :  { %3123 = vrot.lane.b32.xlu1 %v7496_v9, %s6705_s1 }
0x14b7   :  { %6418 = vrot.lane.b32.xlu0 %v7506_v19, %s6706_s20 }
0x14b9   :  { %3125 = vrot.lane.b32.xlu1 %v7502_v34, %s6705_s1 }
0x14bb   :  { %3214 = vrot.lane.b32.xlu0 %v7512_v24, %s6705_s1 }
0x14bd   :  { %3216 = vrot.lane.b32.xlu1 %v7516_v56, %s6705_s1 }
0x151e   :  { %v2942_v40 = vpop.xlane.xlu1 %2941 }
0x151f   :  { %6589 = vrcp.f32 %v2942_v40  ;;  %v2939_v54 = vpop.xlane.xlu0 %2938 }
0x1520   :  { %6591 = vrcp.f32 %v2939_v54 }
0x1529   :  { %v6590_v59 = vpop.eup %6589 }
0x152a   :  { %v6592_v13 = vpop.eup %6591  ;;  %v2954_v46 = vmul.f32 %v6590_v59, %v6582_v1 }
0x152b   :  { %v2953_v22 = vmul.f32 %v6592_v13, %v6584_v3 }
0x152d   :  { %5790 = vmatprep.mubr.msk.f32.mxu1 %vm302_vm1, %v2953_v22  ;;  %v2948_v41 = vpop.xlane.xlu1 %2947 }
0x152e   :  { %6593 = vrcp.f32 %v2948_v41  ;;  %v2945_v36 = vpop.xlane.xlu0 %2944  ;;  %5791 = vmatmul.mubr.msk.f32.vlgmr.msra.gmra.mrb[36].mxu1 %vm302_vm1, %v2954_v46 }
0x152f   :  { %6595 = vrcp.f32 %v2945_v36  ;;  %6183 = vmatpush3.bf16.msra.mxu1 %v7522_v28 }
0x1531   :  { %v6424_v29 = vpop.permute.xlu1 %6423 }
0x1532   :  { %v6426_v31 = vunpack.i.h.bf16 %v6424_v29  ;;  %v6425_v38 = vunpack.i.l.bf16 %v6424_v29  ;;  %v6419_v33 = vpop.permute.xlu0 %6418 }
0x1533   :  { %v6421_v47 = vunpack.i.h.bf16 %v6419_v33  ;;  %v6420_v35 = vunpack.i.l.bf16 %v6419_v33 }
0x1534   :  { %v6190_v32 = vpack.c.bf16 %v6426_v31, %v6425_v38 }
0x1535   :  { %v6184_v37 = vpack.c.bf16 %v6421_v47, %v6420_v35  ;;  %v3124_v26 = vpop.permute.xlu1 %3123 }
0x1536   :  { %5804 = vmatprep.mubr.msk.f32.mxu0 %vm302_vm1, %v3124_v26  ;;  %6192 = vmatprep.subr.msk.bf16.mxu1 %vm6965_vm2, %v6190_v32  ;;  %v3215_v58 = vpop.permute.xlu0 %3214 }
0x1537   :  { %6186 = vmatprep.subr.msk.bf16.mxu0 %vm6965_vm2, %v6184_v37 }
0x1538   :  { %v6594_v8 = vpop.eup %6593  ;;  %6189 = vmatpush3.bf16.xpose.msk.msra.mxu0 %vm6965_vm2, %v6184_v37 }
0x1539   :  { %v6596_v28 = vpop.eup %6595  ;;  %v2956_v53 = vmul.f32 %v6594_v8, %v6586_v16  ;;  %v3126_v42 = vpop.permute.xlu1 %3125 }
0x153a   :  { %v2955_v51 = vmul.f32 %v6596_v28, %v6588_v21 }
0x153c   :  { %5797 = vmatprep.mubr.msk.f32.mxu1 %vm302_vm1, %v2955_v51 }
0x153d   :  { %5798 = vmatmul.mubr.msk.f32.vlgmr.msra.gmra.mrb[38].mxu1 %vm302_vm1, %v2956_v53  ;;  %v3217_v44 = vpop.permute.xlu1 %3216 }
0x153e   :  { %6195 = vmatpush3.bf16.xpose.msk.msra.mxu1 %vm6965_vm2, %v6190_v32  ;;  %5811 = vmatprep.mubr.msk.f32.mxu1 %vm302_vm1, %v3215_v58 }
0x153f   :  { %5805 = vmatmul.mubr.msk.f32.vlgmr.msra.gmra.mrb[28].mxu0 %vm302_vm1, %v3126_v42 }
0x1545   :  { %5812 = vmatmul.mubr.msk.f32.vlgmr.msra.gmra.mrb[40].mxu1 %vm302_vm1, %v3217_v44 }
0x1601   :  { %v5792_v39 = vpop.f32.mrb[36].mxu1 }
0x1602   :  { %3120 = vst.msk [vmem:[#allocation2 + $0x8] sm:$0xff] %vm302_vm1, %v5792_v39  ;;  %v3029_v57 = vpop.f32.mrb[37].mxu1 }
0x1603   :  { %3119 = vst.msk [vmem:[#allocation2] sm:$0xff] %vm302_vm1, %v3029_v57 }
0x1610   :  { %v5799_v48 = vpop.f32.mrb[38].mxu1 }
0x1611   :  { %3122 = vst.msk [vmem:[#allocation2 + $0x18] sm:$0xff] %vm302_vm1, %v5799_v48  ;;  %v3110_v43 = vpop.f32.mrb[39].mxu1 }
0x1612   :  { %3121 = vst.msk [vmem:[#allocation2 + $0x10] sm:$0xff] %vm302_vm1, %v3110_v43  ;;  %v5806_v62 = vpop.f32.mrb[28].mxu0 }
0x1613   :  { %v3306_v49 = vmul.f32 0.25, %v5806_v62  ;;  %v3205_v17 = vpop.f32.mrb[29].mxu0 }
0x1614   :  { %v3305_v12 = vmul.f32 0.25, %v3205_v17 }
0x1615   :  { %v3310_v63 = vsel %vm6989_vm6, %v3306_v49, -3.4028235e+38 }
0x1616   :  { %v3309_v18 = vsel %vm6989_vm6, %v3305_v12, -3.4028235e+38  ;;  %v3316_v0 = vsel %vm302_vm1, %v3310_v63, -inf }
0x1617   :  { %3317 = vmax.xlane.f32.xlu1 %v3316_v0  ;;  %v3313_v1 = vsel %vm302_vm1, %v3309_v18, -inf }
0x1618   :  { %v5813_v5 = vpop.f32.mrb[40].mxu1  ;;  %3314 = vmax.xlane.f32.xlu0 %v3313_v1 }
0x1619   :  { %v3296_v3 = vpop.f32.mrb[41].mxu1  ;;  %v3308_v2 = vmul.f32 0.25, %v5813_v5 }
0x161a   :  { %v3307_v23 = vmul.f32 0.25, %v3296_v3 }
0x161b   :  { %v3312_v50 = vsel %vm7000_vm7, %v3308_v2, -3.4028235e+38 }
0x161c   :  { %v3311_v10 = vsel %vm7000_vm7, %v3307_v23, -3.4028235e+38  ;;  %v3322_v14 = vsel %vm302_vm1, %v3312_v50, -inf }
0x161d   :  { %v3319_v11 = vsel %vm302_vm1, %v3311_v10, -inf }
0x161e   :  { %3320 = vmax.xlane.f32.xlu0 %v3319_v11 }
0x1622   :  { %3323 = vmax.xlane.f32.xlu0 %v3322_v14 }
0x16a4   :  { %v3318_v15 = vpop.xlane.xlu1 %3317 }
0x16a5   :  { %v3326_v16 = vsub.f32 %v3310_v63, %v3318_v15  ;;  %v3315_v21 = vpop.xlane.xlu0 %3314 }
0x16a6   :  { %v3325_v20 = vsub.f32 %v3309_v18, %v3315_v21 }
0x16a7   :  { %v3331_v60 = vmul.f32 1.442695, %v3326_v16 }
0x16a8   :  { %v3329_v40 = vmul.f32 1.442695, %v3325_v20 }
0x16a9   :  { %6597 = vpow2.f32 %v3331_v60 }
0x16aa   :  { %6599 = vpow2.f32 %v3329_v40 }
0x16ab   :  { %v3321_v46 = vpop.xlane.xlu0 %3320 }
0x16ac   :  { %v3327_v41 = vsub.f32 %v3311_v10, %v3321_v46 }
0x16ae   :  { %v3333_v36 = vmul.f32 1.442695, %v3327_v41 }
0x16af   :  { %v3324_v29 = vpop.xlane.xlu0 %3323 }
0x16b0   :  { %v3328_v31 = vsub.f32 %v3312_v50, %v3324_v29  ;;  %6601 = vpow2.f32 %v3333_v36 }
0x16b2   :  { %v3335_v38 = vmul.f32 1.442695, %v3328_v31 }
0x16b3   :  { %v6598_v54 = vpop.eup %6597 }
0x16b4   :  { %v6600_v59 = vpop.eup %6599  ;;  %v3340_v13 = vsel %vm302_vm1, %v6598_v54, 0.0  ;;  %6603 = vpow2.f32 %v3335_v38 }
0x16b5   :  { %3341 = vadd.xlane.f32.xlu1 %v3340_v13  ;;  %v3337_v22 = vsel %vm302_vm1, %v6600_v59, 0.0 }
0x16b6   :  { %3338 = vadd.xlane.f32.xlu0 %v3337_v22 }
0x16ba   :  { %v6602_v33 = vpop.eup %6601 }
0x16bb   :  { %v3343_v47 = vsel %vm302_vm1, %v6602_v33, 0.0 }
0x16be   :  { %v6604_v35 = vpop.eup %6603 }
0x16bf   :  { %v3346_v32 = vsel %vm302_vm1, %v6604_v35, 0.0 }
0x16c6   :  { %6433 = vrot.lane.b32.xlu1 %v7524_v30, %s6705_s1 }
0x16ca   :  { %6438 = vrot.lane.b32.xlu1 %v7506_v19, %s6707_s21 }
0x16cc   :  { %6428 = vrot.lane.b32.xlu0 %v7508_v45, %s6705_s1  ;;  %s6711_s1 = smov [#allocation3]  }
0x16ce   :  { %6443 = vrot.lane.b32.xlu1 %v7520_v27, %s6707_s21 }
0x16eb   :  { %3344 = vadd.xlane.f32.xlu0 %v3343_v47 }
0x16f2   :  { %3347 = vadd.xlane.f32.xlu1 %v3346_v32 }
0x1701   :  { %3555 = vrot.lane.b32.xlu0 %v7496_v9, %s6708_s22 }
0x1703   :  { %3557 = vrot.lane.b32.xlu1 %v7502_v34, %s6708_s22 }
0x1705   :  { %3646 = vrot.lane.b32.xlu0 %v7512_v24, %s6708_s22 }
0x1707   :  { %3648 = vrot.lane.b32.xlu1 %v7516_v56, %s6708_s22 }
0x1742   :  { %v3342_v37 = vpop.xlane.xlu1 %3341 }
0x1743   :  { %6605 = vrcp.f32 %v3342_v37  ;;  %v3339_v26 = vpop.xlane.xlu0 %3338 }
0x1744   :  { %6607 = vrcp.f32 %v3339_v26 }
0x1746   :  { %v6434_v8 = vpop.permute.xlu1 %6433 }
0x1747   :  { %v6436_v28 = vunpack.i.h.bf16 %v6434_v8  ;;  %v6435_v51 = vunpack.i.l.bf16 %v6434_v8  ;;  %v6429_v53 = vpop.permute.xlu0 %6428 }
0x1748   :  { %v6431_v58 = vunpack.i.h.bf16 %v6429_v53  ;;  %v6430_v42 = vunpack.i.l.bf16 %v6429_v53 }
0x1749   :  { %v6200_v44 = vpack.c.bf16 %v6436_v28, %v6435_v51 }
0x174a   :  { %v6196_v39 = vpack.c.bf16 %v6431_v58, %v6430_v42  ;;  %v6439_v57 = vpop.permute.xlu1 %6438 }
0x174b   :  { %v6441_v48 = vunpack.i.h.bf16 %v6439_v57  ;;  %v6440_v43 = vunpack.i.l.bf16 %v6439_v57  ;;  %6201 = vmatprep.subr.bf16.mxu1 %v6200_v44 }
0x174c   :  { %6197 = vmatprep.subr.bf16.mxu0 %v6196_v39  ;;  %6203 = vmatpush3.bf16.msra.mxu1 %v6200_v44 }
0x174d   :  { %v6606_v62 = vpop.eup %6605  ;;  %v6204_v49 = vpack.c.bf16 %v6441_v48, %v6440_v43  ;;  %6199 = vmatpush3.bf16.msra.mxu0 %v6196_v39 }
0x174e   :  { %v6608_v17 = vpop.eup %6607  ;;  %v6444_v12 = vpop.permute.xlu1 %6443  ;;  %v3354_v1 = vmul.f32 %v6606_v62, %v6598_v54 }
0x174f   :  { %v6446_v63 = vunpack.i.h.bf16 %v6444_v12  ;;  %v6445_v18 = vunpack.i.l.bf16 %v6444_v12  ;;  %6206 = vmatprep.subr.msk.bf16.mxu0 %vm6965_vm2, %v6204_v49  ;;  %v3353_v0 = vmul.f32 %v6608_v17, %v6600_v59 }
0x1751   :  { %v6210_v5 = vpack.c.bf16 %v6446_v63, %v6445_v18  ;;  %5818 = vmatprep.mubr.msk.f32.mxu0 %vm302_vm1, %v3353_v0 }
0x1752   :  { %5819 = vmatmul.mubr.msk.f32.vlgmr.msra.gmra.mrb[30].mxu0 %vm302_vm1, %v3354_v1 }
0x1753   :  { %6212 = vmatprep.subr.msk.bf16.mxu1 %vm6965_vm2, %v6210_v5 }
0x1756   :  { %6209 = vmatpush3.bf16.xpose.msk.msra.mxu0 %vm6965_vm2, %v6204_v49 }
0x1778   :  { %v3345_v3 = vpop.xlane.xlu0 %3344 }
0x1779   :  { %6609 = vrcp.f32 %v3345_v3 }
0x177c   :  { %v3556_v2 = vpop.permute.xlu0 %3555 }
0x177d   :  { %5832 = vmatprep.mubr.msk.f32.mxu0 %vm302_vm1, %v3556_v2 }
0x177f   :  { %v3348_v23 = vpop.xlane.xlu1 %3347 }
0x1780   :  { %6611 = vrcp.f32 %v3348_v23  ;;  %v3647_v16 = vpop.permute.xlu0 %3646 }
0x1783   :  { %v6610_v10 = vpop.eup %6609  ;;  %v3558_v11 = vpop.permute.xlu1 %3557 }
0x1784   :  { %5833 = vmatmul.mubr.msk.f32.vlgmr.msra.gmra.mrb[32].mxu0 %vm302_vm1, %v3558_v11  ;;  %v3355_v50 = vmul.f32 %v6610_v10, %v6602_v33 }
0x1786   :  { %5825 = vmatprep.mubr.msk.f32.mxu1 %vm302_vm1, %v3355_v50 }
0x1787   :  { %v3649_v21 = vpop.permute.xlu1 %3648 }
0x178a   :  { %v6612_v14 = vpop.eup %6611 }
0x178b   :  { %v3356_v15 = vmul.f32 %v6612_v14, %v6604_v35 }
0x178d   :  { %5826 = vmatmul.mubr.msk.f32.vlgmr.msra.gmra.mrb[42].mxu1 %vm302_vm1, %v3356_v15 }
0x178e   :  { %6215 = vmatpush3.bf16.xpose.msk.msra.mxu1 %vm6965_vm2, %v6210_v5  ;;  %5839 = vmatprep.mubr.msk.f32.mxu1 %vm302_vm1, %v3647_v16 }
0x1795   :  { %5840 = vmatmul.mubr.msk.f32.vlgmr.msra.gmra.mrb[44].mxu1 %vm302_vm1, %v3649_v21 }
0x1825   :  { %v7638_v20 = vpop.f32.mrb[30].mxu0 }
0x1826   :  { %v7640_v60 = vpop.f32.mrb[31].mxu0 }
0x1857   :  { %v5834_v40 = vpop.f32.mrb[32].mxu0 }
0x1858   :  { %v3738_v54 = vmul.f32 0.25, %v5834_v40  ;;  %v3637_v59 = vpop.f32.mrb[33].mxu0 }
0x1859   :  { %v3737_v13 = vmul.f32 0.25, %v3637_v59 }
0x185a   :  { %v3742_v22 = vsel %vm6989_vm6, %v3738_v54, -3.4028235e+38 }
0x185b   :  { %v3741_v46 = vsel %vm6989_vm6, %v3737_v13, -3.4028235e+38  ;;  %v3748_v41 = vsel %vm302_vm1, %v3742_v22, -inf }
0x185c   :  { %3749 = vmax.xlane.f32.xlu1 %v3748_v41  ;;  %v3745_v36 = vsel %vm302_vm1, %v3741_v46, -inf }
0x185d   :  { %3746 = vmax.xlane.f32.xlu0 %v3745_v36 }
0x1860   :  { %v7648_v29 = vpop.f32.mrb[42].mxu1 }
0x1861   :  { %v7650_v31 = vpop.f32.mrb[43].mxu1 }
0x1868   :  { %v5841_v38 = vpop.f32.mrb[44].mxu1 }
0x1869   :  { %v3728_v33 = vpop.f32.mrb[45].mxu1  ;;  %v3740_v47 = vmul.f32 0.25, %v5841_v38 }
0x186a   :  { %v3739_v35 = vmul.f32 0.25, %v3728_v33 }
0x186b   :  { %v3744_v26 = vsel %vm7000_vm7, %v3740_v47, -3.4028235e+38 }
0x186c   :  { %v3743_v32 = vsel %vm7000_vm7, %v3739_v35, -3.4028235e+38  ;;  %v3754_v8 = vsel %vm302_vm1, %v3744_v26, -inf }
0x186d   :  { %v3751_v37 = vsel %vm302_vm1, %v3743_v32, -inf }
0x186e   :  { %3752 = vmax.xlane.f32.xlu0 %v3751_v37 }
0x1872   :  { %3755 = vmax.xlane.f32.xlu0 %v3754_v8 }
0x18e9   :  { %v3750_v28 = vpop.xlane.xlu1 %3749 }
0x18ea   :  { %v3758_v51 = vsub.f32 %v3742_v22, %v3750_v28  ;;  %v3747_v53 = vpop.xlane.xlu0 %3746 }
0x18eb   :  { %v3757_v58 = vsub.f32 %v3741_v46, %v3747_v53 }
0x18ec   :  { %v3763_v42 = vmul.f32 1.442695, %v3758_v51 }
0x18ed   :  { %v3761_v44 = vmul.f32 1.442695, %v3757_v58 }
0x18ee   :  { %6613 = vpow2.f32 %v3763_v42 }
0x18ef   :  { %6615 = vpow2.f32 %v3761_v44 }
0x18f8   :  { %v6614_v39 = vpop.eup %6613 }
0x18f9   :  { %v6616_v57 = vpop.eup %6615  ;;  %v3772_v48 = vsel %vm302_vm1, %v6614_v39, 0.0 }
0x18fa   :  { %3773 = vadd.xlane.f32.xlu1 %v3772_v48  ;;  %v3769_v43 = vsel %vm302_vm1, %v6616_v57, 0.0 }
0x18fb   :  { %3770 = vadd.xlane.f32.xlu0 %v3769_v43  ;;  %v3753_v62 = vpop.xlane.xlu0 %3752 }
0x18fc   :  { %v3759_v49 = vsub.f32 %v3743_v32, %v3753_v62 }
0x18fe   :  { %v3765_v17 = vmul.f32 1.442695, %v3759_v49 }
0x18ff   :  { %v3756_v12 = vpop.xlane.xlu0 %3755 }
0x1900   :  { %v3760_v63 = vsub.f32 %v3744_v26, %v3756_v12  ;;  %6617 = vpow2.f32 %v3765_v17 }
0x1902   :  { %v3767_v18 = vmul.f32 1.442695, %v3760_v63 }
0x1904   :  { %6619 = vpow2.f32 %v3767_v18 }
0x190a   :  { %v6618_v0 = vpop.eup %6617 }
0x190b   :  { %6453 = vrot.lane.b32.xlu1 %v7524_v30, %s6708_s22  ;;  %v3775_v1 = vsel %vm302_vm1, %v6618_v0, 0.0 }
0x190e   :  { %v6620_v5 = vpop.eup %6619 }
0x190f   :  { %6458 = vrot.lane.b32.xlu1 %v7506_v19, %s6709_s2  ;;  %v3778_v19 = vsel %vm302_vm1, %v6620_v5, 0.0 }
0x1911   :  { %6448 = vrot.lane.b32.xlu0 %v7508_v45, %s6708_s22  ;;  %s5142_s22 = sshll.u32 %s6711_s1, 4  ;;  %s5143_s22 = int_to_ptr.vmem [resolvable:$true] %s5142_s22 }
0x1912   :  { %s6677_s24 = scalar_lea.vmem %s5143_s22, 512  ;;  %p6682_p1 = scmp.lt.s32.totalorder %s5143_s22, %s5143_s22 }
0x1913   :  { %6463 = vrot.lane.b32.xlu1 %v7520_v27, %s6709_s2  ;;  %p6678_p0 = scmp.ne.s32.totalorder %s5143_s22, %s6677_s24  ;;  %p6683_p2 = scmp.lt.s32.totalorder %s6677_s24, %s6677_s24 }
0x1915   :  { %p6684_p3 = por %p6683_p2, %p6682_p1 }
0x1917   :  { %p6685_p4 = pnand %p6684_p3, %p6678_p0 }
0x1930   :  { %3776 = vadd.xlane.f32.xlu0 %v3775_v1 }
0x1937   :  { %3779 = vadd.xlane.f32.xlu1 %v3778_v19 }
0x1946   :  { %3983 = vrot.lane.b32.xlu0 %v7496_v9, %s8022_s5 }
0x1948   :  { %3985 = vrot.lane.b32.xlu1 %v7502_v34, %s8022_s5 }
0x194a   :  { %4074 = vrot.lane.b32.xlu0 %v7512_v24, %s8022_s5 }
0x194c   :  { %4076 = vrot.lane.b32.xlu1 %v7516_v56, %s8022_s5 }
0x1987   :  { %v3774_v27 = vpop.xlane.xlu1 %3773 }
0x1988   :  { %6621 = vrcp.f32 %v3774_v27  ;;  %v3771_v3 = vpop.xlane.xlu0 %3770 }
0x1989   :  { %6623 = vrcp.f32 %v3771_v3 }
0x198b   :  { %v6454_v2 = vpop.permute.xlu1 %6453 }
0x198c   :  { %v6456_v23 = vunpack.i.h.bf16 %v6454_v2  ;;  %v6455_v10 = vunpack.i.l.bf16 %v6454_v2  ;;  %v6449_v11 = vpop.permute.xlu0 %6448 }
0x198d   :  { %v6451_v50 = vunpack.i.h.bf16 %v6449_v11  ;;  %v6450_v14 = vunpack.i.l.bf16 %v6449_v11 }
0x198e   :  { %v6220_v9 = vpack.c.bf16 %v6456_v23, %v6455_v10 }
0x198f   :  { %v6216_v15 = vpack.c.bf16 %v6451_v50, %v6450_v14  ;;  %v6459_v16 = vpop.permute.xlu1 %6458 }
0x1990   :  { %v6461_v34 = vunpack.i.h.bf16 %v6459_v16  ;;  %v6460_v21 = vunpack.i.l.bf16 %v6459_v16  ;;  %6221 = vmatprep.subr.bf16.mxu1 %v6220_v9 }
0x1991   :  { %6217 = vmatprep.subr.bf16.mxu0 %v6216_v15  ;;  %6223 = vmatpush3.bf16.msra.mxu1 %v6220_v9 }
0x1992   :  { %v6622_v24 = vpop.eup %6621  ;;  %v6224_v56 = vpack.c.bf16 %v6461_v34, %v6460_v21  ;;  %6219 = vmatpush3.bf16.msra.mxu0 %v6216_v15 }
0x1993   :  { %v6624_v40 = vpop.eup %6623  ;;  %v6464_v54 = vpop.permute.xlu1 %6463  ;;  %v3786_v46 = vmul.f32 %v6622_v24, %v6614_v39 }
0x1994   :  { %v6466_v59 = vunpack.i.h.bf16 %v6464_v54  ;;  %v6465_v13 = vunpack.i.l.bf16 %v6464_v54  ;;  %6226 = vmatprep.subr.msk.bf16.mxu0 %vm6965_vm2, %v6224_v56  ;;  %v3785_v22 = vmul.f32 %v6624_v40, %v6616_v57 }
0x1996   :  { %v6230_v41 = vpack.c.bf16 %v6466_v59, %v6465_v13  ;;  %5846 = vmatprep.mubr.msk.f32.mxu0 %vm302_vm1, %v3785_v22 }
0x1997   :  { %5847 = vmatmul.mubr.msk.f32.vlgmr.msra.gmra.mrb[34].mxu0 %vm302_vm1, %v3786_v46 }
0x1998   :  { %6232 = vmatprep.subr.msk.bf16.mxu1 %vm6965_vm2, %v6230_v41 }
0x199b   :  { %6229 = vmatpush3.bf16.xpose.msk.msra.mxu0 %vm6965_vm2, %v6224_v56 }
0x19bd   :  { %v3777_v36 = vpop.xlane.xlu0 %3776 }
0x19be   :  { %6625 = vrcp.f32 %v3777_v36 }
0x19c1   :  { %v3984_v38 = vpop.permute.xlu0 %3983 }
0x19c2   :  { %5860 = vmatprep.mubr.msk.f32.mxu0 %vm302_vm1, %v3984_v38 }
0x19c4   :  { %v3780_v33 = vpop.xlane.xlu1 %3779 }
0x19c5   :  { %6627 = vrcp.f32 %v3780_v33  ;;  %v4075_v8 = vpop.permute.xlu0 %4074 }
0x19c8   :  { %v6626_v47 = vpop.eup %6625  ;;  %v3986_v35 = vpop.permute.xlu1 %3985 }
0x19c9   :  { %5861 = vmatmul.mubr.msk.f32.vlgmr.msra.gmra.mrb[36].mxu0 %vm302_vm1, %v3986_v35  ;;  %v3787_v32 = vmul.f32 %v6626_v47, %v6618_v0 }
0x19cb   :  { %5853 = vmatprep.mubr.msk.f32.mxu1 %vm302_vm1, %v3787_v32 }
0x19cc   :  { %v4077_v28 = vpop.permute.xlu1 %4076 }
0x19cf   :  { %v6628_v37 = vpop.eup %6627 }
0x19d0   :  { %v3788_v26 = vmul.f32 %v6628_v37, %v6620_v5 }
0x19d2   :  { %5854 = vmatmul.mubr.msk.f32.vlgmr.msra.gmra.mrb[46].mxu1 %vm302_vm1, %v3788_v26 }
0x19d3   :  { %6235 = vmatpush3.bf16.xpose.msk.msra.mxu1 %vm6965_vm2, %v6230_v41  ;;  %5867 = vmatprep.mubr.msk.f32.mxu1 %vm302_vm1, %v4075_v8 }
0x19da   :  { %5868 = vmatmul.mubr.msk.f32.vlgmr.msra.gmra.mrb[48].mxu1 %vm302_vm1, %v4077_v28 }
0x1a6a   :  { %v5848_v51 = vpop.f32.mrb[34].mxu0 }
0x1a6b   :  { %v3867_v53 = vpop.f32.mrb[35].mxu0 }
0x1a9c   :  { %v5862_v58 = vpop.f32.mrb[36].mxu0 }
0x1a9d   :  { %v4166_v42 = vmul.f32 0.25, %v5862_v58  ;;  %v4065_v44 = vpop.f32.mrb[37].mxu0 }
0x1a9e   :  { %v4165_v39 = vmul.f32 0.25, %v4065_v44 }
0x1a9f   :  { %v4170_v57 = vsel %vm6989_vm6, %v4166_v42, -3.4028235e+38 }
0x1aa0   :  { %v4169_v48 = vsel %vm6989_vm6, %v4165_v39, -3.4028235e+38  ;;  %v4176_v52 = vsel %vm302_vm1, %v4170_v57, -inf }
0x1aa1   :  { %4177 = vmax.xlane.f32.xlu1 %v4176_v52  ;;  %v4173_v43 = vsel %vm302_vm1, %v4169_v48, -inf  ;;  %v5293_v52 = vld [vmem:[%s7994_s6 + $0x50] sm:$0xff] }
0x1aa2   :  { %4174 = vmax.xlane.f32.xlu0 %v4173_v43 }
0x1aa5   :  { %v7700_v62 = vpop.f32.mrb[46].mxu1 }
0x1aa6   :  { %v7702_v49 = vpop.f32.mrb[47].mxu1 }
0x1aad   :  { %v5869_v17 = vpop.f32.mrb[48].mxu1 }
0x1aae   :  { %v4156_v12 = vpop.f32.mrb[49].mxu1  ;;  %v4168_v63 = vmul.f32 0.25, %v5869_v17  ;;  %v5294_v17 = vld [vmem:[%s7994_s6 + $0x58] sm:$0xff] }
0x1aaf   :  { %v4167_v18 = vmul.f32 0.25, %v4156_v12  ;;  %v6248_v12 = vpack.c.bf16 %v5294_v17, %v5293_v52  ;;  %v5310_v52 = vld [vmem:[%s7998_s10 + $0x48] sm:$0xff]  ;;  %v5311_v17 = vld [vmem:[%s7998_s10 + $0x50] sm:$0xff] }
0x1ab0   :  { %v4172_v1 = vsel %vm7000_vm7, %v4168_v63, -3.4028235e+38  ;;  %v5295_v63 = vld [vmem:[%s7994_s6 + $0x60] sm:$0xff] }
0x1ab1   :  { %v4171_v0 = vsel %vm7000_vm7, %v4167_v18, -3.4028235e+38  ;;  %v4182_v5 = vsel %vm302_vm1, %v4172_v1, -inf  ;;  %v5296_v18 = vld [vmem:[%s7994_s6 + $0x68] sm:$0xff] }
0x1ab2   :  { %v4179_v7 = vsel %vm302_vm1, %v4171_v0, -inf }
0x1ab3   :  { %4180 = vmax.xlane.f32.xlu0 %v4179_v7  ;;  %v5297_v7 = vld [vmem:[%s7994_s6 + $0x70] sm:$0xff] }
0x1ab7   :  { %4183 = vmax.xlane.f32.xlu0 %v4182_v5 }
0x1b2e   :  { %v4178_v19 = vpop.xlane.xlu1 %4177 }
0x1b2f   :  { %v4186_v27 = vsub.f32 %v4170_v57, %v4178_v19  ;;  %v4175_v3 = vpop.xlane.xlu0 %4174  ;;  %v5291_v57 = vld [vmem:[%s7994_s6 + $0x40] sm:$0xff] }
0x1b30   :  { %v4185_v2 = vsub.f32 %v4169_v48, %v4175_v3  ;;  %v5292_v48 = vld [vmem:[%s7994_s6 + $0x48] sm:$0xff] }
0x1b31   :  { %v4191_v23 = vmul.f32 1.442695, %v4186_v27  ;;  %v6244_v43 = vpack.c.bf16 %v5292_v48, %v5291_v57  ;;  %v5309_v48 = vld [vmem:[%s7998_s10 + $0x40] sm:$0xff] }
0x1b32   :  { %v4189_v10 = vmul.f32 1.442695, %v4185_v2 }
0x1b33   :  { %6629 = vpow2.f32 %v4191_v23 }
0x1b34   :  { %6631 = vpow2.f32 %v4189_v10 }
0x1b3d   :  { %v6630_v11 = vpop.eup %6629 }
0x1b3e   :  { %v6632_v50 = vpop.eup %6631  ;;  %v4200_v14 = vsel %vm302_vm1, %v6630_v11, 0.0 }
0x1b3f   :  { %4201 = vadd.xlane.f32.xlu1 %v4200_v14  ;;  %v4197_v25 = vsel %vm302_vm1, %v6632_v50, 0.0 }
0x1b40   :  { %v4181_v9 = vpop.xlane.xlu0 %4180  ;;  %4198 = vadd.xlane.f32.xlu0 %v4197_v25 }
0x1b41   :  { %v4187_v15 = vsub.f32 %v4171_v0, %v4181_v9  ;;  %v6252_v0 = vpack.c.bf16 %v5296_v18, %v5295_v63  ;;  %v5313_v18 = vld [vmem:[%s7998_s10 + $0x60] sm:$0xff] }
0x1b43   :  { %v4193_v16 = vmul.f32 1.442695, %v4187_v15 }
0x1b44   :  { %v4184_v34 = vpop.xlane.xlu0 %4183 }
0x1b45   :  { %6633 = vpow2.f32 %v4193_v16  ;;  %v4188_v21 = vsub.f32 %v4172_v1, %v4184_v34  ;;  %v5298_v1 = vld [vmem:[%s7994_s6 + $0x78] sm:$0xff]  ;;  %v5300_v16 = vld [vmem:[%s7995_s7 + $0x1] ss:$0 sm:$0xff] }
0x1b46   :  { %v6256_v5 = vpack.c.bf16 %v5298_v1, %v5297_v7  ;;  %v5315_v1 = vld [vmem:[%s7998_s10 + $0x70] sm:$0xff] }
0x1b47   :  { %v4195_v24 = vmul.f32 1.442695, %v4188_v21 }
0x1b49   :  { %6635 = vpow2.f32 %v4195_v24 }
0x1b4f   :  { %v6634_v56 = vpop.eup %6633 }
0x1b50   :  { %v4203_v40 = vsel %vm302_vm1, %v6634_v56, 0.0 }
0x1b51   :  { %4204 = vadd.xlane.f32.xlu0 %v4203_v40 }
0x1b53   :  { %v6636_v54 = vpop.eup %6635 }
0x1b54   :  { %v4206_v59 = vsel %vm302_vm1, %v6636_v54, 0.0 }
0x1b55   :  { %4207 = vadd.xlane.f32.xlu1 %v4206_v59 }
0x1b66   :  { %6473 = vrot.lane.b32.xlu1 %v7524_v30, %s8022_s5 }
0x1b67   :  { %6468 = vrot.lane.b32.xlu0 %v7508_v45, %s8022_s5 }
0x1b6a   :  { %3539 = vrot.lane.b32.xlu1 %v7640_v60, %s6709_s2 }
0x1b6b   :  { %3967 = vrot.lane.b32.xlu0 %v3867_v53, %s6707_s21 }
0x1b6e   :  { %3541 = vrot.lane.b32.xlu1 %v7638_v20, %s6709_s2 }
0x1b72   :  { %3969 = vrot.lane.b32.xlu1 %v5848_v51, %s6707_s21 }
0x1bcc   :  { %v4202_v46 = vpop.xlane.xlu1 %4201 }
0x1bcd   :  { %v4199_v13 = vpop.xlane.xlu0 %4198 }
0x1bce   :  { %6637 = vrcp.f32 %v4199_v13 }
0x1bcf   :  { %6639 = vrcp.f32 %v4202_v46 }
0x1bd8   :  { %v6638_v22 = vpop.eup %6637 }
0x1bd9   :  { %v4213_v41 = vmul.f32 %v6638_v22, %v6632_v50  ;;  %v6640_v47 = vpop.eup %6639 }
0x1bda   :  { %v4214_v26 = vmul.f32 %v6640_v47, %v6630_v11 }
0x1bdb   :  { %5874 = vmatprep.mubr.msk.f32.mxu0 %vm302_vm1, %v4213_v41 }
0x1bde   :  { %v4205_v30 = vpop.xlane.xlu0 %4204 }
0x1bdf   :  { %6641 = vrcp.f32 %v4205_v30 }
0x1be2   :  { %v4208_v45 = vpop.xlane.xlu1 %4207  ;;  %v6469_v36 = vpop.permute.xlu0 %6468 }
0x1be3   :  { %6643 = vrcp.f32 %v4208_v45  ;;  %v6471_v60 = vunpack.i.h.bf16 %v6469_v36  ;;  %v6470_v38 = vunpack.i.l.bf16 %v6469_v36 }
0x1be5   :  { %v6236_v33 = vpack.c.bf16 %v6471_v60, %v6470_v38 }
0x1be6   :  { %v6474_v20 = vpop.permute.xlu1 %6473  ;;  %v3968_v53 = vpop.permute.xlu0 %3967 }
0x1be7   :  { %v6476_v35 = vunpack.i.h.bf16 %v6474_v20  ;;  %v6475_v32 = vunpack.i.l.bf16 %v6474_v20  ;;  %6237 = vmatprep.subr.bf16.mxu0 %v6236_v33 }
0x1be8   :  { %6239 = vmatpush3.bf16.msra.mxu0 %v6236_v33 }
0x1be9   :  { %v6642_v37 = vpop.eup %6641  ;;  %v6240_v8 = vpack.c.bf16 %v6476_v35, %v6475_v32  ;;  %6245 = vmatprep.subr.bf16.mxu0 %v6244_v43 }
0x1bea   :  { %v3540_v28 = vpop.permute.xlu1 %3539  ;;  %v4215_v51 = vmul.f32 %v6642_v37, %v6634_v56 }
0x1beb   :  { %3551 = vst.msk [vmem:[#allocation2] sm:$0xff] %vm1133_vm8, %v3540_v28  ;;  %5875 = vmatmul.mubr.msk.f32.vlgmr.msra.gmra.mrb[38].mxu0 %vm302_vm1, %v4214_v26  ;;  %6241 = vmatprep.subr.bf16.mxu1 %v6240_v8 }
0x1bec   :  { %3979 = vst.msk [vmem:[#allocation2] sm:$0xff] %vm1562_vm9, %v3968_v53  ;;  %6243 = vmatpush3.bf16.msra.mxu1 %v6240_v8  ;;  %5881 = vmatprep.mubr.msk.f32.mxu1 %vm302_vm1, %v4215_v51 }
0x1bed   :  { %v6644_v58 = vpop.eup %6643  ;;  %6247 = vmatpush3.bf16.msra.mxu0 %v6244_v43  ;;  %v6260_v43 = vpack.c.bf16 %v5310_v52, %v5309_v48  ;;  %v5338_v48 = vld [vmem:[%s8000_s12 + $0xf8] sm:$0xff] }
0x1bee   :  { %v4216_v42 = vmul.f32 %v6644_v58, %v6636_v54  ;;  %v3542_v44 = vpop.permute.xlu1 %3541  ;;  %6249 = vmatprep.subr.bf16.mxu0 %v6248_v12 }
0x1bef   :  { %3552 = vst.msk [vmem:[#allocation2 + $0x8] sm:$0xff] %vm1133_vm8, %v3542_v44  ;;  %6261 = vmatprep.subr.bf16.mxu1 %v6260_v43 }
0x1bf0   :  { %5882 = vmatmul.mubr.msk.f32.vlgmr.msra.gmra.mrb[50].mxu1 %vm302_vm1, %v4216_v42 }
0x1bf1   :  { %6251 = vmatpush3.bf16.msra.mxu0 %v6248_v12  ;;  %6263 = vmatpush3.bf16.msra.mxu1 %v6260_v43  ;;  %v5312_v12 = vld [vmem:[%s7998_s10 + $0x58] sm:$0xff]  ;;  %v5318_v43 = vld [vmem:[%s7999_s11 + $0x1] ss:$0 sm:$0xff] }
0x1bf2   :  { %v3970_v39 = vpop.permute.xlu1 %3969  ;;  %6253 = vmatprep.subr.bf16.mxu0 %v6252_v0  ;;  %v6264_v63 = vpack.c.bf16 %v5312_v12, %v5311_v17 }
0x1bf3   :  { %3980 = vst.msk [vmem:[#allocation2 + $0x8] sm:$0xff] %vm1562_vm9, %v3970_v39 }
0x1bf4   :  { %6265 = vmatprep.subr.bf16.mxu1 %v6264_v63 }
0x1bf5   :  { %6255 = vmatpush3.bf16.msra.mxu0 %v6252_v0  ;;  %6267 = vmatpush3.bf16.msra.mxu1 %v6264_v63  ;;  %v5314_v0 = vld [vmem:[%s7998_s10 + $0x68] sm:$0xff] }
0x1bf6   :  { %6257 = vmatprep.subr.bf16.mxu0 %v6256_v5  ;;  %v6268_v7 = vpack.c.bf16 %v5314_v0, %v5313_v18 }
0x1bf8   :  { %6269 = vmatprep.subr.bf16.mxu1 %v6268_v7 }
0x1bf9   :  { %6259 = vmatpush3.bf16.msra.mxu0 %v6256_v5  ;;  %6271 = vmatpush3.bf16.msra.mxu1 %v6268_v7  ;;  %v5316_v5 = vld [vmem:[%s7998_s10 + $0x78] sm:$0xff] }
0x1cbe   :  { %v5876_v19 = vpop.f32.mrb[38].mxu0 }
0x1cbf   :  { %4397 = vrot.lane.b32.xlu1 %v5876_v19, %s6706_s20  ;;  %v4295_v27 = vpop.f32.mrb[39].mxu0  ;;  %v6272_v19 = vpack.c.bf16 %v5316_v5, %v5315_v1 }
0x1cc0   :  { %4395 = vrot.lane.b32.xlu0 %v4295_v27, %s6706_s20 }
0x1cc1   :  { %6273 = vmatprep.subr.bf16.mxu1 %v6272_v19 }
0x1cc2   :  { %6275 = vmatpush3.bf16.msra.mxu1 %v6272_v19 }
0x1cc3   :  { %v5883_v3 = vpop.f32.mrb[50].mxu1  ;;  %3545 = vrot.lane.b32.xlu1 %v7648_v29, %s6709_s2 }
0x1cc4   :  { %v4382_v2 = vpop.f32.mrb[51].mxu1  ;;  %3543 = vrot.lane.b32.xlu0 %v7650_v31, %s6709_s2 }
0x1cc7   :  { %3973 = vrot.lane.b32.xlu1 %v7700_v62, %s6707_s21 }
0x1cc8   :  { %3971 = vrot.lane.b32.xlu0 %v7702_v49, %s6707_s21 }
0x1ccb   :  { %4401 = vrot.lane.b32.xlu1 %v5883_v3, %s6706_s20 }
0x1ccc   :  { %4399 = vrot.lane.b32.xlu0 %v4382_v2, %s6706_s20 }
0x1d31   :  { %v4398_v23 = vpop.permute.xlu1 %4397 }
0x1d32   :  { %4408 = vst.msk [vmem:[#allocation2 + $0x8] sm:$0xff] %vm1991_vm10, %v4398_v23  ;;  %v4396_v10 = vpop.permute.xlu0 %4395 }
0x1d33   :  { %4407 = vst.msk [vmem:[#allocation2] sm:$0xff] %vm1991_vm10, %v4396_v10 }
0x1d35   :  { %v3546_v29 = vpop.permute.xlu1 %3545 }
0x1d36   :  { %3554 = vst.msk [vmem:[#allocation2 + $0x18] sm:$0xff] %vm1133_vm8, %v3546_v29  ;;  %v3544_v31 = vpop.permute.xlu0 %3543 }
0x1d37   :  { %3553 = vst.msk [vmem:[#allocation2 + $0x10] sm:$0xff] %vm1133_vm8, %v3544_v31 }
0x1d39   :  { %v3974_v62 = vpop.permute.xlu1 %3973  ;;  %v4412_v50 = vld [vmem:[#allocation2 + $0x8] sm:$0xff] }
0x1d3a   :  { %3982 = vst.msk [vmem:[#allocation2 + $0x18] sm:$0xff] %vm1562_vm9, %v3974_v62  ;;  %v3972_v49 = vpop.permute.xlu0 %3971  ;;  %v4411_v11 = vld [vmem:[#allocation2] sm:$0xff] }
0x1d3b   :  { %3981 = vst.msk [vmem:[#allocation2 + $0x10] sm:$0xff] %vm1562_vm9, %v3972_v49  ;;  %5900 = vmatprep.mubr.msk.f32.mxu0 %vm66_vm0, %v4411_v11  ;;  %v5307_v11 = vld [vmem:[%s7996_s8 + $0x1] ss:$0 sm:$0xff] }
0x1d3c   :  { %5901 = vmatmul.mubr.msk.f32.vlgmr.msra.gmra.mrb[40].mxu0 %vm66_vm0, %v4412_v50 }
0x1d3d   :  { %v4402_v14 = vpop.permute.xlu1 %4401 }
0x1d3e   :  { %4410 = vst.msk [vmem:[#allocation2 + $0x18] sm:$0xff] %vm1991_vm10, %v4402_v14  ;;  %v4400_v25 = vpop.permute.xlu0 %4399 }
0x1d3f   :  { %4409 = vst.msk [vmem:[#allocation2 + $0x10] sm:$0xff] %vm1991_vm10, %v4400_v25 }
0x1d45   :  { %v4414_v15 = vld [vmem:[#allocation2 + $0x18] sm:$0xff] }
0x1d46   :  { %v4413_v9 = vld [vmem:[#allocation2 + $0x10] sm:$0xff] }
0x1d47   :  { %5903 = vmatprep.mubr.msk.f32.mxu0 %vm66_vm0, %v4413_v9 }
0x1d48   :  { %5904 = vmatmul.mubr.msk.f32.gmra.mrb[42].mxu0 %vm66_vm0, %v4414_v15 }
0x1e0f   :  { %v5902_v34 = vpop.f32.mrb[40].mxu0 }
0x1e10   :  { %v4516_v21 = vadd.f32 %v5902_v34, %v5300_v16  ;;  %v4510_v24 = vpop.f32.mrb[41].mxu0  ;;  %v5308_v34 = vld [vmem:[%s7997_s9 + $0x1] ss:$0 sm:$0xff] }
0x1e11   :  { %v4511_v56 = vadd.f32 %v5300_v16, %v4510_v24 }
0x1e12   :  { %v4530_v40 = vadd.f32 %v4516_v21, %v7476_v61 }
0x1e13   :  { %v4529_v54 = vadd.f32 %v4511_v56, %v7471_v55 }
0x1e14   :  { %v4540_v59 = vsel %vm66_vm0, %v4530_v40, 0.0 }
0x1e15   :  { %4541 = vadd.xlane.f32.xlu1 %v4540_v59  ;;  %v4537_v13 = vsel %vm66_vm0, %v4529_v54, 0.0 }
0x1e16   :  { %4538 = vadd.xlane.f32.xlu0 %v4537_v13 }
0x1e1b   :  { %v5905_v22 = vpop.f32.mrb[42].mxu0 }
0x1e1c   :  { %v4520_v46 = vpop.f32.mrb[43].mxu0  ;;  %v4526_v41 = vadd.f32 %v5905_v22, %v5300_v16 }
0x1e1d   :  { %v4521_v30 = vadd.f32 %v5300_v16, %v4520_v46 }
0x1e1e   :  { %v4532_v36 = vadd.f32 %v4526_v41, %v7488_v6 }
0x1e1f   :  { %v4531_v45 = vadd.f32 %v4521_v30, %v7483_v4 }
0x1e20   :  { %v4546_v61 = vsel %vm66_vm0, %v4532_v36, 0.0 }
0x1e21   :  { %v4543_v60 = vsel %vm66_vm0, %v4531_v45, 0.0 }
0x1e22   :  { %4544 = vadd.xlane.f32.xlu0 %v4543_v60  ;;  %v5323_v60 = vld [vmem:[%s8000_s12 + $0x80] sm:$0xff] }
0x1e26   :  { %4547 = vadd.xlane.f32.xlu0 %v4546_v61  ;;  %v5324_v61 = vld [vmem:[%s8000_s12 + $0x88] sm:$0xff] }
0x1ea2   :  { %v4542_v55 = vpop.xlane.xlu1 %4541 }
0x1ea3   :  { %v4550_v38 = vmul.f32 0.015625, %v4542_v55  ;;  %v4539_v33 = vpop.xlane.xlu0 %4538  ;;  %v6276_v55 = vpack.c.bf16 %v5324_v61, %v5323_v60 }
0x1ea4   :  { %v4549_v47 = vmul.f32 0.015625, %v4539_v33  ;;  %v5326_v33 = vld [vmem:[%s8000_s12 + $0x98] sm:$0xff] }
0x1ea5   :  { %v4554_v20 = vsub.f32 %v4530_v40, %v4550_v38  ;;  %6277 = vmatprep.subr.bf16.mxu0 %v6276_v55  ;;  %v5325_v38 = vld [vmem:[%s8000_s12 + $0x90] sm:$0xff] }
0x1ea6   :  { %v4553_v35 = vsub.f32 %v4529_v54, %v4549_v47  ;;  %6279 = vmatpush3.bf16.msra.mxu0 %v6276_v55  ;;  %v6280_v47 = vpack.c.bf16 %v5326_v33, %v5325_v38 }
0x1ea7   :  { %v4558_v32 = vmul.f32 %v4554_v20, %v4554_v20 }
0x1ea8   :  { %v4557_v37 = vmul.f32 %v4553_v35, %v4553_v35  ;;  %6281 = vmatprep.subr.bf16.mxu0 %v6280_v47 }
0x1ea9   :  { %v4564_v26 = vsel %vm66_vm0, %v4558_v32, 0.0 }
0x1eaa   :  { %4565 = vadd.xlane.f32.xlu1 %v4564_v26  ;;  %v4561_v4 = vsel %vm66_vm0, %v4557_v37, 0.0  ;;  %6283 = vmatpush3.bf16.msra.mxu0 %v6280_v47  ;;  %v5329_v37 = vld [vmem:[%s8000_s12 + $0xb0] sm:$0xff]  ;;  %v5330_v26 = vld [vmem:[%s8000_s12 + $0xb8] sm:$0xff] }
0x1eab   :  { %4562 = vadd.xlane.f32.xlu0 %v4561_v4  ;;  %v6288_v4 = vpack.c.bf16 %v5330_v26, %v5329_v37 }
0x1eaf   :  { %v4545_v6 = vpop.xlane.xlu0 %4544 }
0x1eb0   :  { %v4551_v8 = vmul.f32 0.015625, %v4545_v6  ;;  %v5331_v6 = vld [vmem:[%s8000_s12 + $0xc0] sm:$0xff] }
0x1eb2   :  { %v4555_v28 = vsub.f32 %v4531_v45, %v4551_v8  ;;  %v5332_v8 = vld [vmem:[%s8000_s12 + $0xc8] sm:$0xff] }
0x1eb3   :  { %v4548_v51 = vpop.xlane.xlu0 %4547 }
0x1eb4   :  { %v4552_v53 = vmul.f32 0.015625, %v4548_v51  ;;  %v4559_v58 = vmul.f32 %v4555_v28, %v4555_v28  ;;  %v5333_v51 = vld [vmem:[%s8000_s12 + $0xd0] sm:$0xff] }
0x1eb6   :  { %v4556_v42 = vsub.f32 %v4532_v36, %v4552_v53  ;;  %v4567_v44 = vsel %vm66_vm0, %v4559_v58, 0.0  ;;  %v5334_v53 = vld [vmem:[%s8000_s12 + $0xd8] sm:$0xff] }
0x1eb7   :  { %4568 = vadd.xlane.f32.xlu0 %v4567_v44  ;;  %v6296_v58 = vpack.c.bf16 %v5334_v53, %v5333_v51  ;;  %v5336_v44 = vld [vmem:[%s8000_s12 + $0xe8] sm:$0xff] }
0x1eb8   :  { %v4560_v39 = vmul.f32 %v4556_v42, %v4556_v42 }
0x1eba   :  { %v4570_v57 = vsel %vm66_vm0, %v4560_v39, 0.0 }
0x1ebb   :  { %4571 = vadd.xlane.f32.xlu1 %v4570_v57  ;;  %v5337_v57 = vld [vmem:[%s8000_s12 + $0xf0] sm:$0xff] }
0x1ebc   :  { %v6304_v52 = vpack.c.bf16 %v5338_v48, %v5337_v57 }
0x1f37   :  { %v4566_v27 = vpop.xlane.xlu1 %4565 }
0x1f38   :  { %v4574_v3 = vmul.f32 0.015625, %v4566_v27  ;;  %v4563_v2 = vpop.xlane.xlu0 %4562 }
0x1f39   :  { %v4573_v23 = vmul.f32 0.015625, %v4563_v2 }
0x1f3a   :  { %v4578_v10 = vadd.f32 1e-12, %v4574_v3 }
0x1f3b   :  { %v4577_v29 = vadd.f32 1e-12, %v4573_v23 }
0x1f3c   :  { %6645 = vrsqrt.f32 %v4578_v10 }
0x1f3d   :  { %6647 = vrsqrt.f32 %v4577_v29 }
0x1f44   :  { %v4569_v31 = vpop.xlane.xlu0 %4568 }
0x1f45   :  { %v4575_v62 = vmul.f32 0.015625, %v4569_v31 }
0x1f46   :  { %v6646_v49 = vpop.eup %6645 }
0x1f47   :  { %v6648_v50 = vpop.eup %6647  ;;  %v4586_v14 = vmul.f32 %v6646_v49, %v4554_v20  ;;  %v4579_v25 = vadd.f32 1e-12, %v4575_v62  ;;  %v5327_v20 = vld [vmem:[%s8000_s12 + $0xa0] sm:$0xff] }
0x1f48   :  { %v4572_v9 = vpop.xlane.xlu1 %4571  ;;  %v4585_v15 = vmul.f32 %v6648_v50, %v4553_v35  ;;  %v5328_v35 = vld [vmem:[%s8000_s12 + $0xa8] sm:$0xff] }
0x1f49   :  { %6649 = vrsqrt.f32 %v4579_v25  ;;  %v4576_v16 = vmul.f32 0.015625, %v4572_v9  ;;  %v4596_v21 = vmul.f32 %v5307_v11, %v4586_v14  ;;  %v6284_v32 = vpack.c.bf16 %v5328_v35, %v5327_v20 }
0x1f4a   :  { %v4595_v24 = vmul.f32 %v5307_v11, %v4585_v15 }
0x1f4b   :  { %v4580_v56 = vadd.f32 1e-12, %v4576_v16  ;;  %v7827_v54 = vadd.f32 %v5308_v34, %v4596_v21  ;;  %6285 = vmatprep.subr.bf16.mxu0 %v6284_v32 }
0x1f4c   :  { %v7825_v40 = vadd.f32 %v5308_v34, %v4595_v24  ;;  %6287 = vmatpush3.bf16.msra.mxu0 %v6284_v32 }
0x1f4d   :  { %6651 = vrsqrt.f32 %v4580_v56  ;;  %6289 = vmatprep.subr.bf16.mxu0 %v6288_v4 }
0x1f4e   :  { %5922 = vmatprep.mubr.msk.f32.mxu1 %vm66_vm0, %v7825_v40 }
0x1f4f   :  { %5923 = vmatmul.mubr.msk.f32.vlgmr.msra.gmra.mrb[52].mxu1 %vm66_vm0, %v7827_v54 }
0x1f50   :  { %6291 = vmatpush3.bf16.msra.mxu0 %v6288_v4 }
0x1f53   :  { %v6650_v59 = vpop.eup %6649 }
0x1f54   :  { %v4587_v13 = vmul.f32 %v6650_v59, %v4555_v28  ;;  %v6292_v28 = vpack.c.bf16 %v5332_v8, %v5331_v6 }
0x1f56   :  { %v4597_v22 = vmul.f32 %v5307_v11, %v4587_v13  ;;  %6293 = vmatprep.subr.bf16.mxu0 %v6292_v28 }
0x1f57   :  { %v6652_v46 = vpop.eup %6651  ;;  %6295 = vmatpush3.bf16.msra.mxu0 %v6292_v28 }
0x1f58   :  { %v7833_v41 = vadd.f32 %v5308_v34, %v4597_v22  ;;  %v4588_v30 = vmul.f32 %v6652_v46, %v4556_v42  ;;  %6297 = vmatprep.subr.bf16.mxu0 %v6296_v58  ;;  %v5335_v42 = vld [vmem:[%s8000_s12 + $0xe0] sm:$0xff] }
0x1f59   :  { %v6300_v39 = vpack.c.bf16 %v5336_v44, %v5335_v42 }
0x1f5a   :  { %5925 = vmatprep.mubr.msk.f32.mxu1 %vm66_vm0, %v7833_v41  ;;  %v4598_v45 = vmul.f32 %v5307_v11, %v4588_v30 }
0x1f5b   :  { %6299 = vmatpush3.bf16.msra.mxu0 %v6296_v58 }
0x1f5c   :  { %v7837_v36 = vadd.f32 %v5308_v34, %v4598_v45  ;;  %6301 = vmatprep.subr.bf16.mxu0 %v6300_v39 }
0x1f5e   :  { %5926 = vmatmul.mubr.msk.f32.gmra.mrb[54].mxu1 %vm66_vm0, %v7837_v36 }
0x1f5f   :  { %6303 = vmatpush3.bf16.msra.mxu0 %v6300_v39 }
0x1f60   :  { %6305 = vmatprep.subr.bf16.mxu0 %v6304_v52 }
0x1f63   :  { %6307 = vmatpush3.bf16.msra.mxu0 %v6304_v52 }
0x2022   :  { %v5924_v17 = vpop.f32.mrb[52].mxu1 }
0x2023   :  { %v7892_v12 = vadd.f32 %v5924_v17, %v5318_v43  ;;  %v4704_v63 = vpop.f32.mrb[53].mxu1 }
0x2024   :  { %v7894_v18 = vadd.f32 %v5318_v43, %v4704_v63 }
0x2025   :  { %v7897_v0 = vmul.f32 0.70710677, %v7892_v12 }
0x2026   :  { %v7900_v7 = vmul.f32 0.70710677, %v7894_v18 }
0x2027   :  { %v4732_v1 = vand.u32 2147483647, %v7897_v0  ;;  %vm4812_vm15 = vcmp.ge.f32.partialorder %v7897_v0, 0.0 }
0x2028   :  { %v4731_v5 = vand.u32 2147483647, %v7900_v7  ;;  %vm4811_vm1 = vcmp.ge.f32.partialorder %v7900_v7, 0.0 }
0x2029   :  { %v4736_v19 = vmul.f32 0.3275911, %v4732_v1  ;;  %v4788_v31 = vsub.f32 0.0, %v4732_v1 }
0x202a   :  { %v4735_v27 = vmul.f32 0.3275911, %v4731_v5  ;;  %v4787_v49 = vsub.f32 0.0, %v4731_v5 }
0x202b   :  { %v4740_v3 = vadd.f32 1.0, %v4736_v19  ;;  %v4792_v9 = vmul.f32 %v4788_v31, %v4732_v1 }
0x202c   :  { %v4739_v2 = vadd.f32 1.0, %v4735_v27  ;;  %v4791_v21 = vmul.f32 %v4787_v49, %v4731_v5 }
0x202d   :  { %6653 = vrcp.f32 %v4740_v3  ;;  %v4797_v46 = vmul.f32 1.442695, %v4792_v9 }
0x202e   :  { %6655 = vrcp.f32 %v4739_v2  ;;  %v4795_v61 = vmul.f32 1.442695, %v4791_v21 }
0x2031   :  { %v5927_v23 = vpop.f32.mrb[54].mxu1 }
0x2032   :  { %v7904_v10 = vadd.f32 %v5927_v23, %v5318_v43  ;;  %v4714_v29 = vpop.f32.mrb[55].mxu1 }
0x2033   :  { %v7906_v62 = vadd.f32 %v5318_v43, %v4714_v29 }
0x2034   :  { %v7909_v11 = vmul.f32 0.70710677, %v7904_v10 }
0x2035   :  { %v7912_v50 = vmul.f32 0.70710677, %v7906_v62 }
0x2036   :  { %v4734_v14 = vand.u32 2147483647, %v7909_v11  ;;  %vm4814_vm2 = vcmp.ge.f32.partialorder %v7909_v11, 0.0 }
0x2037   :  { %v6654_v25 = vpop.eup %6653  ;;  %v4733_v15 = vand.u32 2147483647, %v7912_v50  ;;  %vm4813_vm3 = vcmp.ge.f32.partialorder %v7912_v50, 0.0 }
0x2038   :  { %v6656_v16 = vpop.eup %6655  ;;  %v4752_v34 = vmul.f32 1.0614054, %v6654_v25  ;;  %v4738_v24 = vmul.f32 0.3275911, %v4734_v14  ;;  %v4790_v32 = vsub.f32 0.0, %v4734_v14 }
0x2039   :  { %v4737_v56 = vmul.f32 0.3275911, %v4733_v15  ;;  %v4751_v59 = vmul.f32 1.0614054, %v6656_v16  ;;  %v4789_v37 = vsub.f32 0.0, %v4733_v15 }
0x203a   :  { %v4756_v13 = vadd.f32 -1.4531521, %v4752_v34  ;;  %v4742_v22 = vadd.f32 1.0, %v4738_v24  ;;  %v4794_v51 = vmul.f32 %v4790_v32, %v4734_v14 }
0x203b   :  { %v4741_v30 = vadd.f32 1.0, %v4737_v56  ;;  %v4755_v45 = vadd.f32 -1.4531521, %v4751_v59  ;;  %v4793_v58 = vmul.f32 %v4789_v37, %v4733_v15  ;;  %v4723_v56 = vmul.f32 0.5, %v7894_v18 }
0x203c   :  { %v4760_v60 = vmul.f32 %v6654_v25, %v4756_v13  ;;  %6657 = vrcp.f32 %v4742_v22  ;;  %v4801_v1 = vmul.f32 1.442695, %v4794_v51  ;;  %v4724_v22 = vmul.f32 0.5, %v7892_v12 }
0x203d   :  { %6659 = vrcp.f32 %v4741_v30  ;;  %v4759_v55 = vmul.f32 %v6656_v16, %v4755_v45  ;;  %v4799_v19 = vmul.f32 1.442695, %v4793_v58  ;;  %v5340_v58 = vld [vmem:[%s8001_s13 + $0x1] ss:$0 sm:$0xff] }
0x203e   :  { %v4764_v38 = vadd.f32 1.4214138, %v4760_v60  ;;  %6661 = vpow2.f32 %v4797_v46 }
0x203f   :  { %v4763_v33 = vadd.f32 1.4214138, %v4759_v55  ;;  %6663 = vpow2.f32 %v4795_v61 }
0x2040   :  { %v4768_v47 = vmul.f32 %v6654_v25, %v4764_v38  ;;  %6665 = vpow2.f32 %v4801_v1 }
0x2041   :  { %v4767_v20 = vmul.f32 %v6656_v16, %v4763_v33  ;;  %6667 = vpow2.f32 %v4799_v19 }
0x2042   :  { %v4772_v35 = vadd.f32 -0.28449672, %v4768_v47 }
0x2043   :  { %v4771_v26 = vadd.f32 -0.28449672, %v4767_v20 }
0x2044   :  { %v4776_v4 = vmul.f32 %v6654_v25, %v4772_v35 }
0x2045   :  { %v4775_v6 = vmul.f32 %v6656_v16, %v4771_v26 }
0x2046   :  { %v6658_v8 = vpop.eup %6657  ;;  %v4780_v28 = vadd.f32 0.2548296, %v4776_v4 }
0x2047   :  { %v6660_v53 = vpop.eup %6659  ;;  %v4779_v42 = vadd.f32 0.2548296, %v4775_v6  ;;  %v4754_v44 = vmul.f32 1.0614054, %v6658_v8  ;;  %v4725_v6 = vmul.f32 0.5, %v7906_v62 }
0x2048   :  { %v4784_v39 = vmul.f32 %v6654_v25, %v4780_v28  ;;  %v4753_v57 = vmul.f32 1.0614054, %v6660_v53  ;;  %v6662_v48 = vpop.eup %6661 }
0x2049   :  { %v4783_v52 = vmul.f32 %v6656_v16, %v4779_v42  ;;  %v4758_v43 = vadd.f32 -1.4531521, %v4754_v44  ;;  %v6664_v17 = vpop.eup %6663 }
0x204a   :  { %v4804_v63 = vmul.f32 %v6662_v48, %v4784_v39  ;;  %v4757_v5 = vadd.f32 -1.4531521, %v4753_v57  ;;  %v6666_v7 = vpop.eup %6665 }
0x204b   :  { %v4803_v27 = vmul.f32 %v6664_v17, %v4783_v52  ;;  %v4762_v3 = vmul.f32 %v6658_v8, %v4758_v43  ;;  %v6668_v33 = vpop.eup %6667 }
0x204c   :  { %v4808_v2 = vsub.f32 1.0, %v4804_v63  ;;  %v4761_v23 = vmul.f32 %v6660_v53, %v4757_v5 }
0x204d   :  { %v4807_v29 = vsub.f32 1.0, %v4803_v27  ;;  %v4766_v31 = vadd.f32 1.4214138, %v4762_v3 }
0x204e   :  { %v4816_v49 = vsub.f32 0.0, %v4808_v2  ;;  %v4765_v14 = vadd.f32 1.4214138, %v4761_v23 }
0x204f   :  { %v4815_v25 = vsub.f32 0.0, %v4807_v29  ;;  %v4770_v9 = vmul.f32 %v6658_v8, %v4766_v31 }
0x2050   :  { %v4820_v15 = vsel %vm4812_vm15, %v4808_v2, %v4816_v49  ;;  %v4769_v16 = vmul.f32 %v6660_v53, %v4765_v14 }
0x2051   :  { %v4824_v34 = vadd.f32 1.0, %v4820_v15  ;;  %v4819_v21 = vsel %vm4811_vm1, %v4807_v29, %v4815_v25  ;;  %v4774_v24 = vadd.f32 -0.28449672, %v4770_v9 }
0x2052   :  { %v4823_v59 = vadd.f32 1.0, %v4819_v21  ;;  %v4773_v13 = vadd.f32 -0.28449672, %v4769_v16 }
0x2053   :  { %v4778_v46 = vmul.f32 %v6658_v8, %v4774_v24  ;;  %v4828_v0 = vmul.f32 %v4824_v34, %v4724_v22 }
0x2054   :  { %v4827_v30 = vmul.f32 %v4823_v59, %v4723_v56  ;;  %v4777_v45 = vmul.f32 %v6660_v53, %v4773_v13  ;;  %v5021_v59 = vld [vmem:[%s8004_s16] sm:$0xff]  ;;  %v5022_v13 = vld [vmem:[%s8004_s16 + $0x8] sm:$0xff] }
0x2055   :  { %v4782_v60 = vadd.f32 0.2548296, %v4778_v46  ;;  %v6308_v22 = vpack.c.bf16 %v5022_v13, %v5021_v59  ;;  %v5023_v46 = vld [vmem:[%s8004_s16 + $0x10] sm:$0xff] }
0x2056   :  { %5960 = vmatprep.mubr.f32.mxu0 %v4827_v30  ;;  %v4781_v61 = vadd.f32 0.2548296, %v4777_v45  ;;  %v5024_v30 = vld [vmem:[%s8004_s16 + $0x18] sm:$0xff] }
0x2057   :  { %5961 = vmatmul.mubr.f32.vlgmr.msra.gmra.mrb[44].mxu0 %v4828_v0  ;;  %v4786_v55 = vmul.f32 %v6658_v8, %v4782_v60  ;;  %v4726_v8 = vmul.f32 0.5, %v7904_v10  ;;  %6309 = vmatprep.subr.bf16.mxu1 %v6308_v22  ;;  %v6312_v45 = vpack.c.bf16 %v5024_v30, %v5023_v46  ;;  %v5025_v0 = vld [vmem:[%s8004_s16 + $0x20] sm:$0xff]  ;;  %v5026_v60 = vld [vmem:[%s8004_s16 + $0x28] sm:$0xff] }
0x2058   :  { %v4785_v38 = vmul.f32 %v6660_v53, %v4781_v61  ;;  %6311 = vmatpush3.bf16.msra.mxu1 %v6308_v22  ;;  %v6316_v61 = vpack.c.bf16 %v5026_v60, %v5025_v0 }
0x2059   :  { %v4806_v47 = vmul.f32 %v6666_v7, %v4786_v55  ;;  %6313 = vmatprep.subr.bf16.mxu1 %v6312_v45  ;;  %v5027_v55 = vld [vmem:[%s8004_s16 + $0x30] sm:$0xff]  ;;  %v5028_v7 = vld [vmem:[%s8004_s16 + $0x38] sm:$0xff] }
0x205a   :  { %v4805_v20 = vmul.f32 %v6668_v33, %v4785_v38  ;;  %v6320_v38 = vpack.c.bf16 %v5028_v7, %v5027_v55 }
0x205b   :  { %v4810_v35 = vsub.f32 1.0, %v4806_v47 }
0x205c   :  { %v4809_v18 = vsub.f32 1.0, %v4805_v20  ;;  %6315 = vmatpush3.bf16.msra.mxu1 %v6312_v45 }
0x205d   :  { %v4818_v32 = vsub.f32 0.0, %v4810_v35  ;;  %6317 = vmatprep.subr.bf16.mxu1 %v6316_v61 }
0x205e   :  { %v4817_v12 = vsub.f32 0.0, %v4809_v18 }
0x205f   :  { %v4822_v37 = vsel %vm4814_vm2, %v4810_v35, %v4818_v32 }
0x2060   :  { %v4821_v26 = vsel %vm4813_vm3, %v4809_v18, %v4817_v12  ;;  %v4826_v4 = vadd.f32 1.0, %v4822_v37  ;;  %6319 = vmatpush3.bf16.msra.mxu1 %v6316_v61 }
0x2061   :  { %v4825_v28 = vadd.f32 1.0, %v4821_v26  ;;  %6321 = vmatprep.subr.bf16.mxu1 %v6320_v38  ;;  %v5343_v26 = vld [vmem:[%s8002_s14 + $0x1] ss:$0 sm:$0xff] }
0x2062   :  { %v4830_v53 = vmul.f32 %v4826_v4, %v4726_v8 }
0x2063   :  { %v4829_v51 = vmul.f32 %v4825_v28, %v4725_v6 }
0x2064   :  { %6323 = vmatpush3.bf16.msra.mxu1 %v6320_v38 }
0x2065   :  { %5963 = vmatprep.mubr.f32.mxu0 %v4829_v51 }
0x2066   :  { %5964 = vmatmul.mubr.f32.gmra.mrb[46].mxu0 %v4830_v53 }
0x212a   :  { %v5962_v11 = vpop.f32.mrb[44].mxu0 }
0x212b   :  { %v4928_v42 = vadd.f32 %v5962_v11, %v5340_v58  ;;  %v4922_v44 = vpop.f32.mrb[45].mxu0  ;;  %v5344_v11 = vld [vmem:[%s8003_s15 + $0x1] ss:$0 sm:$0xff] }
0x212c   :  { %v4923_v50 = vadd.f32 %v5340_v58, %v4922_v44 }
0x212d   :  { %v4942_v39 = vadd.f32 %v4928_v42, %v7827_v54 }
0x212e   :  { %v4941_v57 = vadd.f32 %v4923_v50, %v7825_v40 }
0x212f   :  { %v4952_v62 = vsel %vm66_vm0, %v4942_v39, 0.0 }
0x2130   :  { %4953 = vadd.xlane.f32.xlu1 %v4952_v62  ;;  %v4949_v10 = vsel %vm66_vm0, %v4941_v57, 0.0 }
0x2131   :  { %4950 = vadd.xlane.f32.xlu0 %v4949_v10 }
0x2139   :  { %v5965_v48 = vpop.f32.mrb[46].mxu0 }
0x213a   :  { %v4938_v52 = vadd.f32 %v5965_v48, %v5340_v58  ;;  %v4932_v43 = vpop.f32.mrb[47].mxu0 }
0x213b   :  { %v4933_v17 = vadd.f32 %v5340_v58, %v4932_v43 }
0x213c   :  { %v4944_v63 = vadd.f32 %v4938_v52, %v7837_v36 }
0x213d   :  { %v4943_v1 = vadd.f32 %v4933_v17, %v7833_v41 }
0x213e   :  { %v4958_v5 = vsel %vm66_vm0, %v4944_v63, 0.0 }
0x213f   :  { %4959 = vadd.xlane.f32.xlu1 %v4958_v5  ;;  %v4955_v54 = vsel %vm66_vm0, %v4943_v1, 0.0  ;;  %v5345_v5 = vld [vmem:[%s8005_s17] ss:$0 sm:$0xff] }
0x2140   :  { %4956 = vadd.xlane.f32.xlu0 %v4955_v54 }
0x21bd   :  { %v4954_v40 = vpop.xlane.xlu1 %4953 }
0x21be   :  { %v4962_v19 = vmul.f32 0.015625, %v4954_v40  ;;  %v4951_v27 = vpop.xlane.xlu0 %4950 }
0x21bf   :  { %v4961_v3 = vmul.f32 0.015625, %v4951_v27 }
0x21c0   :  { %v4966_v2 = vsub.f32 %v4942_v39, %v4962_v19 }
0x21c1   :  { %v4965_v23 = vsub.f32 %v4941_v57, %v4961_v3 }
0x21c2   :  { %v4970_v29 = vmul.f32 %v4966_v2, %v4966_v2 }
0x21c3   :  { %v4969_v31 = vmul.f32 %v4965_v23, %v4965_v23 }
0x21c4   :  { %v4976_v49 = vsel %vm66_vm0, %v4970_v29, 0.0 }
0x21c5   :  { %4977 = vadd.xlane.f32.xlu1 %v4976_v49  ;;  %v4973_v36 = vsel %vm66_vm0, %v4969_v31, 0.0 }
0x21c6   :  { %4974 = vadd.xlane.f32.xlu0 %v4973_v36 }
0x21cc   :  { %v4960_v41 = vpop.xlane.xlu1 %4959 }
0x21cd   :  { %v4964_v14 = vmul.f32 0.015625, %v4960_v41  ;;  %v4957_v25 = vpop.xlane.xlu0 %4956 }
0x21ce   :  { %v4963_v9 = vmul.f32 0.015625, %v4957_v25 }
0x21cf   :  { %v4968_v15 = vsub.f32 %v4944_v63, %v4964_v14 }
0x21d0   :  { %v4967_v16 = vsub.f32 %v4943_v1, %v4963_v9 }
0x21d1   :  { %v4972_v34 = vmul.f32 %v4968_v15, %v4968_v15 }
0x21d2   :  { %v4971_v21 = vmul.f32 %v4967_v16, %v4967_v16 }
0x21d3   :  { %v4982_v24 = vsel %vm66_vm0, %v4972_v34, 0.0 }
0x21d4   :  { %4983 = vadd.xlane.f32.xlu1 %v4982_v24  ;;  %v4979_v56 = vsel %vm66_vm0, %v4971_v21, 0.0 }
0x21d5   :  { %4980 = vadd.xlane.f32.xlu0 %v4979_v56 }
0x2252   :  { %v4978_v33 = vpop.xlane.xlu1 %4977 }
0x2253   :  { %v4986_v47 = vmul.f32 0.015625, %v4978_v33  ;;  %v4975_v20 = vpop.xlane.xlu0 %4974 }
0x2254   :  { %v4985_v35 = vmul.f32 0.015625, %v4975_v20 }
0x2255   :  { %v4990_v18 = vadd.f32 1e-12, %v4986_v47 }
0x2256   :  { %v4989_v32 = vadd.f32 1e-12, %v4985_v35 }
0x2257   :  { %6669 = vrsqrt.f32 %v4990_v18 }
0x2258   :  { %6671 = vrsqrt.f32 %v4989_v32 }
0x2261   :  { %v6670_v12 = vpop.eup %6669  ;;  %v4984_v37 = vpop.xlane.xlu1 %4983 }
0x2262   :  { %v6672_v4 = vpop.eup %6671  ;;  %v4998_v6 = vmul.f32 %v6670_v12, %v4966_v2  ;;  %v4988_v28 = vmul.f32 0.015625, %v4984_v37  ;;  %v4981_v8 = vpop.xlane.xlu0 %4980 }
0x2263   :  { %v4987_v51 = vmul.f32 0.015625, %v4981_v8  ;;  %v4997_v53 = vmul.f32 %v6672_v4, %v4965_v23 }
0x2264   :  { %v4992_v58 = vadd.f32 1e-12, %v4988_v28  ;;  %v5008_v42 = vmul.f32 %v5343_v26, %v4998_v6 }
0x2265   :  { %v4991_v44 = vadd.f32 1e-12, %v4987_v51  ;;  %v5007_v50 = vmul.f32 %v5343_v26, %v4997_v53 }
0x2266   :  { %6673 = vrsqrt.f32 %v4992_v58  ;;  %v5018_v57 = vadd.f32 %v5344_v11, %v5008_v42 }
0x2267   :  { %6675 = vrsqrt.f32 %v4991_v44  ;;  %v5017_v39 = vadd.f32 %v5344_v11, %v5007_v50 }
0x2269   :  { %5982 = vmatprep.mubr.msk.f32.mxu1 %vm66_vm0, %v5017_v39 }
0x226a   :  { %5983 = vmatmul.mubr.msk.f32.vlgmr.msra.gmra.mrb[56].mxu1 %vm66_vm0, %v5018_v57 }
0x2270   :  { %v6674_v62 = vpop.eup %6673 }
0x2271   :  { %v6676_v10 = vpop.eup %6675  ;;  %v5000_v48 = vmul.f32 %v6674_v62, %v4968_v15 }
0x2272   :  { %v4999_v52 = vmul.f32 %v6676_v10, %v4967_v16 }
0x2273   :  { %v5010_v43 = vmul.f32 %v5343_v26, %v5000_v48 }
0x2274   :  { %v5009_v17 = vmul.f32 %v5343_v26, %v4999_v52 }
0x2275   :  { %v5020_v1 = vadd.f32 %v5344_v11, %v5010_v43 }
0x2276   :  { %v5019_v63 = vadd.f32 %v5344_v11, %v5009_v17 }
0x2278   :  { %5985 = vmatprep.mubr.msk.f32.mxu1 %vm66_vm0, %v5019_v63 }
0x2279   :  { %5986 = vmatmul.mubr.msk.f32.gmra.mrb[58].mxu1 %vm66_vm0, %v5020_v1 }
0x233d   :  { %v5984_v54 = vpop.f32.mrb[56].mxu1 }
0x233e   :  { %v5120_v40 = vadd.f32 %v5984_v54, %v5345_v5  ;;  %v5114_v19 = vpop.f32.mrb[57].mxu1 }
0x233f   :  { %v5115_v27 = vadd.f32 %v5345_v5, %v5114_v19 }
0x2340   :  { %5134 = vst [vmem:[#allocation3 + $0x8] sm:$0xff] %v5120_v40 }
0x2341   :  { %5133 = vst [vmem:[#allocation3] sm:$0xff] %v5115_v27 }
0x234c   :  { %v5987_v3 = vpop.f32.mrb[58].mxu1 }
0x234d   :  { %v5130_v2 = vadd.f32 %v5987_v3, %v5345_v5  ;;  %v5124_v23 = vpop.f32.mrb[59].mxu1 }
0x234e   :  { %v5125_v29 = vadd.f32 %v5345_v5, %v5124_v23 }
0x234f   :  { %5136 = vst [vmem:[#allocation3 + $0x18] sm:$0xff] %v5130_v2 }
0x2350   :  { %5135 = vst [vmem:[#allocation3 + $0x10] sm:$0xff] %v5125_v29 }
0x2351   :  { %6688 = shalt.err (!%p6685_p4)
}
0x2352   :  { %s6689_s25 = scalar_lea.hbm %s8006_s18, 512 }
0x2353   :  { %p6690_p5 = scmp.ne.s32.totalorder %s8006_s18, %s6689_s25  ;;  %p6693_p6 = scmp.lt.u32.totalorder %s6689_s25, %s8006_s18 }
0x2355   :  { %p6695_p7 = pnand %p6693_p6, %p6690_p5 }
0x2357   :  { %6698 = shalt.err (!%p6695_p7)
}
0x2358   :  { %s6712_s27 = smov 128   ;;  %s6713_s3 = smov 8  }
0x2359   :  { %5148 = dma.vmem_to_hbm [thread:$0]  %s5143_s22, 512, %s8006_s18, [#allocation4], %s6712_s27, %s6712_s27, %s6713_s3  }
0x235a   :  { %6699 = dma.done.wait [#allocation4], 512  }
0x235b   :  { %6700 = vsyncadd [#allocation4], 4294966784 }
0x235c   :  { %5152 = vsyncpa [#allocation4], 1 }

</bundles_post_ra>
